<compile_context>
chip_gen: v6e
topology: v6e:2x2x1
jax: 0.10.0
libtpu: 0.0.40
codegen_flags: <defaults>
</compile_context>

<pallas_src>
import functools

import jax
import jax.numpy as jnp
from jax.experimental import pallas as pl
from jax.experimental.pallas import tpu as pltpu

A_PAD = 128   # lane-dense padded width of the q-value output


def _round_up(n, m):
    return ((n + m - 1) // m) * m


# ---------------------------------------------------------------------------
# Fused Pallas kernel: conv1+relu -> conv2+relu -> conv3+relu -> fc
# ---------------------------------------------------------------------------
def _dqn_fused_kernel(x_ref, c_ref, w_ref, o_ref, *, width, hw, batch,
                      cin0, c1, c2, c3, num_actions, mask_rep,
                      r_w2, r_w3, r_ssum, r_sel, r_wfs, r_bias):
    bhw = batch * hw
    a_c3 = num_actions * c3
    a_pad = o_ref.shape[1]

    def conv3x3_relu(x, cin, cout, wrow, bias_row):
        # 3x3 "same" conv + ReLU as a single (B*HW, 9*Cin) @ (9*Cin, Cout) matmul.
        wmat = w_ref[wrow:wrow + 9 * cin, 0:cout]                      # bf16
        taps = []
        for dy in range(3):
            for dx in range(3):
                tap = dy * 3 + dx
                shift = (dy - 1) * width + (dx - 1)
                # tap[r] = x[(r + shift) mod B*HW]; every row whose tap falls
                # outside its image (incl. every wrapped row) is zeroed.
                t = x if shift == 0 else pltpu.roll(x, shift=(-shift) % bhw, axis=0)
                if tap != 4:                         # center tap always valid
                    t = t * c_ref[0:bhw, tap * mask_rep:tap * mask_rep + cin]
                taps.append(t)
        xcat = jnp.concatenate(taps, axis=1).astype(jnp.bfloat16)      # (B*HW, 9*Cin)
        acc = jnp.dot(xcat, wmat, preferred_element_type=jnp.float32)
        bias = c_ref[bias_row:bias_row + 1, 0:cout]                    # (1, Cout) f32
        return jnp.maximum(acc + bias, 0.0)

    x = x_ref[...]                                                     # (B*HW, Cin0) f32
    x = conv3x3_relu(x, cin0, c1, 0, r_bias)
    x = conv3x3_relu(x, c1, c2, r_w2, r_bias + 1)
    x = conv3x3_relu(x, c2, c3, r_w3, r_bias + 2)                      # (B*HW, c3) f32

    # fc head: q[b, a] = sum_{p, c} x[b*HW + p, c] * wf[c*HW + p, a] + b_fc[a]
    # done as two MXU matmuls (no cross-lane reductions, no per-action loop).
    wfs = c_ref[r_wfs:r_wfs + bhw, 0:a_c3]                             # (B*HW, A*c3) f32
    xrep = jnp.concatenate([x] * num_actions, axis=1)                  # (B*HW, A*c3) f32
    g = (xrep * wfs).astype(jnp.bfloat16)
    sel = w_ref[r_sel:r_sel + batch, 0:bhw]                            # (B, B*HW) bf16 0/1
    tsel = jnp.dot(sel, g, preferred_element_type=jnp.float32)         # (B, A*c3)
    ssum = w_ref[r_ssum:r_ssum + a_c3, 0:a_pad]                        # (A*c3, A_PAD) bf16 0/1
    q = jnp.dot(tsel.astype(jnp.bfloat16), ssum, preferred_element_type=jnp.float32)
    o_ref[...] = q + c_ref[r_bias + 3:r_bias + 4, 0:a_pad]             # one dense (B,128) store


# ---------------------------------------------------------------------------
# One-time (cold path) parameter / constant packing into two slabs
# ---------------------------------------------------------------------------
def pack_params(params, batch, h, w):
    """Repack PyTorch-layout weights into two coalesced kernel slabs.

    Returns (packed, meta): packed = {"cslab": f32, "wslab": bf16},
    meta = dict of static ints consumed by the kernel.
    """
    hw = h * w
    bhw = batch * hw
    cin0 = params["w1"].shape[1]
    c1 = params["w1"].shape[0]
    c2 = params["w2"].shape[0]
    c3 = params["w3"].shape[0]
    num_actions = params["bf"].shape[0]
    a_c3 = num_actions * c3
    mask_rep = max(cin0, c1, c2)          # widest conv input-channel count

    # --- per-tap validity masks (shared by every conv layer) ---------------
    hh = jnp.arange(h).reshape(h, 1)
    ww = jnp.arange(w).reshape(1, w)
    mask_cols = []
    for dy in range(3):
        for dx in range(3):
            m = ((hh + dy - 1 >= 0) & (hh + dy - 1 < h) &
                 (ww + dx - 1 >= 0) & (ww + dx - 1 < w)).astype(jnp.float32)
            # rows are batch-major (b, h, w); repeat over batch and channels
            mask_cols.append(jnp.tile(m.reshape(hw, 1), (batch, mask_rep)))
    mask_block = jnp.concatenate(mask_cols, axis=1)            # (B*HW, 9*mask_rep)

    # --- fc weight slab: Wslab[b*HW + p, a*c3 + c] = wf[c*HW + p, a] --------
    # (folds PyTorch's NCHW flatten into the weight; no runtime transpose)
    wf3 = params["wf"].reshape(c3, hw, num_actions)                    # [c, p, a]
    wf_rows = jnp.transpose(wf3, (1, 2, 0)).reshape(hw, a_c3)          # [p, a*c3+c]
    wf_slab = jnp.tile(wf_rows, (batch, 1))                            # (B*HW, A*c3)

    # --- f32 constant slab: masks | fc-weight slab | biases ----------------
    wc = max(9 * mask_rep, a_c3, A_PAD)
    r_wfs = _round_up(bhw, 8)
    r_bias = _round_up(r_wfs + bhw, 8)
    rc = _round_up(r_bias + 4, 8)
    cslab = jnp.zeros((rc, wc), jnp.float32)
    cslab = cslab.at[0:bhw, 0:9 * mask_rep].set(mask_block)
    cslab = cslab.at[r_wfs:r_wfs + bhw, 0:a_c3].set(wf_slab)
    cslab = cslab.at[r_bias + 0, 0:c1].set(params["b1"])
    cslab = cslab.at[r_bias + 1, 0:c2].set(params["b2"])
    cslab = cslab.at[r_bias + 2, 0:c3].set(params["b3"])
    cslab = cslab.at[r_bias + 3, 0:num_actions].set(params["bf"])

    # --- bf16 weight slab: conv taps | Ssum | Sel ---------------------------
    def conv_w(w_oihw):   # (Cout, Cin, 3, 3) -> (9*Cin, Cout), row = tap*Cin + ci
        cout, cin = w_oihw.shape[0], w_oihw.shape[1]
        return jnp.transpose(w_oihw, (2, 3, 1, 0)).reshape(9 * cin, cout)

    ssum = (jnp.arange(a_c3)[:, None] // c3 ==
            jnp.arange(A_PAD)[None, :]).astype(jnp.float32)            # (A*c3, A_PAD)
    sel = (jnp.arange(bhw)[None, :] // hw ==
           jnp.arange(batch)[:, None]).astype(jnp.float32)             # (B, B*HW)

    r_w1 = 0
    r_w2 = _round_up(r_w1 + 9 * cin0, 16)     # 16-row alignment for bf16 tiles
    r_w3 = _round_up(r_w2 + 9 * c1, 16)
    r_ssum = _round_up(r_w3 + 9 * c2, 16)
    r_sel = _round_up(r_ssum + a_c3, 16)
    rw = _round_up(r_sel + batch, 16)
    ww_cols = max(c1, c2, c3, A_PAD, bhw)
    wslab = jnp.zeros((rw, ww_cols), jnp.float32)
    wslab = wslab.at[r_w1:r_w1 + 9 * cin0, 0:c1].set(conv_w(params["w1"]))
    wslab = wslab.at[r_w2:r_w2 + 9 * c1, 0:c2].set(conv_w(params["w2"]))
    wslab = wslab.at[r_w3:r_w3 + 9 * c2, 0:c3].set(conv_w(params["w3"]))
    wslab = wslab.at[r_ssum:r_ssum + a_c3, 0:A_PAD].set(ssum)
    wslab = wslab.at[r_sel:r_sel + batch, 0:bhw].set(sel)
    wslab = wslab.astype(jnp.bfloat16)

    meta = dict(width=w, hw=hw, batch=batch, cin0=cin0, c1=c1, c2=c2, c3=c3,
                num_actions=num_actions, mask_rep=mask_rep,
                r_w2=r_w2, r_w3=r_w3, r_ssum=r_ssum, r_sel=r_sel,
                r_wfs=r_wfs, r_bias=r_bias)
    return {"cslab": cslab, "wslab": wslab}, meta


# ---------------------------------------------------------------------------
# Forward pass wrapper (single pallas_call, 3 input DMAs total)
# ---------------------------------------------------------------------------
def dqn_forward(state_nchw, cslab, wslab, *, meta):
    b, cin, h, w = state_nchw.shape
    assert b == meta["batch"] and cin == meta["cin0"] and h * w == meta["hw"]
    hw = h * w
    num_actions = meta["num_actions"]
    c1, c2, c3 = meta["c1"], meta["c2"], meta["c3"]

    # NCHW -> (B*HW, Cin): rows (b, h, w), channels in lanes.  ~3 KB relayout,
    # fused by XLA into the pallas_call prologue (kept outside the kernel for
    # robustness; see notes).
    x0 = jnp.transpose(state_nchw, (0, 2, 3, 1)).reshape(b * hw, cin)

    flops = (2 * b * hw * 9 * (cin * c1 + c1 * c2 + c2 * c3)
             + 2 * b * (b * hw) * num_actions * c3
             + 2 * b * num_actions * c3 * A_PAD)
    bytes_accessed = (x0.size * 4 + cslab.size * 4 + wslab.size * 2
                      + b * A_PAD * 4)

    out = pl.pallas_call(
        functools.partial(_dqn_fused_kernel, **meta),
        out_shape=jax.ShapeDtypeStruct((b, A_PAD), jnp.float32),
        cost_estimate=pl.CostEstimate(flops=flops, transcendentals=0,
                                      bytes_accessed=bytes_accessed),
    )(x0, cslab, wslab)
    return out[:, :num_actions]


# ---------------------------------------------------------------------------
# Parameter init (mirrors the PyTorch module's layout) + pure-JAX reference
# ---------------------------------------------------------------------------
def init_params(key, num_obsv_states, num_actions):
    c1, c2, c3 = 6, 16, 32
    ks = jax.random.split(key, 8)

    def w_init(k, shape, fan_in):
        return (jax.random.normal(k, shape, jnp.float32) / jnp.sqrt(fan_in)).astype(jnp.float32)

    return {
        "w1": w_init(ks[0], (c1, 6, 3, 3), 6 * 9),
        "b1": w_init(ks[1], (c1,), 6 * 9),
        "w2": w_init(ks[2], (c2, c1, 3, 3), c1 * 9),
        "b2": w_init(ks[3], (c2,), c1 * 9),
        "w3": w_init(ks[4], (c3, c2, 3, 3), c2 * 9),
        "b3": w_init(ks[5], (c3,), c2 * 9),
        # Stored as (in_features, num_actions); PyTorch Linear stores the transpose.
        "wf": w_init(ks[6], (c3 * num_obsv_states, num_actions), c3 * num_obsv_states),
        "bf": w_init(ks[7], (num_actions,), c3 * num_obsv_states),
    }


def reference_forward(state_nchw, params):
    """Pure-JAX reference mirroring the PyTorch module (for verification)."""
    def conv(x, wgt, bias):
        y = jax.lax.conv_general_dilated(
            x, wgt, window_strides=(1, 1), padding="SAME",
            dimension_numbers=("NCHW", "OIHW", "NCHW"))
        return jax.nn.relu(y + bias.reshape(1, -1, 1, 1))

    x = conv(state_nchw, params["w1"], params["b1"])
    x = conv(x, params["w2"], params["b2"])
    x = conv(x, params["w3"], params["b3"])
    flat = x.reshape(x.shape[0], -1)
    return flat @ params["wf"] + params["bf"]


if __name__ == "__main__":
    # Shapes consistent with the module: batch=2, 6 input channels,
    # 8x8 map => num_obsv_states = 64, num_actions = 5.
    B, H, W = 2, 8, 8
    num_obsv_states = H * W
    num_actions = 5

    key = jax.random.PRNGKey(0)
    k_state, k_params = jax.random.split(key)
    state = jax.random.normal(k_state, (B, 6, H, W), jnp.float32)
    params = init_params(k_params, num_obsv_states, num_actions)
    packed, meta = pack_params(params, B, H, W)   # one-time weight/constant repack

    fwd = jax.jit(functools.partial(dqn_forward, meta=meta))
    q_values = jax.block_until_ready(fwd(state, packed["cslab"], packed["wslab"]))
    q_ref = jax.block_until_ready(reference_forward(state, params))

    assert q_values.shape == (B, num_actions)
    # bf16 MXU operands (f32 accumulation) => loosened tolerance vs f32 reference.
    assert jnp.allclose(q_values, q_ref, rtol=5e-2, atol=5e-2), (q_values, q_ref)
    print("KERNEL_OK")
</pallas_src>

<mosaic_0001>
module attributes {stable_mosaic.version = 11 : i64} {
  func.func @_dqn_fused_kernel(%arg0: memref<128x6xf32, #tpu.memory_space<vmem>>, %arg1: memref<264x160xf32, #tpu.memory_space<vmem>>, %arg2: memref<448x128xbf16, #tpu.memory_space<vmem>>, %arg3: memref<2x128xf32, #tpu.memory_space<vmem>>) attributes {dimension_semantics = [], scalar_prefetch = 0 : i64, scratch_operands = 0 : i64, tpu.core_type = #tpu.core_type<tc>} {
    %c0 = arith.constant 0 : index
    %c0_0 = arith.constant 0 : index
    %0 = vector.load %arg0[%c0, %c0_0] : memref<128x6xf32, #tpu.memory_space<vmem>>, vector<128x6xf32>
    %c0_1 = arith.constant 0 : index
    %c0_2 = arith.constant 0 : index
    %1 = vector.load %arg2[%c0_1, %c0_2] : memref<448x128xbf16, #tpu.memory_space<vmem>>, vector<54x6xbf16>
    %c9_i32 = arith.constant 9 : i32
    %2 = tpu.dynamic_rotate %0 by %c9_i32 dim 0 : vector<128x6xf32>, i32 -> vector<128x6xf32>
    %c0_3 = arith.constant 0 : index
    %c0_4 = arith.constant 0 : index
    %3 = vector.load %arg1[%c0_3, %c0_4] : memref<264x160xf32, #tpu.memory_space<vmem>>, vector<128x6xf32>
    %4 = arith.mulf %2, %3 : vector<128x6xf32>
    %c8_i32 = arith.constant 8 : i32
    %5 = tpu.dynamic_rotate %0 by %c8_i32 dim 0 : vector<128x6xf32>, i32 -> vector<128x6xf32>
    %c0_5 = arith.constant 0 : index
    %c16 = arith.constant 16 : index
    %6 = vector.load %arg1[%c0_5, %c16] : memref<264x160xf32, #tpu.memory_space<vmem>>, vector<128x6xf32>
    %7 = arith.mulf %5, %6 : vector<128x6xf32>
    %c7_i32 = arith.constant 7 : i32
    %8 = tpu.dynamic_rotate %0 by %c7_i32 dim 0 : vector<128x6xf32>, i32 -> vector<128x6xf32>
    %c0_6 = arith.constant 0 : index
    %c32 = arith.constant 32 : index
    %9 = vector.load %arg1[%c0_6, %c32] : memref<264x160xf32, #tpu.memory_space<vmem>>, vector<128x6xf32>
    %10 = arith.mulf %8, %9 : vector<128x6xf32>
    %c1_i32 = arith.constant 1 : i32
    %11 = tpu.dynamic_rotate %0 by %c1_i32 dim 0 : vector<128x6xf32>, i32 -> vector<128x6xf32>
    %c0_7 = arith.constant 0 : index
    %c48 = arith.constant 48 : index
    %12 = vector.load %arg1[%c0_7, %c48] : memref<264x160xf32, #tpu.memory_space<vmem>>, vector<128x6xf32>
    %13 = arith.mulf %11, %12 : vector<128x6xf32>
    %c127_i32 = arith.constant 127 : i32
    %14 = tpu.dynamic_rotate %0 by %c127_i32 dim 0 : vector<128x6xf32>, i32 -> vector<128x6xf32>
    %c0_8 = arith.constant 0 : index
    %c80 = arith.constant 80 : index
    %15 = vector.load %arg1[%c0_8, %c80] : memref<264x160xf32, #tpu.memory_space<vmem>>, vector<128x6xf32>
    %16 = arith.mulf %14, %15 : vector<128x6xf32>
    %c121_i32 = arith.constant 121 : i32
    %17 = tpu.dynamic_rotate %0 by %c121_i32 dim 0 : vector<128x6xf32>, i32 -> vector<128x6xf32>
    %c0_9 = arith.constant 0 : index
    %c96 = arith.constant 96 : index
    %18 = vector.load %arg1[%c0_9, %c96] : memref<264x160xf32, #tpu.memory_space<vmem>>, vector<128x6xf32>
    %19 = arith.mulf %17, %18 : vector<128x6xf32>
    %c120_i32 = arith.constant 120 : i32
    %20 = tpu.dynamic_rotate %0 by %c120_i32 dim 0 : vector<128x6xf32>, i32 -> vector<128x6xf32>
    %c0_10 = arith.constant 0 : index
    %c112 = arith.constant 112 : index
    %21 = vector.load %arg1[%c0_10, %c112] : memref<264x160xf32, #tpu.memory_space<vmem>>, vector<128x6xf32>
    %22 = arith.mulf %20, %21 : vector<128x6xf32>
    %c119_i32 = arith.constant 119 : i32
    %23 = tpu.dynamic_rotate %0 by %c119_i32 dim 0 : vector<128x6xf32>, i32 -> vector<128x6xf32>
    %c0_11 = arith.constant 0 : index
    %c128 = arith.constant 128 : index
    %24 = vector.load %arg1[%c0_11, %c128] : memref<264x160xf32, #tpu.memory_space<vmem>>, vector<128x6xf32>
    %25 = arith.mulf %23, %24 : vector<128x6xf32>
    %26 = tpu.concatenate %4, %7, %10, %13, %0, %16, %19, %22, %25 in 1 : vector<128x6xf32>, vector<128x6xf32>, vector<128x6xf32>, vector<128x6xf32>, vector<128x6xf32>, vector<128x6xf32>, vector<128x6xf32>, vector<128x6xf32>, vector<128x6xf32> -> vector<128x54xf32>
    %27 = arith.truncf %26 : vector<128x54xf32> to vector<128x54xbf16>
    %cst = arith.constant dense<0.000000e+00> : vector<128x6xf32>
    %28 = tpu.matmul %27, %1, %cst {dimension_numbers = #tpu.dot_dimension_numbers<[1], [0], [0], [1], [0, 0, 1, 1], [], []>} : vector<128x54xbf16>, vector<54x6xbf16>, vector<128x6xf32> -> vector<128x6xf32>
    %c256 = arith.constant 256 : index
    %c0_12 = arith.constant 0 : index
    %29 = vector.load %arg1[%c256, %c0_12] : memref<264x160xf32, #tpu.memory_space<vmem>>, vector<1x6xf32>
    %30 = vector.broadcast %29 : vector<1x6xf32> to vector<128x6xf32>
    %31 = arith.addf %28, %30 : vector<128x6xf32>
    %cst_13 = arith.constant 0.000000e+00 : f32
    %32 = vector.broadcast %cst_13 : f32 to vector<128x6xf32>
    %33 = arith.maximumf %31, %32 : vector<128x6xf32>
    %c64 = arith.constant 64 : index
    %c0_14 = arith.constant 0 : index
    %34 = vector.load %arg2[%c64, %c0_14] : memref<448x128xbf16, #tpu.memory_space<vmem>>, vector<54x16xbf16>
    %c9_i32_15 = arith.constant 9 : i32
    %35 = tpu.dynamic_rotate %33 by %c9_i32_15 dim 0 : vector<128x6xf32>, i32 -> vector<128x6xf32>
    %c0_16 = arith.constant 0 : index
    %c0_17 = arith.constant 0 : index
    %36 = vector.load %arg1[%c0_16, %c0_17] : memref<264x160xf32, #tpu.memory_space<vmem>>, vector<128x6xf32>
    %37 = arith.mulf %35, %36 : vector<128x6xf32>
    %c8_i32_18 = arith.constant 8 : i32
    %38 = tpu.dynamic_rotate %33 by %c8_i32_18 dim 0 : vector<128x6xf32>, i32 -> vector<128x6xf32>
    %c0_19 = arith.constant 0 : index
    %c16_20 = arith.constant 16 : index
    %39 = vector.load %arg1[%c0_19, %c16_20] : memref<264x160xf32, #tpu.memory_space<vmem>>, vector<128x6xf32>
    %40 = arith.mulf %38, %39 : vector<128x6xf32>
    %c7_i32_21 = arith.constant 7 : i32
    %41 = tpu.dynamic_rotate %33 by %c7_i32_21 dim 0 : vector<128x6xf32>, i32 -> vector<128x6xf32>
    %c0_22 = arith.constant 0 : index
    %c32_23 = arith.constant 32 : index
    %42 = vector.load %arg1[%c0_22, %c32_23] : memref<264x160xf32, #tpu.memory_space<vmem>>, vector<128x6xf32>
    %43 = arith.mulf %41, %42 : vector<128x6xf32>
    %c1_i32_24 = arith.constant 1 : i32
    %44 = tpu.dynamic_rotate %33 by %c1_i32_24 dim 0 : vector<128x6xf32>, i32 -> vector<128x6xf32>
    %c0_25 = arith.constant 0 : index
    %c48_26 = arith.constant 48 : index
    %45 = vector.load %arg1[%c0_25, %c48_26] : memref<264x160xf32, #tpu.memory_space<vmem>>, vector<128x6xf32>
    %46 = arith.mulf %44, %45 : vector<128x6xf32>
    %c127_i32_27 = arith.constant 127 : i32
    %47 = tpu.dynamic_rotate %33 by %c127_i32_27 dim 0 : vector<128x6xf32>, i32 -> vector<128x6xf32>
    %c0_28 = arith.constant 0 : index
    %c80_29 = arith.constant 80 : index
    %48 = vector.load %arg1[%c0_28, %c80_29] : memref<264x160xf32, #tpu.memory_space<vmem>>, vector<128x6xf32>
    %49 = arith.mulf %47, %48 : vector<128x6xf32>
    %c121_i32_30 = arith.constant 121 : i32
    %50 = tpu.dynamic_rotate %33 by %c121_i32_30 dim 0 : vector<128x6xf32>, i32 -> vector<128x6xf32>
    %c0_31 = arith.constant 0 : index
    %c96_32 = arith.constant 96 : index
    %51 = vector.load %arg1[%c0_31, %c96_32] : memref<264x160xf32, #tpu.memory_space<vmem>>, vector<128x6xf32>
    %52 = arith.mulf %50, %51 : vector<128x6xf32>
    %c120_i32_33 = arith.constant 120 : i32
    %53 = tpu.dynamic_rotate %33 by %c120_i32_33 dim 0 : vector<128x6xf32>, i32 -> vector<128x6xf32>
    %c0_34 = arith.constant 0 : index
    %c112_35 = arith.constant 112 : index
    %54 = vector.load %arg1[%c0_34, %c112_35] : memref<264x160xf32, #tpu.memory_space<vmem>>, vector<128x6xf32>
    %55 = arith.mulf %53, %54 : vector<128x6xf32>
    %c119_i32_36 = arith.constant 119 : i32
    %56 = tpu.dynamic_rotate %33 by %c119_i32_36 dim 0 : vector<128x6xf32>, i32 -> vector<128x6xf32>
    %c0_37 = arith.constant 0 : index
    %c128_38 = arith.constant 128 : index
    %57 = vector.load %arg1[%c0_37, %c128_38] : memref<264x160xf32, #tpu.memory_space<vmem>>, vector<128x6xf32>
    %58 = arith.mulf %56, %57 : vector<128x6xf32>
    %59 = tpu.concatenate %37, %40, %43, %46, %33, %49, %52, %55, %58 in 1 : vector<128x6xf32>, vector<128x6xf32>, vector<128x6xf32>, vector<128x6xf32>, vector<128x6xf32>, vector<128x6xf32>, vector<128x6xf32>, vector<128x6xf32>, vector<128x6xf32> -> vector<128x54xf32>
    %60 = arith.truncf %59 : vector<128x54xf32> to vector<128x54xbf16>
    %cst_39 = arith.constant dense<0.000000e+00> : vector<128x16xf32>
    %61 = tpu.matmul %60, %34, %cst_39 {dimension_numbers = #tpu.dot_dimension_numbers<[1], [0], [0], [1], [0, 0, 1, 1], [], []>} : vector<128x54xbf16>, vector<54x16xbf16>, vector<128x16xf32> -> vector<128x16xf32>
    %c257 = arith.constant 257 : index
    %c0_40 = arith.constant 0 : index
    %62 = vector.load %arg1[%c257, %c0_40] : memref<264x160xf32, #tpu.memory_space<vmem>>, vector<1x16xf32>
    %63 = vector.broadcast %62 : vector<1x16xf32> to vector<128x16xf32>
    %64 = arith.addf %61, %63 : vector<128x16xf32>
    %cst_41 = arith.constant 0.000000e+00 : f32
    %65 = vector.broadcast %cst_41 : f32 to vector<128x16xf32>
    %66 = arith.maximumf %64, %65 : vector<128x16xf32>
    %c128_42 = arith.constant 128 : index
    %c0_43 = arith.constant 0 : index
    %67 = vector.load %arg2[%c128_42, %c0_43] : memref<448x128xbf16, #tpu.memory_space<vmem>>, vector<144x32xbf16>
    %c9_i32_44 = arith.constant 9 : i32
    %68 = tpu.dynamic_rotate %66 by %c9_i32_44 dim 0 : vector<128x16xf32>, i32 -> vector<128x16xf32>
    %c0_45 = arith.constant 0 : index
    %c0_46 = arith.constant 0 : index
    %69 = vector.load %arg1[%c0_45, %c0_46] : memref<264x160xf32, #tpu.memory_space<vmem>>, vector<128x16xf32>
    %70 = arith.mulf %68, %69 : vector<128x16xf32>
    %c8_i32_47 = arith.constant 8 : i32
    %71 = tpu.dynamic_rotate %66 by %c8_i32_47 dim 0 : vector<128x16xf32>, i32 -> vector<128x16xf32>
    %c0_48 = arith.constant 0 : index
    %c16_49 = arith.constant 16 : index
    %72 = vector.load %arg1[%c0_48, %c16_49] : memref<264x160xf32, #tpu.memory_space<vmem>>, vector<128x16xf32>
    %73 = arith.mulf %71, %72 : vector<128x16xf32>
    %c7_i32_50 = arith.constant 7 : i32
    %74 = tpu.dynamic_rotate %66 by %c7_i32_50 dim 0 : vector<128x16xf32>, i32 -> vector<128x16xf32>
    %c0_51 = arith.constant 0 : index
    %c32_52 = arith.constant 32 : index
    %75 = vector.load %arg1[%c0_51, %c32_52] : memref<264x160xf32, #tpu.memory_space<vmem>>, vector<128x16xf32>
    %76 = arith.mulf %74, %75 : vector<128x16xf32>
    %c1_i32_53 = arith.constant 1 : i32
    %77 = tpu.dynamic_rotate %66 by %c1_i32_53 dim 0 : vector<128x16xf32>, i32 -> vector<128x16xf32>
    %c0_54 = arith.constant 0 : index
    %c48_55 = arith.constant 48 : index
    %78 = vector.load %arg1[%c0_54, %c48_55] : memref<264x160xf32, #tpu.memory_space<vmem>>, vector<128x16xf32>
    %79 = arith.mulf %77, %78 : vector<128x16xf32>
    %c127_i32_56 = arith.constant 127 : i32
    %80 = tpu.dynamic_rotate %66 by %c127_i32_56 dim 0 : vector<128x16xf32>, i32 -> vector<128x16xf32>
    %c0_57 = arith.constant 0 : index
    %c80_58 = arith.constant 80 : index
    %81 = vector.load %arg1[%c0_57, %c80_58] : memref<264x160xf32, #tpu.memory_space<vmem>>, vector<128x16xf32>
    %82 = arith.mulf %80, %81 : vector<128x16xf32>
    %c121_i32_59 = arith.constant 121 : i32
    %83 = tpu.dynamic_rotate %66 by %c121_i32_59 dim 0 : vector<128x16xf32>, i32 -> vector<128x16xf32>
    %c0_60 = arith.constant 0 : index
    %c96_61 = arith.constant 96 : index
    %84 = vector.load %arg1[%c0_60, %c96_61] : memref<264x160xf32, #tpu.memory_space<vmem>>, vector<128x16xf32>
    %85 = arith.mulf %83, %84 : vector<128x16xf32>
    %c120_i32_62 = arith.constant 120 : i32
    %86 = tpu.dynamic_rotate %66 by %c120_i32_62 dim 0 : vector<128x16xf32>, i32 -> vector<128x16xf32>
    %c0_63 = arith.constant 0 : index
    %c112_64 = arith.constant 112 : index
    %87 = vector.load %arg1[%c0_63, %c112_64] : memref<264x160xf32, #tpu.memory_space<vmem>>, vector<128x16xf32>
    %88 = arith.mulf %86, %87 : vector<128x16xf32>
    %c119_i32_65 = arith.constant 119 : i32
    %89 = tpu.dynamic_rotate %66 by %c119_i32_65 dim 0 : vector<128x16xf32>, i32 -> vector<128x16xf32>
    %c0_66 = arith.constant 0 : index
    %c128_67 = arith.constant 128 : index
    %90 = vector.load %arg1[%c0_66, %c128_67] : memref<264x160xf32, #tpu.memory_space<vmem>>, vector<128x16xf32>
    %91 = arith.mulf %89, %90 : vector<128x16xf32>
    %92 = tpu.concatenate %70, %73, %76, %79, %66, %82, %85, %88, %91 in 1 : vector<128x16xf32>, vector<128x16xf32>, vector<128x16xf32>, vector<128x16xf32>, vector<128x16xf32>, vector<128x16xf32>, vector<128x16xf32>, vector<128x16xf32>, vector<128x16xf32> -> vector<128x144xf32>
    %93 = arith.truncf %92 : vector<128x144xf32> to vector<128x144xbf16>
    %cst_68 = arith.constant dense<0.000000e+00> : vector<128x32xf32>
    %94 = tpu.matmul %93, %67, %cst_68 {dimension_numbers = #tpu.dot_dimension_numbers<[1], [0], [0], [1], [0, 0, 1, 1], [], []>} : vector<128x144xbf16>, vector<144x32xbf16>, vector<128x32xf32> -> vector<128x32xf32>
    %c258 = arith.constant 258 : index
    %c0_69 = arith.constant 0 : index
    %95 = vector.load %arg1[%c258, %c0_69] : memref<264x160xf32, #tpu.memory_space<vmem>>, vector<1x32xf32>
    %96 = vector.broadcast %95 : vector<1x32xf32> to vector<128x32xf32>
    %97 = arith.addf %94, %96 : vector<128x32xf32>
    %cst_70 = arith.constant 0.000000e+00 : f32
    %98 = vector.broadcast %cst_70 : f32 to vector<128x32xf32>
    %99 = arith.maximumf %97, %98 : vector<128x32xf32>
    %c128_71 = arith.constant 128 : index
    %c0_72 = arith.constant 0 : index
    %100 = vector.load %arg1[%c128_71, %c0_72] : memref<264x160xf32, #tpu.memory_space<vmem>>, vector<128x160xf32>
    %101 = tpu.concatenate %99, %99, %99, %99, %99 in 1 : vector<128x32xf32>, vector<128x32xf32>, vector<128x32xf32>, vector<128x32xf32>, vector<128x32xf32> -> vector<128x160xf32>
    %102 = arith.mulf %101, %100 : vector<128x160xf32>
    %103 = arith.truncf %102 : vector<128x160xf32> to vector<128x160xbf16>
    %c432 = arith.constant 432 : index
    %c0_73 = arith.constant 0 : index
    %104 = vector.load %arg2[%c432, %c0_73] : memref<448x128xbf16, #tpu.memory_space<vmem>>, vector<2x128xbf16>
    %cst_74 = arith.constant dense<0.000000e+00> : vector<2x160xf32>
    %105 = tpu.matmul %104, %103, %cst_74 {dimension_numbers = #tpu.dot_dimension_numbers<[1], [0], [0], [1], [0, 0, 1, 1], [], []>} : vector<2x128xbf16>, vector<128x160xbf16>, vector<2x160xf32> -> vector<2x160xf32>
    %c272 = arith.constant 272 : index
    %c0_75 = arith.constant 0 : index
    %106 = vector.load %arg2[%c272, %c0_75] : memref<448x128xbf16, #tpu.memory_space<vmem>>, vector<160x128xbf16>
    %107 = arith.truncf %105 : vector<2x160xf32> to vector<2x160xbf16>
    %cst_76 = arith.constant dense<0.000000e+00> : vector<2x128xf32>
    %108 = tpu.matmul %107, %106, %cst_76 {dimension_numbers = #tpu.dot_dimension_numbers<[1], [0], [0], [1], [0, 0, 1, 1], [], []>} : vector<2x160xbf16>, vector<160x128xbf16>, vector<2x128xf32> -> vector<2x128xf32>
    %c259 = arith.constant 259 : index
    %c0_77 = arith.constant 0 : index
    %109 = vector.load %arg1[%c259, %c0_77] : memref<264x160xf32, #tpu.memory_space<vmem>>, vector<1x128xf32>
    %110 = vector.broadcast %109 : vector<1x128xf32> to vector<2x128xf32>
    %111 = arith.addf %108, %110 : vector<2x128xf32>
    %c0_78 = arith.constant 0 : index
    %c0_79 = arith.constant 0 : index
    %112 = vector.load %arg3[%c0_78, %c0_79] : memref<2x128xf32, #tpu.memory_space<vmem>>, vector<2x128xf32>
    tpu.vector_store %arg3[%c0_78, %c0_79], %111 {strides = array<i32>} : memref<2x128xf32, #tpu.memory_space<vmem>>, vector<2x128xf32>,
    return
  }
}

</mosaic_0001>

<bundles_post_ra>
// kernel: dqn_forward.1
= control target key start
LH: loop header
LB: loop body
LE: loop exit
PB: predicated region body
PF: predicated region fallthrough
CT: control target
= control target key end

     0   :  { %s5046_s16 = smov 112   ;;  %s5047_s21 = smov 96   ;;  %s8423_s0 = inlined_call_operand.vmem [shape: f32[128,6], index: 0, kind: input, shape index: {}]   ;;  %s8424_s1 = inlined_call_operand.vmem [shape: f32[264,160], index: 1, kind: input, shape index: {}]   ;;  %s8425_s2 = inlined_call_operand.vmem [shape: bf16[448,128], index: 2, kind: input, shape index: {}]   ;;  %s8426_s3 = inlined_call_operand.hbm [shape: f32[2,128], index: 3, kind: output, shape index: {}]  }
   0x1   :  { %v76_v0 = vld [vmem:[%s8424_s1 + $0x20] sm:$0xff]  ;;  %v77_v2 = vld [vmem:[%s8424_s1 + $0x30] sm:$0xff]  ;;  %s5048_s22 = smov 80   ;;  %s5049_s23 = smov 48  }
   0x2   :  { %v74_v1 = vld [vmem:[%s8424_s1] sm:$0xff]  ;;  %126 = vrot.lane.b32.xlu1 %v76_v0, %s5046_s16  ;;  %v75_v3 = vld [vmem:[%s8424_s1 + $0x10] sm:$0xff] }
   0x3   :  { %122 = vrot.lane.b32.xlu0 %v74_v1, %s5046_s16 }
   0x6   :  { %128 = vrot.lane.b32.xlu1 %v77_v2, %s5046_s16 }
   0x7   :  { %124 = vrot.lane.b32.xlu0 %v75_v3, %s5046_s16 }
   0xa   :  { %221 = vrot.lane.b32.xlu1 %v75_v3, %s5047_s21 }
   0xb   :  { %219 = vrot.lane.b32.xlu0 %v74_v1, %s5047_s21 }
   0xe   :  { %225 = vrot.lane.b32.xlu1 %v77_v2, %s5047_s21 }
   0xf   :  { %223 = vrot.lane.b32.xlu0 %v76_v0, %s5047_s21 }
  0x12   :  { %285 = vrot.lane.b32.xlu1 %v75_v3, %s5048_s22 }
  0x13   :  { %283 = vrot.lane.b32.xlu0 %v74_v1, %s5048_s22 }
  0x16   :  { %289 = vrot.lane.b32.xlu1 %v77_v2, %s5048_s22 }
  0x17   :  { %287 = vrot.lane.b32.xlu0 %v76_v0, %s5048_s22 }
  0x1a   :  { %349 = vrot.lane.b32.xlu1 %v75_v3, %s5049_s23 }
  0x1b   :  { %347 = vrot.lane.b32.xlu0 %v74_v1, %s5049_s23 }
  0x1c   :  { %8 = vsyncpa [#allocation3], 0  ;;  %s5050_s24 = smov 32   ;;  %s5051_s25 = smov 16   ;;  %v79_v4 = vld [vmem:[%s8424_s1 + $0x50] sm:$0xff]  ;;  %v78_v5 = vld [vmem:[%s8424_s1 + $0x40] sm:$0xff]  ;;  %v55_v46 = vlaneseq }
  0x1d   :  { %v81_v6 = vld [vmem:[%s8424_s1 + $0x70] sm:$0xff]  ;;  %v80_v7 = vld [vmem:[%s8424_s1 + $0x60] sm:$0xff]  ;;  %v5299_v49 = vld [vmem:[%s8423_s0 + $0x8] sm:$0xff]  ;;  %s5052_s14 = smov 6   ;;  %s5053_s15 = smov 12   ;;  %vm1274_vm2 = vcmask 1042432  }
  0x1e   :  { %353 = vrot.lane.b32.xlu1 %v77_v2, %s5049_s23  ;;  %v83_v8 = vld [vmem:[%s8424_s1 + $0x90] sm:$0xff]  ;;  %v82_v9 = vld [vmem:[%s8424_s1 + $0x80] sm:$0xff]  ;;  %v5306_v51 = vshrl.u32 %v55_v46, 7  ;;  %v5315_v54 = vld [vmem:[%s8423_s0 + $0x18] sm:$0xff]  ;;  %v187_v58 = vrot.slane %v5299_v49, 1  ;;  %s5054_s19 = smov 18  }
  0x1f   :  { %351 = vrot.lane.b32.xlu0 %v76_v0, %s5049_s23  ;;  %v85_v10 = vld [vmem:[%s8424_s1 + $0xb0] sm:$0xff]  ;;  %v84_v11 = vld [vmem:[%s8424_s1 + $0xa0] sm:$0xff]  ;;  %v5320_v55 = vld [vmem:[%s8423_s0 + $0x78] sm:$0xff]  ;;  %v189_v61 = vrot.slane %v5315_v54, 1  ;;  %s5055_s27 = smov 24   ;;  %s5056_s5 = smov 30  }
  0x20   :  { %v87_v26 = vld [vmem:[%s8424_s1 + $0xd0] sm:$0xff]  ;;  %v86_v27 = vld [vmem:[%s8424_s1 + $0xc0] sm:$0xff]  ;;  %v8427_v59 = vrot.slane %v5320_v55, 1  ;;  %vm202_vm0 = vcmp.lt.s32.totalorder %v5306_v51, 7  ;;  %vm57_vm1 = vcmp.lt.s32.totalorder %v5306_v51, 1  ;;  %s5057_s20 = smov 36  }
  0x21   :  { %v5233_v30 = vld [vmem:[%s8424_s1 + $0xf0] sm:$0xff]  ;;  %v5238_v31 = vld [vmem:[%s8424_s1 + $0xe0] sm:$0xff]  ;;  %s5058_s4 = smov 42   ;;  %vm1083_vm3 = vcmask 48128   ;;  %vm1100_vm4 = vcmask 97280   ;;  %vm1117_vm5 = vcmask 146432  }
  0x22   :  { %413 = vrot.lane.b32.xlu1 %v75_v3, %s5050_s24  ;;  %v5304_v50 = vld [vmem:[%s8423_s0] sm:$0xff]  ;;  %v5325_v56 = vld [vmem:[%s8423_s0 + $0x10] sm:$0xff]  ;;  %vm1134_vm6 = vcmask 195584   ;;  %vm1151_vm7 = vcmask 244736   ;;  %vm1168_vm8 = vcmask 293888   ;;  %vm1185_vm9 = vcmask 343040  }
  0x23   :  { %411 = vrot.lane.b32.xlu0 %v74_v1, %s5050_s24  ;;  %v186_v57 = vrot.slane %v5304_v50, 1  ;;  %v188_v60 = vrot.slane %v5325_v56, 1  ;;  %vm1202_vm10 = vcmask 392192   ;;  %vm1249_vm11 = vcmask 441344   ;;  %s5059_s30 = smov 64  }
  0x24   :  { %vm3058_vm12 = vcmask 130048   ;;  %vm3075_vm13 = vcmask 261120   ;;  %vm3108_vm14 = vcmask 523264   ;;  %vm3125_vm15 = vcmask 654336  }
  0x26   :  { %417 = vrot.lane.b32.xlu1 %v77_v2, %s5050_s24 }
  0x27   :  { %415 = vrot.lane.b32.xlu0 %v76_v0, %s5050_s24 }
  0x2a   :  { %477 = vrot.lane.b32.xlu1 %v75_v3, %s5051_s25  ;;  %v40_v3 = vrot.slane %v5299_v49, 7 }
  0x2b   :  { %475 = vrot.lane.b32.xlu0 %v74_v1, %s5051_s25  ;;  %v5351_v1 = vsel %vm202_vm0, %v8427_v59, %v186_v57 }
  0x2e   :  { %481 = vrot.lane.b32.xlu1 %v77_v2, %s5051_s25  ;;  %v5355_v2 = vsel %vm202_vm0, %v187_v58, %v188_v60 }
  0x2f   :  { %479 = vrot.lane.b32.xlu0 %v76_v0, %s5051_s25  ;;  %v5345_v0 = vsel %vm202_vm0, %v186_v57, %v187_v58 }
  0x32   :  { %132 = vrot.lane.b32.xlu1 %v79_v4, %s5046_s16 }
  0x33   :  { %130 = vrot.lane.b32.xlu0 %v78_v5, %s5046_s16 }
  0x36   :  { %136 = vrot.lane.b32.xlu1 %v81_v6, %s5046_s16 }
  0x37   :  { %134 = vrot.lane.b32.xlu0 %v80_v7, %s5046_s16 }
  0x3a   :  { %229 = vrot.lane.b32.xlu1 %v79_v4, %s5047_s21 }
  0x3b   :  { %227 = vrot.lane.b32.xlu0 %v78_v5, %s5047_s21 }
  0x3e   :  { %233 = vrot.lane.b32.xlu1 %v81_v6, %s5047_s21 }
  0x3f   :  { %231 = vrot.lane.b32.xlu0 %v80_v7, %s5047_s21 }
  0x42   :  { %293 = vrot.lane.b32.xlu1 %v79_v4, %s5048_s22 }
  0x43   :  { %291 = vrot.lane.b32.xlu0 %v78_v5, %s5048_s22 }
  0x46   :  { %297 = vrot.lane.b32.xlu1 %v81_v6, %s5048_s22 }
  0x47   :  { %295 = vrot.lane.b32.xlu0 %v80_v7, %s5048_s22 }
  0x4a   :  { %357 = vrot.lane.b32.xlu1 %v79_v4, %s5049_s23 }
  0x4b   :  { %355 = vrot.lane.b32.xlu0 %v78_v5, %s5049_s23 }
  0x4e   :  { %361 = vrot.lane.b32.xlu1 %v81_v6, %s5049_s23 }
  0x4f   :  { %359 = vrot.lane.b32.xlu0 %v80_v7, %s5049_s23 }
  0x52   :  { %421 = vrot.lane.b32.xlu1 %v79_v4, %s5050_s24 }
  0x53   :  { %419 = vrot.lane.b32.xlu0 %v78_v5, %s5050_s24 }
  0x56   :  { %425 = vrot.lane.b32.xlu1 %v81_v6, %s5050_s24 }
  0x57   :  { %423 = vrot.lane.b32.xlu0 %v80_v7, %s5050_s24 }
  0x5a   :  { %485 = vrot.lane.b32.xlu1 %v79_v4, %s5051_s25 }
  0x5b   :  { %483 = vrot.lane.b32.xlu0 %v78_v5, %s5051_s25 }
  0x5e   :  { %489 = vrot.lane.b32.xlu1 %v81_v6, %s5051_s25 }
  0x5f   :  { %487 = vrot.lane.b32.xlu0 %v80_v7, %s5051_s25  ;;  %v5366_v7 = vsel %vm202_vm0, %v188_v60, %v189_v61 }
  0x62   :  { %140 = vrot.lane.b32.xlu1 %v83_v8, %s5046_s16 }
  0x63   :  { %138 = vrot.lane.b32.xlu0 %v82_v9, %s5046_s16 }
  0x66   :  { %144 = vrot.lane.b32.xlu1 %v85_v10, %s5046_s16 }
  0x67   :  { %142 = vrot.lane.b32.xlu0 %v84_v11, %s5046_s16 }
  0x6a   :  { %237 = vrot.lane.b32.xlu1 %v83_v8, %s5047_s21 }
  0x6b   :  { %235 = vrot.lane.b32.xlu0 %v82_v9, %s5047_s21 }
  0x6e   :  { %241 = vrot.lane.b32.xlu1 %v85_v10, %s5047_s21 }
  0x6f   :  { %239 = vrot.lane.b32.xlu0 %v84_v11, %s5047_s21 }
  0x72   :  { %301 = vrot.lane.b32.xlu1 %v83_v8, %s5048_s22 }
  0x73   :  { %299 = vrot.lane.b32.xlu0 %v82_v9, %s5048_s22 }
  0x74   :  { %v5176_v12 = vpop.permute.xlu1 %126 }
  0x75   :  { %8610 = vst [vmem:[#allocation5_spill] sm:$0xff] %v5176_v12  ;;  %v5178_v13 = vpop.permute.xlu0 %122  ;;  %v172_v4 = vmul.f32 %v5176_v12, %v5299_v49 }
  0x76   :  { %8611 = vst [vmem:[#allocation6_spill] sm:$0xff] %v5178_v13  ;;  %305 = vrot.lane.b32.xlu1 %v85_v10, %s5048_s22  ;;  %v170_v46 = vmul.f32 %v5178_v13, %v5320_v55 }
  0x77   :  { %303 = vrot.lane.b32.xlu0 %v84_v11, %s5048_s22 }
  0x78   :  { %v5182_v14 = vpop.permute.xlu1 %128 }
  0x79   :  { %v5184_v15 = vpop.permute.xlu0 %124  ;;  %v173_v5 = vmul.f32 %v5182_v14, %v5325_v56 }
  0x7a   :  { %8612 = vst [vmem:[#allocation7_spill] sm:$0xff] %v5184_v15  ;;  %365 = vrot.lane.b32.xlu1 %v83_v8, %s5049_s23  ;;  %v171_v6 = vmul.f32 %v5184_v15, %v5304_v50 }
  0x7b   :  { %363 = vrot.lane.b32.xlu0 %v82_v9, %s5049_s23 }
  0x7c   :  { %v5188_v16 = vpop.permute.xlu1 %221  ;;  %v3997_v13 = vpack.i.bf16 %v171_v6, %v170_v46 }
  0x7d   :  { %8613 = vst [vmem:[#allocation8_spill] sm:$0xff] %v5188_v16  ;;  %v5190_v17 = vpop.permute.xlu0 %219  ;;  %v268_v57 = vmul.f32 %v5188_v16, %v5345_v0  ;;  %v8649_v16 = vrot.slane %v5320_v55, 7 }
  0x7e   :  { %8614 = vst [vmem:[#allocation9_spill] sm:$0xff] %v5190_v17  ;;  %369 = vrot.lane.b32.xlu1 %v85_v10, %s5049_s23  ;;  %v267_v58 = vmul.f32 %v5190_v17, %v5351_v1 }
  0x7f   :  { %367 = vrot.lane.b32.xlu0 %v84_v11, %s5049_s23 }
  0x80   :  { %v5194_v18 = vpop.permute.xlu1 %225 }
  0x81   :  { %8615 = vst [vmem:[#allocation10_spill] sm:$0xff] %v5194_v18  ;;  %v5196_v19 = vpop.permute.xlu0 %223  ;;  %v270_v60 = vmul.f32 %v5194_v18, %v5366_v7 }
  0x82   :  { %8616 = vst [vmem:[#allocation11_spill] sm:$0xff] %v5196_v19  ;;  %429 = vrot.lane.b32.xlu1 %v83_v8, %s5050_s24  ;;  %v269_v59 = vmul.f32 %v5196_v19, %v5355_v2 }
  0x83   :  { %427 = vrot.lane.b32.xlu0 %v82_v9, %s5050_s24 }
  0x84   :  { %v5200_v20 = vpop.permute.xlu1 %285 }
  0x85   :  { %8617 = vst [vmem:[#allocation12_spill] sm:$0xff] %v5200_v20  ;;  %v5202_v21 = vpop.permute.xlu0 %283 }
  0x86   :  { %8618 = vst [vmem:[#allocation13_spill] sm:$0xff] %v5202_v21  ;;  %433 = vrot.lane.b32.xlu1 %v85_v10, %s5050_s24 }
  0x87   :  { %431 = vrot.lane.b32.xlu0 %v84_v11, %s5050_s24 }
  0x88   :  { %v5206_v22 = vpop.permute.xlu1 %289 }
  0x89   :  { %8619 = vst [vmem:[#allocation14_spill] sm:$0xff] %v5206_v22  ;;  %v5208_v23 = vpop.permute.xlu0 %287 }
  0x8a   :  { %8620 = vst [vmem:[#allocation15_spill] sm:$0xff] %v5208_v23  ;;  %493 = vrot.lane.b32.xlu1 %v83_v8, %s5051_s25 }
  0x8b   :  { %491 = vrot.lane.b32.xlu0 %v82_v9, %s5051_s25 }
  0x8c   :  { %v5212_v24 = vpop.permute.xlu1 %349 }
  0x8d   :  { %8621 = vst [vmem:[#allocation16_spill] sm:$0xff] %v5212_v24  ;;  %v5214_v25 = vpop.permute.xlu0 %347 }
  0x8e   :  { %8622 = vst [vmem:[#allocation17_spill] sm:$0xff] %v5214_v25  ;;  %497 = vrot.lane.b32.xlu1 %v85_v10, %s5051_s25  ;;  %v39_v10 = vrot.slane %v5304_v50, 7 }
  0x8f   :  { %495 = vrot.lane.b32.xlu0 %v84_v11, %s5051_s25 }
  0x90   :  { %v5224_v28 = vpop.permute.xlu1 %353  ;;  %v5403_v17 = vsel %vm57_vm1, %v8649_v16, %v39_v10  ;;  %v4012_v16 = vpack.i.bf16 %v270_v60, %v269_v59 }
  0x91   :  { %8623 = vst [vmem:[#allocation18_spill] sm:$0xff] %v5224_v28  ;;  %v5226_v29 = vpop.permute.xlu0 %351 }
  0x92   :  { %8624 = vst [vmem:[#allocation19_spill] sm:$0xff] %v5226_v29  ;;  %148 = vrot.lane.b32.xlu1 %v87_v26, %s5046_s16 }
  0x93   :  { %146 = vrot.lane.b32.xlu0 %v86_v27, %s5046_s16 }
  0x94   :  { %v5240_v32 = vpop.permute.xlu1 %413 }
  0x95   :  { %8625 = vst [vmem:[#allocation20_spill] sm:$0xff] %v5240_v32  ;;  %v5242_v33 = vpop.permute.xlu0 %411 }
  0x96   :  { %8626 = vst [vmem:[#allocation21_spill] sm:$0xff] %v5242_v33  ;;  %152 = vrot.lane.b32.xlu1 %v5233_v30, %s5046_s16 }
  0x97   :  { %150 = vrot.lane.b32.xlu0 %v5238_v31, %s5046_s16 }
  0x98   :  { %v5248_v34 = vpop.permute.xlu1 %417 }
  0x99   :  { %8627 = vst [vmem:[#allocation22_spill] sm:$0xff] %v5248_v34  ;;  %v5250_v35 = vpop.permute.xlu0 %415 }
  0x9a   :  { %8628 = vst [vmem:[#allocation23_spill] sm:$0xff] %v5250_v35  ;;  %245 = vrot.lane.b32.xlu1 %v87_v26, %s5047_s21 }
  0x9b   :  { %243 = vrot.lane.b32.xlu0 %v86_v27, %s5047_s21 }
  0x9c   :  { %v5254_v36 = vpop.permute.xlu1 %477 }
  0x9d   :  { %8629 = vst [vmem:[#allocation24_spill] sm:$0xff] %v5254_v36  ;;  %v5256_v37 = vpop.permute.xlu0 %475 }
  0x9e   :  { %8630 = vst [vmem:[#allocation25_spill] sm:$0xff] %v5256_v37  ;;  %249 = vrot.lane.b32.xlu1 %v5233_v30, %s5047_s21 }
  0x9f   :  { %247 = vrot.lane.b32.xlu0 %v5238_v31, %s5047_s21 }
  0xa0   :  { %v5262_v38 = vpop.permute.xlu1 %481 }
  0xa1   :  { %8631 = vst [vmem:[#allocation26_spill] sm:$0xff] %v5262_v38  ;;  %v5264_v39 = vpop.permute.xlu0 %479 }
  0xa2   :  { %8632 = vst [vmem:[#allocation27_spill] sm:$0xff] %v5264_v39  ;;  %309 = vrot.lane.b32.xlu1 %v87_v26, %s5048_s22 }
  0xa3   :  { %307 = vrot.lane.b32.xlu0 %v86_v27, %s5048_s22 }
  0xa4   :  { %v5268_v40 = vpop.permute.xlu1 %132 }
  0xa5   :  { %8633 = vst [vmem:[#allocation28_spill] sm:$0xff] %v5268_v40  ;;  %v5270_v41 = vpop.permute.xlu0 %130 }
  0xa6   :  { %8634 = vst [vmem:[#allocation29_spill] sm:$0xff] %v5270_v41  ;;  %313 = vrot.lane.b32.xlu1 %v5233_v30, %s5048_s22 }
  0xa7   :  { %311 = vrot.lane.b32.xlu0 %v5238_v31, %s5048_s22 }
  0xa8   :  { %v5276_v42 = vpop.permute.xlu1 %136 }
  0xa9   :  { %8635 = vst [vmem:[#allocation30_spill] sm:$0xff] %v5276_v42  ;;  %v5278_v43 = vpop.permute.xlu0 %134 }
  0xaa   :  { %8636 = vst [vmem:[#allocation31_spill] sm:$0xff] %v5278_v43  ;;  %373 = vrot.lane.b32.xlu1 %v87_v26, %s5049_s23 }
  0xab   :  { %371 = vrot.lane.b32.xlu0 %v86_v27, %s5049_s23 }
  0xac   :  { %v5282_v44 = vpop.permute.xlu1 %229 }
  0xad   :  { %8637 = vst [vmem:[#allocation32_spill] sm:$0xff] %v5282_v44  ;;  %v5284_v45 = vpop.permute.xlu0 %227 }
  0xae   :  { %8638 = vst [vmem:[#allocation33_spill] sm:$0xff] %v5284_v45  ;;  %377 = vrot.lane.b32.xlu1 %v5233_v30, %s5049_s23 }
  0xaf   :  { %375 = vrot.lane.b32.xlu0 %v5238_v31, %s5049_s23 }
  0xb0   :  { %v5290_v47 = vpop.permute.xlu1 %233 }
  0xb1   :  { %8639 = vst [vmem:[#allocation34_spill] sm:$0xff] %v5290_v47  ;;  %v5292_v48 = vpop.permute.xlu0 %231 }
  0xb2   :  { %8640 = vst [vmem:[#allocation35_spill] sm:$0xff] %v5292_v48  ;;  %437 = vrot.lane.b32.xlu1 %v87_v26, %s5050_s24 }
  0xb3   :  { %435 = vrot.lane.b32.xlu0 %v86_v27, %s5050_s24 }
  0xb4   :  { %v5308_v52 = vpop.permute.xlu1 %293 }
  0xb5   :  { %8641 = vst [vmem:[#allocation36_spill] sm:$0xff] %v5308_v52  ;;  %v5310_v53 = vpop.permute.xlu0 %291 }
  0xb6   :  { %8642 = vst [vmem:[#allocation37_spill] sm:$0xff] %v5310_v53  ;;  %441 = vrot.lane.b32.xlu1 %v5233_v30, %s5050_s24 }
  0xb7   :  { %439 = vrot.lane.b32.xlu0 %v5238_v31, %s5050_s24 }
  0xb8   :  { %v5337_v62 = vpop.permute.xlu1 %297 }
  0xb9   :  { %8643 = vst [vmem:[#allocation38_spill] sm:$0xff] %v5337_v62  ;;  %v5339_v63 = vpop.permute.xlu0 %295 }
  0xba   :  { %8644 = vst [vmem:[#allocation39_spill] sm:$0xff] %v5339_v63  ;;  %501 = vrot.lane.b32.xlu1 %v87_v26, %s5051_s25  ;;  %v41_v26 = vrot.slane %v5325_v56, 7 }
  0xbb   :  { %499 = vrot.lane.b32.xlu0 %v86_v27, %s5051_s25  ;;  %v42_v27 = vrot.slane %v5315_v54, 7 }
  0xbc   :  { %v5368_v8 = vpop.permute.xlu1 %357  ;;  %v5411_v19 = vsel %vm57_vm1, %v40_v3, %v41_v26 }
  0xbd   :  { %8645 = vst [vmem:[#allocation40_spill] sm:$0xff] %v5368_v8  ;;  %v5370_v9 = vpop.permute.xlu0 %355  ;;  %v5407_v18 = vsel %vm57_vm1, %v41_v26, %v42_v27  ;;  %v333_v26 = vmul.f32 %v5208_v23, %v5411_v19 }
  0xbe   :  { %8646 = vst [vmem:[#allocation41_spill] sm:$0xff] %v5370_v9  ;;  %505 = vrot.lane.b32.xlu1 %v5233_v30, %s5051_s25  ;;  %v4002_v30 = vpack.i.bf16 %v173_v5, %v172_v4  ;;  %v5416_v4 = vld [vmem:[%s8423_s0 + $0x20] sm:$0xff]  ;;  %v4007_v5 = vpack.i.bf16 %v268_v57, %v267_v58 }
  0xbf   :  { %503 = vrot.lane.b32.xlu0 %v5238_v31, %s5051_s25  ;;  %v5397_v31 = vsel %vm57_vm1, %v39_v10, %v40_v3  ;;  %v331_v10 = vmul.f32 %v5202_v21, %v5403_v17  ;;  %v334_v3 = vmul.f32 %v5206_v22, %v5407_v18  ;;  %v8447_v59 = vrot.slane %v5416_v4, 7 }
  0xc0   :  { %v5391_v11 = vpop.permute.xlu1 %361  ;;  %v332_v6 = vmul.f32 %v5200_v20, %v5397_v31  ;;  %v4917_v20 = vld [vmem:[%s8425_s2 + $0x18] ss:$0 sps:$4 sm:$0x77]  }
  0xc1   :  { %8647 = vst [vmem:[#allocation42_spill] sm:$0xff] %v5391_v11  ;;  %v5393_v15 = vpop.permute.xlu0 %359  ;;  %v4022_v60 = vpack.i.bf16 %v334_v3, %v333_v26  ;;  %3979 = vmatprep.subr.msk.bf16.mxu0 %vm1274_vm2, %v4917_v20  ;;  %v395_v3 = vmul.f32 %v5214_v25, %v5345_v0  ;;  %v8662_v25 = vrot.slane %v5416_v4, 1 }
  0xc2   :  { %8648 = vst [vmem:[#allocation43_spill] sm:$0xff] %v5393_v15  ;;  %4003 = vrot.lane.b32.xlu1 %v4002_v30, %s5052_s14  ;;  %v4017_v30 = vpack.i.bf16 %v332_v6, %v331_v10  ;;  %v1276_v6 = vsel %vm1274_vm2, %v4917_v20, 0  ;;  %v396_v10 = vmul.f32 %v5212_v24, %v5355_v2  ;;  %v4918_v20 = vld [vmem:[%s8425_s2 + $0x10] sm:$0xff]   ;;  %v542_v24 = vld [vmem:[%s8424_s1 + $0x38] sm:$0xff] }
  0xc3   :  { %3998 = vrot.lane.b32.xlu0 %v3997_v13, %s5052_s14  ;;  %v8446_v13 = vrot.slane %v5416_v4, 1  ;;  %3932 = vmatpush3.bf16.msra.mxu0 %v1276_v6  ;;  %v461_v6 = vmul.f32 %v5250_v35, %v5407_v18 }
  0xc4   :  { %v5428_v46 = vpop.permute.xlu1 %421  ;;  %3933 = vmatprep.subr.bf16.mxu0 %v4918_v20  ;;  %v4037_v23 = vpack.i.bf16 %v396_v10, %v395_v3  ;;  %v539_v10 = vld [vmem:[%s8424_s1 + $0x8] sm:$0xff]  ;;  %v540_v3 = vld [vmem:[%s8424_s1 + $0x18] sm:$0xff] }
  0xc5   :  { %8650 = vst [vmem:[#allocation44_spill] sm:$0xff] %v5428_v46  ;;  %v5430_v12 = vpop.permute.xlu0 %419  ;;  %v5447_v21 = vsel %vm202_vm0, %v189_v61, %v8446_v13  ;;  %v5460_v61 = vsel %vm57_vm1, %v42_v27, %v8447_v59  ;;  %v460_v27 = vmul.f32 %v5240_v32, %v5411_v19  ;;  %v459_v59 = vmul.f32 %v5242_v33, %v5397_v31  ;;  %v5498_v32 = vld [vmem:[%s8423_s0 + $0x28] sm:$0xff] }
  0xc6   :  { %8651 = vst [vmem:[#allocation45_spill] sm:$0xff] %v5430_v12  ;;  %4013 = vrot.lane.b32.xlu1 %v4012_v16, %s5053_s15  ;;  %v4032_v16 = vpack.i.bf16 %v5315_v54, %v5325_v56  ;;  %v398_v26 = vmul.f32 %v5224_v28, %v5447_v21  ;;  %v541_v33 = vld [vmem:[%s8424_s1 + $0x28] sm:$0xff] }
  0xc7   :  { %4008 = vrot.lane.b32.xlu0 %v4007_v5, %s5053_s15  ;;  %v4027_v5 = vpack.i.bf16 %v5299_v49, %v5304_v50  ;;  %3934 = vmatpush3.bf16.msra.mxu0 %v4918_v20 }
  0xc8   :  { %v5436_v57 = vpop.permute.xlu1 %425 }
  0xc9   :  { %8652 = vst [vmem:[#allocation46_spill] sm:$0xff] %v5436_v57  ;;  %v5438_v58 = vpop.permute.xlu0 %423 }
  0xca   :  { %8653 = vst [vmem:[#allocation47_spill] sm:$0xff] %v5438_v58  ;;  %4023 = vrot.lane.b32.xlu1 %v4022_v60, %s5054_s19  ;;  %v397_v60 = vmul.f32 %v5226_v29, %v5366_v7  ;;  %v462_v29 = vmul.f32 %v5248_v34, %v5460_v61  ;;  %v4047_v34 = vpack.i.bf16 %v460_v27, %v459_v59  ;;  %v5519_v59 = vld [vmem:[%s8423_s0 + $0x38] sm:$0xff] }
  0xcb   :  { %4018 = vrot.lane.b32.xlu0 %v4017_v30, %s5054_s19 }
  0xcc   :  { %v5471_v30 = vpop.permute.xlu1 %485  ;;  %v4052_v35 = vpack.i.bf16 %v462_v29, %v461_v6  ;;  %v525_v29 = vmul.f32 %v5264_v39, %v5315_v54  ;;  %v5532_v6 = vld [vmem:[%s8423_s0 + $0x30] sm:$0xff]  ;;  %v193_v39 = vrot.slane %v5519_v59, 1 }
  0xcd   :  { %8654 = vst [vmem:[#allocation48_spill] sm:$0xff] %v5471_v30  ;;  %v5473_v13 = vpop.permute.xlu0 %483 }
  0xce   :  { %8655 = vst [vmem:[#allocation49_spill] sm:$0xff] %v5473_v13  ;;  %4033 = vrot.lane.b32.xlu1 %v4032_v16, %s5055_s27  ;;  %v4042_v16 = vpack.i.bf16 %v398_v26, %v397_v60  ;;  %v524_v26 = vmul.f32 %v5254_v36, %v5325_v56  ;;  %v523_v60 = vmul.f32 %v5256_v37, %v5299_v49  ;;  %v4920_v49 = vld [vmem:[%s8425_s2] sm:$0xff]   ;;  %v191_v56 = vrot.slane %v5498_v32, 1 }
  0xcf   :  { %4028 = vrot.lane.b32.xlu0 %v4027_v5, %s5055_s27  ;;  %v4919_v5 = vld [vmem:[%s8425_s2 + $0x8] sm:$0xff]  }
  0xd0   :  { %v5488_v28 = vpop.permute.xlu1 %489  ;;  %3935 = vmatprep.subr.bf16.mxu0 %v4919_v5  ;;  %v213_v36 = vsel %vm202_vm0, %v8662_v25, %v191_v56 }
  0xd1   :  { %8656 = vst [vmem:[#allocation50_spill] sm:$0xff] %v5488_v28  ;;  %v5490_v22 = vpop.permute.xlu0 %487  ;;  %3936 = vmatpush3.bf16.msra.mxu0 %v4919_v5  ;;  %v556_v5 = vmul.f32 %v540_v3, %v5366_v7  ;;  %v4057_v3 = vpack.i.bf16 %v524_v26, %v523_v60  ;;  %v177_v26 = vmul.f32 %v5276_v42, %v5532_v6 }
  0xd2   :  { %8657 = vst [vmem:[#allocation51_spill] sm:$0xff] %v5490_v22  ;;  %4043 = vrot.lane.b32.xlu1 %v4042_v16, %s5056_s5  ;;  %v555_v16 = vmul.f32 %v539_v10, %v5355_v2  ;;  %3937 = vmatprep.subr.bf16.mxu0 %v4920_v49  ;;  %v176_v60 = vmul.f32 %v5278_v43, %v5498_v32 }
  0xd3   :  { %4038 = vrot.lane.b32.xlu0 %v4037_v23, %s5056_s5  ;;  %v526_v23 = vmul.f32 %v5262_v38, %v5416_v4  ;;  %v192_v38 = vrot.slane %v5532_v6, 1 }
  0xd4   :  { %v5521_v20 = vpop.permute.xlu1 %140  ;;  %v4082_v42 = vpack.i.bf16 %v177_v26, %v176_v60 }
  0xd5   :  { %8658 = vst [vmem:[#allocation52_spill] sm:$0xff] %v5521_v20  ;;  %v5523_v27 = vpop.permute.xlu0 %138  ;;  %v4062_v10 = vpack.i.bf16 %v526_v23, %v525_v29  ;;  %3938 = vmatpush3.bf16.msra.mxu0 %v4920_v49  ;;  %v5563_v37 = vsel %vm202_vm0, %v192_v38, %v193_v39  ;;  %v5571_v25 = vsel %vm202_vm0, %v191_v56, %v192_v38  ;;  %v45_v49 = vrot.slane %v5532_v6, 7 }
  0xd6   :  { %8659 = vst [vmem:[#allocation53_spill] sm:$0xff] %v5523_v27  ;;  %4053 = vrot.lane.b32.xlu1 %v4052_v35, %s5057_s20  ;;  %v174_v35 = vmul.f32 %v5270_v41, %v5315_v54  ;;  %v557_v54 = vmul.f32 %v541_v33, %v5447_v21  ;;  %v558_v41 = vmul.f32 %v542_v24, %v213_v36  ;;  %v44_v24 = vrot.slane %v5498_v32, 7 }
  0xd7   :  { %4048 = vrot.lane.b32.xlu0 %v4047_v34, %s5057_s20  ;;  %v175_v34 = vmul.f32 %v5268_v40, %v5416_v4  ;;  %v4067_v40 = vpack.i.bf16 %v556_v5, %v555_v16  ;;  %v46_v16 = vrot.slane %v5519_v59, 7  ;;  %v271_v38 = vmul.f32 %v5284_v45, %v5447_v21 }
  0xd8   :  { %v5550_v2 = vpop.permute.xlu1 %144  ;;  %v4077_v5 = vpack.i.bf16 %v558_v41, %v557_v54  ;;  %v274_v56 = vmul.f32 %v5290_v47, %v5563_v37  ;;  %v5605_v41 = vsel %vm57_vm1, %v44_v24, %v45_v49  ;;  %v5610_v54 = vld [vmem:[%s8423_s0 + $0x40] sm:$0xff]  ;;  %v335_v47 = vmul.f32 %v5310_v53, %v5460_v61 }
  0xd9   :  { %8660 = vst [vmem:[#allocation54_spill] sm:$0xff] %v5550_v2  ;;  %v5552_v7 = vpop.permute.xlu0 %142  ;;  %v4072_v33 = vpack.i.bf16 %v175_v34, %v174_v35  ;;  %v273_v34 = vmul.f32 %v5292_v48, %v5571_v25  ;;  %v5601_v21 = vsel %vm57_vm1, %v45_v49, %v46_v16  ;;  %v337_v49 = vmul.f32 %v5339_v63, %v5605_v41 }
  0xda   :  { %8661 = vst [vmem:[#allocation55_spill] sm:$0xff] %v5552_v7  ;;  %4063 = vrot.lane.b32.xlu1 %v4062_v10, %s5058_s4  ;;  %v272_v10 = vmul.f32 %v5282_v44, %v213_v36 }
  0xdb   :  { %4058 = vrot.lane.b32.xlu0 %v4057_v3, %s5058_s4  ;;  %v4092_v26 = vpack.i.bf16 %v274_v56, %v273_v34 }
  0xdc   :  { %v5573_v23 = vpop.permute.xlu1 %237  ;;  %v4087_v60 = vpack.i.bf16 %v272_v10, %v271_v38 }
  0xdd   :  { %8663 = vst [vmem:[#allocation56_spill] sm:$0xff] %v5573_v23  ;;  %v5575_v29 = vpop.permute.xlu0 %235 }
  0xde   :  { %8664 = vst [vmem:[#allocation57_spill] sm:$0xff] %v5575_v29  ;;  %4073 = vrot.lane.b32.xlu1 %v4072_v33, %s5052_s14  ;;  %v8667_v33 = vrot.slane %v5416_v4, 7 }
  0xdf   :  { %4068 = vrot.lane.b32.xlu0 %v4067_v40, %s5049_s23 }
  0xe0   :  { %v5589_v35 = vpop.permute.xlu1 %241  ;;  %v5597_v40 = vsel %vm57_vm1, %v8667_v33, %v44_v24  ;;  %v338_v24 = vmul.f32 %v5337_v62, %v5601_v21 }
  0xe1   :  { %8665 = vst [vmem:[#allocation58_spill] sm:$0xff] %v5589_v35  ;;  %v5591_v3 = vpop.permute.xlu0 %239  ;;  %v336_v33 = vmul.f32 %v5308_v52, %v5597_v40 }
  0xe2   :  { %8666 = vst [vmem:[#allocation59_spill] sm:$0xff] %v5591_v3  ;;  %4083 = vrot.lane.b32.xlu1 %v4082_v42, %s5052_s14  ;;  %v194_v42 = vrot.slane %v5610_v54, 1  ;;  %v4102_v56 = vpack.i.bf16 %v338_v24, %v337_v49  ;;  %v401_v49 = vmul.f32 %v5393_v15, %v5563_v37 }
  0xe3   :  { %4078 = vrot.lane.b32.xlu0 %v4077_v5, %s5049_s23  ;;  %v8490_v5 = vrot.slane %v5610_v54, 7  ;;  %v4097_v34 = vpack.i.bf16 %v336_v33, %v335_v47  ;;  %v399_v47 = vmul.f32 %v5370_v9, %v213_v36  ;;  %v463_v36 = vmul.f32 %v5430_v12, %v5597_v40  ;;  %v545_v12 = vld [vmem:[%s8424_s1 + $0x68] sm:$0xff] }
  0xe4   :  { %v5622_v48 = vpop.permute.xlu1 %301  ;;  %v5636_v62 = vsel %vm202_vm0, %v193_v39, %v194_v42  ;;  %v400_v39 = vmul.f32 %v5368_v8, %v5571_v25  ;;  %v546_v8 = vld [vmem:[%s8424_s1 + $0x78] sm:$0xff] }
  0xe5   :  { %8668 = vst [vmem:[#allocation60_spill] sm:$0xff] %v5622_v48  ;;  %v5624_v43 = vpop.permute.xlu0 %299  ;;  %v5648_v24 = vsel %vm57_vm1, %v46_v16, %v8490_v5  ;;  %v402_v33 = vmul.f32 %v5391_v11, %v5636_v62  ;;  %v464_v16 = vmul.f32 %v5428_v46, %v5605_v41  ;;  %v465_v5 = vmul.f32 %v5438_v58, %v5601_v21  ;;  %v543_v58 = vld [vmem:[%s8424_s1 + $0x48] sm:$0xff] }
  0xe6   :  { %8669 = vst [vmem:[#allocation61_spill] sm:$0xff] %v5624_v43  ;;  %4093 = vrot.lane.b32.xlu1 %v4092_v26, %s5053_s15  ;;  %v4112_v26 = vpack.i.bf16 %v5519_v59, %v5532_v6  ;;  %v561_v52 = vmul.f32 %v545_v12, %v5636_v62 }
  0xe7   :  { %4088 = vrot.lane.b32.xlu0 %v4087_v60, %s5053_s15  ;;  %v4107_v60 = vpack.i.bf16 %v5498_v32, %v5416_v4  ;;  %v4122_v63 = vpack.i.bf16 %v402_v33, %v401_v49  ;;  %v544_v33 = vld [vmem:[%s8424_s1 + $0x58] sm:$0xff] }
  0xe8   :  { %v5630_v10 = vpop.permute.xlu1 %305  ;;  %v5699_v49 = vld [vmem:[%s8423_s0 + $0x58] sm:$0xff] }
  0xe9   :  { %8670 = vst [vmem:[#allocation62_spill] sm:$0xff] %v5630_v10  ;;  %v5632_v38 = vpop.permute.xlu0 %303 }
  0xea   :  { %8671 = vst [vmem:[#allocation63_spill] sm:$0xff] %v5632_v38  ;;  %4103 = vrot.lane.b32.xlu1 %v4102_v56, %s5054_s19 }
  0xeb   :  { %4098 = vrot.lane.b32.xlu0 %v4097_v34, %s5054_s19  ;;  %v466_v34 = vmul.f32 %v5436_v57, %v5648_v24  ;;  %v4127_v57 = vpack.i.bf16 %v464_v16, %v463_v36 }
  0xec   :  { %v5657_v56 = vpop.permute.xlu1 %365 }
  0xed   :  { %8672 = vst [vmem:[#allocation64_spill] sm:$0xff] %v5657_v56  ;;  %v5659_v4 = vpop.permute.xlu0 %363  ;;  %v4132_v46 = vpack.i.bf16 %v466_v34, %v465_v5  ;;  %v529_v5 = vmul.f32 %v5490_v22, %v5519_v59  ;;  %v559_v34 = vmul.f32 %v543_v58, %v5571_v25  ;;  %v197_v22 = vrot.slane %v5699_v49, 1 }
  0xee   :  { %8673 = vst [vmem:[#allocation65_spill] sm:$0xff] %v5659_v4  ;;  %4113 = vrot.lane.b32.xlu1 %v4112_v26, %s5055_s27  ;;  %v4117_v26 = vpack.i.bf16 %v400_v39, %v399_v47  ;;  %v528_v39 = vmul.f32 %v5471_v30, %v5532_v6  ;;  %v527_v47 = vmul.f32 %v5473_v13, %v5498_v32  ;;  %v5709_v32 = vld [vmem:[%s8423_s0 + $0x50] sm:$0xff] }
  0xef   :  { %4108 = vrot.lane.b32.xlu0 %v4107_v60, %s5055_s27  ;;  %v5678_v60 = vld [vmem:[%s8423_s0 + $0x48] sm:$0xff] }
  0xf0   :  { %v5671_v15 = vpop.permute.xlu1 %369  ;;  %v195_v6 = vrot.slane %v5678_v60, 1 }
  0xf1   :  { %8674 = vst [vmem:[#allocation66_spill] sm:$0xff] %v5671_v15  ;;  %v5673_v11 = vpop.permute.xlu0 %367 }
  0xf2   :  { %8675 = vst [vmem:[#allocation67_spill] sm:$0xff] %v5673_v11  ;;  %4123 = vrot.lane.b32.xlu1 %v4122_v63, %s5056_s5  ;;  %v530_v63 = vmul.f32 %v5488_v28, %v5610_v54  ;;  %v196_v28 = vrot.slane %v5709_v32, 1  ;;  %v209_v9 = vsel %vm202_vm0, %v194_v42, %v195_v6 }
  0xf3   :  { %4118 = vrot.lane.b32.xlu0 %v4117_v26, %s5056_s5  ;;  %v560_v26 = vmul.f32 %v544_v33, %v5563_v37  ;;  %v4137_v33 = vpack.i.bf16 %v528_v39, %v527_v47  ;;  %v180_v39 = vmul.f32 %v5552_v7, %v5678_v60 }
  0xf4   :  { %v5701_v16 = vpop.permute.xlu1 %429  ;;  %v4142_v25 = vpack.i.bf16 %v530_v63, %v529_v5  ;;  %v5746_v42 = vsel %vm202_vm0, %v195_v6, %v196_v28  ;;  %v49_v5 = vrot.slane %v5709_v32, 7 }
  0xf5   :  { %8676 = vst [vmem:[#allocation68_spill] sm:$0xff] %v5701_v16  ;;  %v5703_v36 = vpop.permute.xlu0 %427  ;;  %v4147_v53 = vpack.i.bf16 %v560_v26, %v559_v34  ;;  %v50_v34 = vrot.slane %v5699_v49, 7 }
  0xf6   :  { %8677 = vst [vmem:[#allocation69_spill] sm:$0xff] %v5703_v36  ;;  %4133 = vrot.lane.b32.xlu1 %v4132_v46, %s5057_s20  ;;  %v179_v46 = vmul.f32 %v5521_v20, %v5610_v54  ;;  %v562_v20 = vmul.f32 %v546_v8, %v209_v9  ;;  %v48_v8 = vrot.slane %v5678_v60, 7 }
  0xf7   :  { %4128 = vrot.lane.b32.xlu0 %v4127_v57, %s5057_s20  ;;  %v178_v57 = vmul.f32 %v5523_v27, %v5519_v59  ;;  %v5738_v59 = vsel %vm202_vm0, %v196_v28, %v197_v22  ;;  %v181_v27 = vmul.f32 %v5550_v2, %v5709_v32  ;;  %v275_v28 = vmul.f32 %v5575_v29, %v5636_v62 }
  0xf8   :  { %v5727_v58 = vpop.permute.xlu1 %433  ;;  %v4157_v26 = vpack.i.bf16 %v562_v20, %v561_v52  ;;  %v278_v6 = vmul.f32 %v5589_v35, %v5738_v59  ;;  %v5780_v62 = vsel %vm57_vm1, %v48_v8, %v49_v5  ;;  %v5785_v20 = vld [vmem:[%s8423_s0 + $0x60] sm:$0xff]  ;;  %v339_v35 = vmul.f32 %v5624_v43, %v5648_v24 }
  0xf9   :  { %8678 = vst [vmem:[#allocation70_spill] sm:$0xff] %v5727_v58  ;;  %v5729_v37 = vpop.permute.xlu0 %431  ;;  %v4152_v12 = vpack.i.bf16 %v179_v46, %v178_v57  ;;  %v277_v46 = vmul.f32 %v5591_v3, %v5746_v42  ;;  %v4162_v2 = vpack.i.bf16 %v181_v27, %v180_v39  ;;  %v8697_v43 = vrot.slane %v5320_v55, 1 }
  0xfa   :  { %8679 = vst [vmem:[#allocation71_spill] sm:$0xff] %v5729_v37  ;;  %4143 = vrot.lane.b32.xlu1 %v4142_v25, %s5058_s4  ;;  %v276_v25 = vmul.f32 %v5573_v23, %v209_v9 }
  0xfb   :  { %4138 = vrot.lane.b32.xlu0 %v4137_v33, %s5058_s4  ;;  %v4172_v27 = vpack.i.bf16 %v278_v6, %v277_v46 }
  0xfc   :  { %v5748_v47 = vpop.permute.xlu1 %493  ;;  %v4167_v39 = vpack.i.bf16 %v276_v25, %v275_v28 }
  0xfd   :  { %8680 = vst [vmem:[#allocation72_spill] sm:$0xff] %v5748_v47  ;;  %v5750_v63 = vpop.permute.xlu0 %491 }
  0xfe   :  { %8681 = vst [vmem:[#allocation73_spill] sm:$0xff] %v5750_v63  ;;  %4153 = vrot.lane.b32.xlu1 %v4152_v12, %s5052_s14  ;;  %v8684_v12 = vrot.slane %v5610_v54, 7 }
  0xff   :  { %4148 = vrot.lane.b32.xlu0 %v4147_v53, %s5049_s23  ;;  %v5776_v53 = vsel %vm57_vm1, %v49_v5, %v50_v34  ;;  %v341_v5 = vmul.f32 %v5632_v38, %v5780_v62 }
 0x100   :  { %v5764_v57 = vpop.permute.xlu1 %497  ;;  %v5772_v52 = vsel %vm57_vm1, %v8684_v12, %v48_v8  ;;  %v342_v8 = vmul.f32 %v5630_v10, %v5776_v53 }
 0x101   :  { %8682 = vst [vmem:[#allocation74_spill] sm:$0xff] %v5764_v57  ;;  %v5766_v33 = vpop.permute.xlu0 %495  ;;  %v340_v12 = vmul.f32 %v5622_v48, %v5772_v52 }
 0x102   :  { %8683 = vst [vmem:[#allocation75_spill] sm:$0xff] %v5766_v33  ;;  %4163 = vrot.lane.b32.xlu1 %v4162_v2, %s5052_s14  ;;  %v198_v2 = vrot.slane %v5785_v20, 1  ;;  %v4182_v6 = vpack.i.bf16 %v342_v8, %v341_v5  ;;  %v405_v5 = vmul.f32 %v5673_v11, %v5738_v59 }
 0x103   :  { %4158 = vrot.lane.b32.xlu0 %v4157_v26, %s5049_s23  ;;  %v8531_v26 = vrot.slane %v5785_v20, 7  ;;  %v4177_v46 = vpack.i.bf16 %v340_v12, %v339_v35  ;;  %v403_v35 = vmul.f32 %v5659_v4, %v209_v9  ;;  %v467_v9 = vmul.f32 %v5703_v36, %v5772_v52 }
 0x104   :  { %v5797_v3 = vpop.permute.xlu1 %148  ;;  %v5811_v10 = vsel %vm202_vm0, %v197_v22, %v198_v2  ;;  %v404_v22 = vmul.f32 %v5657_v56, %v5746_v42 }
 0x105   :  { %8685 = vst [vmem:[#allocation76_spill] sm:$0xff] %v5797_v3  ;;  %v5799_v7 = vpop.permute.xlu0 %146  ;;  %v5823_v8 = vsel %vm57_vm1, %v50_v34, %v8531_v26  ;;  %v406_v12 = vmul.f32 %v5671_v15, %v5811_v10  ;;  %v468_v34 = vmul.f32 %v5701_v16, %v5780_v62  ;;  %v469_v26 = vmul.f32 %v5729_v37, %v5776_v53  ;;  %v547_v37 = vld [vmem:[%s8424_s1 + $0x88] sm:$0xff] }
 0x106   :  { %8686 = vst [vmem:[#allocation77_spill] sm:$0xff] %v5799_v7  ;;  %4173 = vrot.lane.b32.xlu1 %v4172_v27, %s5053_s15  ;;  %v4192_v27 = vpack.i.bf16 %v5699_v49, %v5709_v32  ;;  %v183_v36 = vmul.f32 %v5797_v3, %v5785_v20 }
 0x107   :  { %4168 = vrot.lane.b32.xlu0 %v4167_v39, %s5053_s15  ;;  %v4187_v39 = vpack.i.bf16 %v5678_v60, %v5610_v54  ;;  %v4202_v38 = vpack.i.bf16 %v406_v12, %v405_v5  ;;  %v548_v12 = vld [vmem:[%s8424_s1 + $0x98] sm:$0xff] }
 0x108   :  { %v5805_v25 = vpop.permute.xlu1 %152 }
 0x109   :  { %8687 = vst [vmem:[#allocation78_spill] sm:$0xff] %v5805_v25  ;;  %v5807_v28 = vpop.permute.xlu0 %150 }
 0x10a   :  { %8688 = vst [vmem:[#allocation79_spill] sm:$0xff] %v5807_v28  ;;  %4183 = vrot.lane.b32.xlu1 %v4182_v6, %s5054_s19 }
 0x10b   :  { %4178 = vrot.lane.b32.xlu0 %v4177_v46, %s5054_s19  ;;  %v470_v46 = vmul.f32 %v5727_v58, %v5823_v8  ;;  %v4207_v58 = vpack.i.bf16 %v468_v34, %v467_v9 }
 0x10c   :  { %v5832_v6 = vpop.permute.xlu1 %245 }
 0x10d   :  { %8689 = vst [vmem:[#allocation80_spill] sm:$0xff] %v5832_v6  ;;  %v5834_v54 = vpop.permute.xlu0 %243  ;;  %v4212_v16 = vpack.i.bf16 %v470_v46, %v469_v26  ;;  %v533_v26 = vmul.f32 %v5766_v33, %v5699_v49  ;;  %v5879_v46 = vld [vmem:[%s8423_s0 + $0x70] sm:$0xff]  ;;  %v549_v33 = vld [vmem:[%s8424_s1 + $0xa8] sm:$0xff] }
 0x10e   :  { %8690 = vst [vmem:[#allocation81_spill] sm:$0xff] %v5834_v54  ;;  %4193 = vrot.lane.b32.xlu1 %v4192_v27, %s5055_s27  ;;  %v4197_v27 = vpack.i.bf16 %v404_v22, %v403_v35  ;;  %v532_v22 = vmul.f32 %v5748_v47, %v5709_v32  ;;  %v531_v35 = vmul.f32 %v5750_v63, %v5678_v60 }
 0x10f   :  { %4188 = vrot.lane.b32.xlu0 %v4187_v39, %s5055_s27  ;;  %v5853_v39 = vld [vmem:[%s8423_s0 + $0x68] sm:$0xff]  ;;  %v563_v60 = vmul.f32 %v547_v37, %v5746_v42  ;;  %v564_v32 = vmul.f32 %v548_v12, %v5738_v59  ;;  %v565_v4 = vmul.f32 %v549_v33, %v5811_v10 }
 0x110   :  { %v5846_v11 = vpop.permute.xlu1 %249  ;;  %v199_v9 = vrot.slane %v5853_v39, 1  ;;  %v4217_v42 = vpack.i.bf16 %v532_v22, %v531_v35  ;;  %v185_v22 = vmul.f32 %v5805_v25, %v5879_v46 }
 0x111   :  { %8691 = vst [vmem:[#allocation82_spill] sm:$0xff] %v5846_v11  ;;  %v5848_v15 = vpop.permute.xlu0 %247  ;;  %v4227_v56 = vpack.i.bf16 %v564_v32, %v563_v60 }
 0x112   :  { %8692 = vst [vmem:[#allocation83_spill] sm:$0xff] %v5848_v15  ;;  %4203 = vrot.lane.b32.xlu1 %v4202_v38, %s5056_s5  ;;  %v534_v38 = vmul.f32 %v5764_v57, %v5785_v20  ;;  %v550_v57 = vld [vmem:[%s8424_s1 + $0xb8] sm:$0xff]  ;;  %v205_v12 = vsel %vm202_vm0, %v198_v2, %v199_v9  ;;  %v184_v2 = vmul.f32 %v5807_v28, %v5853_v39 }
 0x113   :  { %4198 = vrot.lane.b32.xlu0 %v4197_v27, %s5056_s5  ;;  %v200_v27 = vrot.slane %v5879_v46, 1  ;;  %v566_v3 = vmul.f32 %v550_v57, %v205_v12  ;;  %v280_v32 = vmul.f32 %v5832_v6, %v205_v12 }
 0x114   :  { %v5871_v5 = vpop.permute.xlu1 %309  ;;  %v4222_v59 = vpack.i.bf16 %v534_v38, %v533_v26  ;;  %v52_v26 = vrot.slane %v5853_v39, 7 }
 0x115   :  { %8693 = vst [vmem:[#allocation84_spill] sm:$0xff] %v5871_v5  ;;  %v5873_v34 = vpop.permute.xlu0 %307  ;;  %v5917_v35 = vsel %vm202_vm0, %v199_v9, %v200_v27  ;;  %v4237_v60 = vpack.i.bf16 %v566_v3, %v565_v4  ;;  %v279_v9 = vmul.f32 %v5834_v54, %v5811_v10 }
 0x116   :  { %8694 = vst [vmem:[#allocation85_spill] sm:$0xff] %v5873_v34  ;;  %4213 = vrot.lane.b32.xlu1 %v4212_v16, %s5057_s20  ;;  %v182_v16 = vmul.f32 %v5799_v7, %v5699_v49  ;;  %v5909_v49 = vsel %vm202_vm0, %v200_v27, %v8697_v43  ;;  %v53_v43 = vrot.slane %v5879_v46, 7 }
 0x117   :  { %4208 = vrot.lane.b32.xlu0 %v4207_v58, %s5057_s20  ;;  %v282_v27 = vmul.f32 %v5846_v11, %v5909_v49  ;;  %v343_v11 = vmul.f32 %v5873_v34, %v5823_v8  ;;  %v551_v34 = vld [vmem:[%s8424_s1 + $0xc8] sm:$0xff] }
 0x118   :  { %v5896_v58 = vpop.permute.xlu1 %313  ;;  %v4232_v57 = vpack.i.bf16 %v183_v36, %v182_v16  ;;  %v281_v36 = vmul.f32 %v5848_v15, %v5917_v35  ;;  %v5952_v4 = vsel %vm57_vm1, %v52_v26, %v53_v43 }
 0x119   :  { %8695 = vst [vmem:[#allocation86_spill] sm:$0xff] %v5896_v58  ;;  %v5898_v37 = vpop.permute.xlu0 %311 }
 0x11a   :  { %8696 = vst [vmem:[#allocation87_spill] sm:$0xff] %v5898_v37  ;;  %4223 = vrot.lane.b32.xlu1 %v4222_v59, %s5058_s4  ;;  %v345_v15 = vmul.f32 %v5898_v37, %v5952_v4 }
 0x11b   :  { %4218 = vrot.lane.b32.xlu0 %v4217_v42, %s5058_s4  ;;  %v4242_v42 = vpack.i.bf16 %v185_v22, %v184_v2  ;;  %v4252_v22 = vpack.i.bf16 %v282_v27, %v281_v36  ;;  %v4247_v2 = vpack.i.bf16 %v280_v32, %v279_v9  ;;  %v4272_v36 = vpack.i.bf16 %v5320_v55, %v5879_v46 }
 0x11c   :  { %v5919_v38 = vpop.permute.xlu1 %373 }
 0x11d   :  { %8698 = vst [vmem:[#allocation88_spill] sm:$0xff] %v5919_v38  ;;  %v5921_v33 = vpop.permute.xlu0 %371 }
 0x11e   :  { %8699 = vst [vmem:[#allocation89_spill] sm:$0xff] %v5921_v33  ;;  %4233 = vrot.lane.b32.xlu1 %v4232_v57, %s5052_s14  ;;  %v8702_v57 = vrot.slane %v5785_v20, 7 }
 0x11f   :  { %4228 = vrot.lane.b32.xlu0 %v4227_v56, %s5049_s23  ;;  %v8703_v56 = vrot.slane %v5320_v55, 7 }
 0x120   :  { %v5934_v16 = vpop.permute.xlu1 %377  ;;  %v5942_v3 = vsel %vm57_vm1, %v8702_v57, %v52_v26 }
 0x121   :  { %8700 = vst [vmem:[#allocation90_spill] sm:$0xff] %v5934_v16  ;;  %v5936_v59 = vpop.permute.xlu0 %375  ;;  %v5948_v10 = vsel %vm57_vm1, %v53_v43, %v8703_v56  ;;  %v344_v57 = vmul.f32 %v5871_v5, %v5942_v3 }
 0x122   :  { %8701 = vst [vmem:[#allocation91_spill] sm:$0xff] %v5936_v59  ;;  %4243 = vrot.lane.b32.xlu1 %v4242_v42, %s5052_s14  ;;  %v346_v56 = vmul.f32 %v5896_v58, %v5948_v10  ;;  %v4267_v42 = vpack.i.bf16 %v5853_v39, %v5785_v20  ;;  %v410_v58 = vmul.f32 %v5934_v16, %v5351_v1 }
 0x123   :  { %4238 = vrot.lane.b32.xlu0 %v4237_v60, %s5049_s23  ;;  %v4257_v27 = vpack.i.bf16 %v344_v57, %v343_v11 }
 0x124   :  { %v5964_v26 = vpop.permute.xlu1 %437  ;;  %v4262_v9 = vpack.i.bf16 %v346_v56, %v345_v15  ;;  %v409_v15 = vmul.f32 %v5936_v59, %v5909_v49 }
 0x125   :  { %8704 = vst [vmem:[#allocation92_spill] sm:$0xff] %v5964_v26  ;;  %v5966_v43 = vpop.permute.xlu0 %435  ;;  %v472_v20 = vmul.f32 %v5964_v26, %v5952_v4 }
 0x126   :  { %8705 = vst [vmem:[#allocation93_spill] sm:$0xff] %v5966_v43  ;;  %4253 = vrot.lane.b32.xlu1 %v4252_v22, %s5053_s15  ;;  %v408_v22 = vmul.f32 %v5919_v38, %v5917_v35  ;;  %v4282_v38 = vpack.i.bf16 %v410_v58, %v409_v15  ;;  %v552_v58 = vld [vmem:[%s8424_s1 + $0xd8] sm:$0xff] }
 0x127   :  { %4248 = vrot.lane.b32.xlu0 %v4247_v2, %s5053_s15  ;;  %v407_v2 = vmul.f32 %v5921_v33, %v205_v12  ;;  %v471_v12 = vmul.f32 %v5966_v43, %v5942_v3  ;;  %v554_v33 = vld [vmem:[%s8424_s1 + $0xf8] sm:$0xff] }
 0x128   :  { %v5970_v60 = vpop.permute.xlu1 %441 }
 0x129   :  { %8706 = vst [vmem:[#allocation94_spill] sm:$0xff] %v5970_v60  ;;  %v5972_v32 = vpop.permute.xlu0 %439  ;;  %v474_v56 = vmul.f32 %v5970_v60, %v5403_v17  ;;  %v4287_v43 = vpack.i.bf16 %v472_v20, %v471_v12 }
 0x12a   :  { %8707 = vst [vmem:[#allocation95_spill] sm:$0xff] %v5972_v32  ;;  %4263 = vrot.lane.b32.xlu1 %v4262_v9, %s5054_s19  ;;  %v473_v9 = vmul.f32 %v5972_v32, %v5948_v10 }
 0x12b   :  { %4258 = vrot.lane.b32.xlu0 %v4257_v27, %s5054_s19 }
 0x12c   :  { %v5987_v11 = vpop.permute.xlu1 %501  ;;  %v4292_v26 = vpack.i.bf16 %v474_v56, %v473_v9  ;;  %v570_v9 = vmul.f32 %v554_v33, %v5345_v0  ;;  %v4945_v33 = vld [vmem:[%s8424_s1 + $0x10] sm:$0xff] }
 0x12d   :  { %8708 = vst [vmem:[#allocation96_spill] sm:$0xff] %v5987_v11  ;;  %v5989_v57 = vpop.permute.xlu0 %499 }
 0x12e   :  { %8709 = vst [vmem:[#allocation97_spill] sm:$0xff] %v5989_v57  ;;  %4273 = vrot.lane.b32.xlu1 %v4272_v36, %s5055_s27  ;;  %v4277_v36 = vpack.i.bf16 %v408_v22, %v407_v2  ;;  %v535_v22 = vmul.f32 %v5989_v57, %v5853_v39  ;;  %v568_v39 = vmul.f32 %v552_v58, %v5909_v49  ;;  %v4944_v49 = vld [vmem:[%s8424_s1 + $0x20] sm:$0xff] }
 0x12f   :  { %4268 = vrot.lane.b32.xlu0 %v4267_v42, %s5055_s27  ;;  %v553_v42 = vld [vmem:[%s8424_s1 + $0xe8] sm:$0xff] }
 0x130   :  { %v6001_v27 = vpop.permute.xlu1 %505  ;;  %v569_v56 = vmul.f32 %v553_v42, %v5351_v1 }
 0x131   :  { %8710 = vst [vmem:[#allocation98_spill] sm:$0xff] %v6001_v27  ;;  %v6003_v37 = vpop.permute.xlu0 %503  ;;  %v538_v2 = vmul.f32 %v6001_v27, %v5304_v50 }
 0x132   :  { %8711 = vst [vmem:[#allocation99_spill] sm:$0xff] %v6003_v37  ;;  %4283 = vrot.lane.b32.xlu1 %v4282_v38, %s5056_s5  ;;  %v536_v38 = vmul.f32 %v5987_v11, %v5879_v46  ;;  %v537_v15 = vmul.f32 %v6003_v37, %v5320_v55  ;;  %v567_v46 = vmul.f32 %v551_v34, %v5917_v35 }
 0x133   :  { %4278 = vrot.lane.b32.xlu0 %v4277_v36, %s5056_s5  ;;  %v4312_v55 = vpack.i.bf16 %v570_v9, %v569_v56  ;;  %v92_v35 = vmul.f32 %v4944_v49, %v5397_v31 }
 0x134   :  { %v4004_v20 = vpop.permute.xlu1 %4003  ;;  %v4302_v50 = vpack.i.bf16 %v538_v2, %v537_v15  ;;  %v4297_v27 = vpack.i.bf16 %v536_v38, %v535_v22  ;;  %v4307_v1 = vpack.i.bf16 %v568_v39, %v567_v46  ;;  %v4947_v38 = vld [vmem:[%s8424_s1] sm:$0xff] }
 0x135   :  { %v3999_v12 = vpop.permute.xlu0 %3998  ;;  %v90_v22 = vmul.f32 %v4947_v38, %v5948_v10  ;;  %v4006_v15 = vunpack.i.h.bf16 %v4004_v20  ;;  %v4005_v56 = vunpack.i.l.bf16 %v4004_v20 }
 0x136   :  { %4293 = vrot.lane.b32.xlu1 %v4292_v26, %s5057_s20  ;;  %v4000_v9 = vunpack.i.l.bf16 %v3999_v12 }
 0x137   :  { %4288 = vrot.lane.b32.xlu0 %v4287_v43, %s5057_s20  ;;  %v91_v43 = vmul.f32 %v4945_v33, %v5403_v17  ;;  %v4001_v17 = vunpack.i.h.bf16 %v3999_v12  ;;  %v1086_v33 = vsel %vm1083_vm3, %v92_v35, %v4005_v56 }
 0x138   :  { %v4014_v36 = vpop.permute.xlu1 %4013  ;;  %v1084_v12 = vsel %vm1083_vm3, %v90_v22, %v4000_v9 }
 0x139   :  { %v4009_v5 = vpop.permute.xlu0 %4008  ;;  %v4016_v46 = vunpack.i.h.bf16 %v4014_v36  ;;  %v4015_v39 = vunpack.i.l.bf16 %v4014_v36  ;;  %v1085_v36 = vsel %vm1083_vm3, %v91_v43, %v4001_v17 }
 0x13a   :  { %4303 = vrot.lane.b32.xlu1 %v4302_v50, %s5058_s4  ;;  %v4010_v50 = vunpack.i.l.bf16 %v4009_v5 }
 0x13b   :  { %4298 = vrot.lane.b32.xlu0 %v4297_v27, %s5058_s4  ;;  %v4946_v27 = vld [vmem:[%s8424_s1 + $0x30] sm:$0xff] }
 0x13c   :  { %v4024_v42 = vpop.permute.xlu1 %4023  ;;  %v93_v58 = vmul.f32 %v4946_v27, %v5411_v19  ;;  %v4011_v19 = vunpack.i.h.bf16 %v4009_v5  ;;  %v1103_v5 = vsel %vm1100_vm4, %v1086_v33, %v4015_v39 }
 0x13d   :  { %v4019_v26 = vpop.permute.xlu0 %4018 }
 0x13e   :  { %4313 = vrot.lane.b32.xlu1 %v4312_v55, %s5049_s23  ;;  %v4026_v55 = vunpack.i.h.bf16 %v4024_v42  ;;  %v1087_v20 = vsel %vm1083_vm3, %v93_v58, %v4006_v15  ;;  %v4021_v27 = vunpack.i.h.bf16 %v4019_v26  ;;  %v4020_v38 = vunpack.i.l.bf16 %v4019_v26 }
 0x13f   :  { %4308 = vrot.lane.b32.xlu0 %v4307_v1, %s5049_s23  ;;  %v4025_v1 = vunpack.i.l.bf16 %v4024_v42  ;;  %v1104_v37 = vsel %vm1100_vm4, %v1087_v20, %v4016_v46  ;;  %v1101_v42 = vsel %vm1100_vm4, %v1084_v12, %v4010_v50  ;;  %v1102_v60 = vsel %vm1100_vm4, %v1085_v36, %v4011_v19 }
 0x140   :  { %v6037_v0 = vpop.permute.xlu1 %4033  ;;  %v1121_v58 = vsel %vm1117_vm5, %v1104_v37, %v4026_v55  ;;  %v1119_v43 = vsel %vm1117_vm5, %v1102_v60, %v4021_v27  ;;  %v1118_v17 = vsel %vm1117_vm5, %v1101_v42, %v4020_v38 }
 0x141   :  { %v4029_v34 = vpop.permute.xlu0 %4028  ;;  %v1120_v35 = vsel %vm1117_vm5, %v1103_v5, %v4025_v1  ;;  %v4036_v39 = vunpack.i.h.bf16 %v6037_v0  ;;  %v4035_v19 = vunpack.i.l.bf16 %v6037_v0 }
 0x142   :  { %v4031_v32 = vunpack.i.h.bf16 %v4029_v34  ;;  %v4030_v54 = vunpack.i.l.bf16 %v4029_v34 }
 0x144   :  { %v6055_v31 = vpop.permute.xlu1 %4043  ;;  %v1135_v1 = vsel %vm1134_vm6, %v1118_v17, %v4030_v54  ;;  %v1136_v37 = vsel %vm1134_vm6, %v1119_v43, %v4031_v32 }
 0x145   :  { %v4039_v2 = vpop.permute.xlu0 %4038  ;;  %v4045_v55 = vunpack.i.l.bf16 %v6055_v31 }
 0x146   :  { %v4041_v26 = vunpack.i.h.bf16 %v4039_v2  ;;  %v4040_v15 = vunpack.i.l.bf16 %v4039_v2  ;;  %v4046_v2 = vunpack.i.h.bf16 %v6055_v31 }
 0x148   :  { %v4054_v10 = vpop.permute.xlu1 %4053  ;;  %v1152_v60 = vsel %vm1151_vm7, %v1135_v1, %v4040_v15  ;;  %v1153_v33 = vsel %vm1151_vm7, %v1136_v37, %v4041_v26  ;;  %v1137_v15 = vsel %vm1134_vm6, %v1120_v35, %v4035_v19  ;;  %v1138_v26 = vsel %vm1134_vm6, %v1121_v58, %v4036_v39 }
 0x149   :  { %v4049_v49 = vpop.permute.xlu0 %4048  ;;  %v4056_v20 = vunpack.i.h.bf16 %v4054_v10  ;;  %v1154_v43 = vsel %vm1151_vm7, %v1137_v15, %v4045_v55  ;;  %v1155_v17 = vsel %vm1151_vm7, %v1138_v26, %v4046_v2  ;;  %v4951_v15 = vld [vmem:[%s8424_s1 + $0x70] sm:$0xff] }
 0x14a   :  { %v4051_v9 = vunpack.i.h.bf16 %v4049_v49  ;;  %v4050_v46 = vunpack.i.l.bf16 %v4049_v49  ;;  %v4055_v49 = vunpack.i.l.bf16 %v4054_v10 }
 0x14c   :  { %v4064_v22 = vpop.permute.xlu1 %4063  ;;  %v1169_v36 = vsel %vm1168_vm8, %v1152_v60, %v4050_v46  ;;  %v1170_v54 = vsel %vm1168_vm8, %v1153_v33, %v4051_v9 }
 0x14d   :  { %v4059_v56 = vpop.permute.xlu0 %4058  ;;  %v4066_v32 = vunpack.i.h.bf16 %v4064_v22  ;;  %v4065_v5 = vunpack.i.l.bf16 %v4064_v22  ;;  %v1171_v22 = vsel %vm1168_vm8, %v1154_v43, %v4055_v49 }
 0x14e   :  { %v4061_v34 = vunpack.i.h.bf16 %v4059_v56  ;;  %v4060_v50 = vunpack.i.l.bf16 %v4059_v56 }
 0x14f   :  { %v1188_v35 = vsel %vm1185_vm9, %v1171_v22, %v4065_v5 }
 0x150   :  { %v6077_v27 = vpop.permute.xlu1 %4073  ;;  %v1186_v42 = vsel %vm1185_vm9, %v1169_v36, %v4060_v50  ;;  %v1187_v31 = vsel %vm1185_vm9, %v1170_v54, %v4061_v34  ;;  %v1172_v50 = vsel %vm1168_vm8, %v1155_v17, %v4056_v20  ;;  %v4949_v36 = vld [vmem:[%s8424_s1 + $0x50] sm:$0xff] }
 0x151   :  { %v4069_v38 = vpop.permute.xlu0 %4068  ;;  %v1189_v58 = vsel %vm1185_vm9, %v1172_v50, %v4066_v32  ;;  %v95_v54 = vmul.f32 %v4949_v36, %v5460_v61  ;;  %v4075_v61 = vunpack.i.l.bf16 %v6077_v27 }
 0x152   :  { %v4071_v0 = vunpack.i.h.bf16 %v4069_v38  ;;  %v4070_v12 = vunpack.i.l.bf16 %v4069_v38 }
 0x154   :  { %v1203_v10 = vsel %vm1202_vm10, %v1186_v42, %v4070_v12  ;;  %v1204_v56 = vsel %vm1202_vm10, %v1187_v31, %v4071_v0  ;;  %v4084_v46 = vpop.permute.xlu1 %4083  ;;  %v4948_v0 = vld [vmem:[%s8424_s1 + $0x40] sm:$0xff] }
 0x155   :  { %v4079_v9 = vpop.permute.xlu0 %4078  ;;  %v1219_v1 = vpack.c.bf16 %v1204_v56, %v1203_v10  ;;  %v94_v12 = vmul.f32 %v4948_v0, %v5407_v18  ;;  %v4950_v42 = vld [vmem:[%s8424_s1 + $0x60] sm:$0xff]  ;;  %v97_v18 = vmul.f32 %v4951_v15, %v5605_v41  ;;  %v4086_v26 = vunpack.i.h.bf16 %v4084_v46 }
 0x156   :  { %v4081_v34 = vunpack.i.h.bf16 %v4079_v9  ;;  %v4080_v37 = vunpack.i.l.bf16 %v4079_v9  ;;  %v96_v31 = vmul.f32 %v4950_v42, %v5597_v40  ;;  %v4085_v10 = vunpack.i.l.bf16 %v4084_v46 }
 0x157   :  { %3939 = vmatprep.mubr.msk.bf16.mxu0 %vm1249_vm11, %v1219_v1  ;;  %v4076_v56 = vunpack.i.h.bf16 %v6077_v27 }
 0x158   :  { %v1206_v39 = vsel %vm1202_vm10, %v1189_v58, %v4081_v34  ;;  %v1205_v19 = vsel %vm1202_vm10, %v1188_v35, %v4080_v37  ;;  %v4094_v2 = vpop.permute.xlu1 %4093  ;;  %v1091_v37 = vsel %vm1083_vm3, %v97_v18, %v4086_v26  ;;  %v1090_v35 = vsel %vm1083_vm3, %v96_v31, %v4085_v10 }
 0x159   :  { %v4089_v55 = vpop.permute.xlu0 %4088  ;;  %v1220_v60 = vpack.c.bf16 %v1206_v39, %v1205_v19  ;;  %v4096_v43 = vunpack.i.h.bf16 %v4094_v2  ;;  %v4095_v17 = vunpack.i.l.bf16 %v4094_v2  ;;  %v1089_v46 = vsel %vm1083_vm3, %v95_v54, %v4076_v56 }
 0x15a   :  { %v4091_v9 = vunpack.i.h.bf16 %v4089_v55  ;;  %v4090_v1 = vunpack.i.l.bf16 %v4089_v55  ;;  %v1088_v39 = vsel %vm1083_vm3, %v94_v12, %v4075_v61 }
 0x15b   :  { %3940 = vmatmul.mubr.msk.bf16.vlgmr.msra.gmra.mxu0 %vm1249_vm11, %v1220_v60  ;;  %v1107_v27 = vsel %vm1100_vm4, %v1090_v35, %v4095_v17  ;;  %v1108_v19 = vsel %vm1100_vm4, %v1091_v37, %v4096_v43 }
 0x15c   :  { %v4104_v33 = vpop.permute.xlu1 %4103  ;;  %v1106_v2 = vsel %vm1100_vm4, %v1089_v46, %v4091_v9  ;;  %v1105_v55 = vsel %vm1100_vm4, %v1088_v39, %v4090_v1 }
 0x15d   :  { %v4099_v49 = vpop.permute.xlu0 %4098  ;;  %v4106_v22 = vunpack.i.h.bf16 %v4104_v33  ;;  %v4105_v50 = vunpack.i.l.bf16 %v4104_v33 }
 0x15e   :  { %v4101_v58 = vunpack.i.h.bf16 %v4099_v49  ;;  %v4100_v41 = vunpack.i.l.bf16 %v4099_v49 }
 0x15f   :  { %v1124_v0 = vsel %vm1117_vm5, %v1107_v27, %v4105_v50  ;;  %v1125_v36 = vsel %vm1117_vm5, %v1108_v19, %v4106_v22 }
 0x160   :  { %v6097_v20 = vpop.permute.xlu1 %4113  ;;  %v1122_v12 = vsel %vm1117_vm5, %v1105_v55, %v4100_v41  ;;  %v1123_v15 = vsel %vm1117_vm5, %v1106_v2, %v4101_v58 }
 0x161   :  { %v4109_v38 = vpop.permute.xlu0 %4108  ;;  %v4116_v10 = vunpack.i.h.bf16 %v6097_v20  ;;  %v4115_v56 = vunpack.i.l.bf16 %v6097_v20 }
 0x162   :  { %v4111_v60 = vunpack.i.h.bf16 %v4109_v38  ;;  %v4110_v33 = vunpack.i.l.bf16 %v4109_v38 }
 0x163   :  { %v1141_v2 = vsel %vm1134_vm6, %v1124_v0, %v4115_v56  ;;  %v1142_v55 = vsel %vm1134_vm6, %v1125_v36, %v4116_v10 }
 0x164   :  { %v6107_v32 = vpop.permute.xlu1 %4123  ;;  %v1139_v43 = vsel %vm1134_vm6, %v1122_v12, %v4110_v33  ;;  %v1140_v17 = vsel %vm1134_vm6, %v1123_v15, %v4111_v60 }
 0x165   :  { %v4119_v5 = vpop.permute.xlu0 %4118  ;;  %v4125_v9 = vunpack.i.l.bf16 %v6107_v32 }
 0x166   :  { %v4121_v42 = vunpack.i.h.bf16 %v4119_v5  ;;  %v4120_v49 = vunpack.i.l.bf16 %v4119_v5  ;;  %v4126_v5 = vunpack.i.h.bf16 %v6107_v32 }
 0x167   :  { %v1158_v33 = vsel %vm1151_vm7, %v1141_v2, %v4125_v9 }
 0x168   :  { %v4134_v34 = vpop.permute.xlu1 %4133  ;;  %v1156_v1 = vsel %vm1151_vm7, %v1139_v43, %v4120_v49  ;;  %v1157_v22 = vsel %vm1151_vm7, %v1140_v17, %v4121_v42  ;;  %v1159_v42 = vsel %vm1151_vm7, %v1142_v55, %v4126_v5 }
 0x169   :  { %v4129_v40 = vpop.permute.xlu0 %4128  ;;  %v4136_v50 = vunpack.i.h.bf16 %v4134_v34 }
 0x16a   :  { %v4131_v18 = vunpack.i.h.bf16 %v4129_v40  ;;  %v4130_v26 = vunpack.i.l.bf16 %v4129_v40  ;;  %v4135_v40 = vunpack.i.l.bf16 %v4134_v34 }
 0x16b   :  { %v1176_v15 = vsel %vm1168_vm8, %v1159_v42, %v4136_v50 }
 0x16c   :  { %v4144_v31 = vpop.permute.xlu1 %4143  ;;  %v1173_v20 = vsel %vm1168_vm8, %v1156_v1, %v4130_v26  ;;  %v1174_v58 = vsel %vm1168_vm8, %v1157_v22, %v4131_v18  ;;  %v4952_v22 = vld [vmem:[%s8424_s1 + $0x80] sm:$0xff] }
 0x16d   :  { %v4139_v54 = vpop.permute.xlu0 %4138  ;;  %v4146_v39 = vunpack.i.h.bf16 %v4144_v31  ;;  %v4145_v27 = vunpack.i.l.bf16 %v4144_v31  ;;  %v1175_v31 = vsel %vm1168_vm8, %v1158_v33, %v4135_v40  ;;  %v98_v50 = vmul.f32 %v4952_v22, %v5601_v21  ;;  %v4953_v40 = vld [vmem:[%s8424_s1 + $0x90] sm:$0xff] }
 0x16e   :  { %v4141_v61 = vunpack.i.h.bf16 %v4139_v54  ;;  %v4140_v38 = vunpack.i.l.bf16 %v4139_v54 }
 0x16f   :  { %v1192_v0 = vsel %vm1185_vm9, %v1175_v31, %v4145_v27  ;;  %v1193_v36 = vsel %vm1185_vm9, %v1176_v15, %v4146_v39  ;;  %v4955_v39 = vld [vmem:[%s8424_s1 + $0xb0] sm:$0xff] }
 0x170   :  { %v6139_v37 = vpop.permute.xlu1 %4153  ;;  %v1190_v19 = vsel %vm1185_vm9, %v1173_v20, %v4140_v38  ;;  %v1191_v32 = vsel %vm1185_vm9, %v1174_v58, %v4141_v61  ;;  %v101_v21 = vmul.f32 %v4955_v39, %v5780_v62 }
 0x171   :  { %v4149_v35 = vpop.permute.xlu0 %4148 }
 0x172   :  { %v4151_v41 = vunpack.i.h.bf16 %v4149_v35  ;;  %v4150_v46 = vunpack.i.l.bf16 %v4149_v35  ;;  %v99_v35 = vmul.f32 %v4953_v40, %v5648_v24  ;;  %v4155_v24 = vunpack.i.l.bf16 %v6139_v37 }
 0x174   :  { %v1207_v34 = vsel %vm1202_vm10, %v1190_v19, %v4150_v46  ;;  %v1208_v60 = vsel %vm1202_vm10, %v1191_v32, %v4151_v41  ;;  %v4164_v49 = vpop.permute.xlu1 %4163  ;;  %v4954_v41 = vld [vmem:[%s8424_s1 + $0xa0] sm:$0xff]  ;;  %v4156_v32 = vunpack.i.h.bf16 %v6139_v37 }
 0x175   :  { %v4159_v54 = vpop.permute.xlu0 %4158  ;;  %v1221_v12 = vpack.c.bf16 %v1208_v60, %v1207_v34  ;;  %v100_v46 = vmul.f32 %v4954_v41, %v5772_v52  ;;  %v4166_v27 = vunpack.i.h.bf16 %v4164_v49  ;;  %v4165_v19 = vunpack.i.l.bf16 %v4164_v49 }
 0x176   :  { %v4161_v18 = vunpack.i.h.bf16 %v4159_v54  ;;  %v4160_v26 = vunpack.i.l.bf16 %v4159_v54  ;;  %v1093_v49 = vsel %vm1083_vm3, %v99_v35, %v4156_v32 }
 0x177   :  { %3943 = vmatprep.mubr.msk.bf16.mxu0 %vm1249_vm11, %v1221_v12  ;;  %v1095_v12 = vsel %vm1083_vm3, %v101_v21, %v4166_v27  ;;  %v1094_v31 = vsel %vm1083_vm3, %v100_v46, %v4165_v19 }
 0x178   :  { %v1210_v10 = vsel %vm1202_vm10, %v1193_v36, %v4161_v18  ;;  %v1209_v56 = vsel %vm1202_vm10, %v1192_v0, %v4160_v26  ;;  %v4174_v61 = vpop.permute.xlu1 %4173  ;;  %v1092_v18 = vsel %vm1083_vm3, %v98_v50, %v4155_v24 }
 0x179   :  { %v4169_v38 = vpop.permute.xlu0 %4168  ;;  %v1222_v43 = vpack.c.bf16 %v1210_v10, %v1209_v56  ;;  %v4176_v2 = vunpack.i.h.bf16 %v4174_v61  ;;  %v4175_v55 = vunpack.i.l.bf16 %v4174_v61 }
 0x17a   :  { %v4171_v34 = vunpack.i.h.bf16 %v4169_v38  ;;  %v4170_v60 = vunpack.i.l.bf16 %v4169_v38 }
 0x17b   :  { %3944 = vmatmul.mubr.msk.bf16.gmra.mxu0 %vm1249_vm11, %v1222_v43  ;;  %v1111_v37 = vsel %vm1100_vm4, %v1094_v31, %v4175_v55  ;;  %v1112_v26 = vsel %vm1100_vm4, %v1095_v12, %v4176_v2 }
 0x17c   :  { %v4184_v17 = vpop.permute.xlu1 %4183  ;;  %v1110_v0 = vsel %vm1100_vm4, %v1093_v49, %v4171_v34  ;;  %v1109_v36 = vsel %vm1100_vm4, %v1092_v18, %v4170_v60 }
 0x17d   :  { %v4179_v5 = vpop.permute.xlu0 %4178  ;;  %v4186_v33 = vunpack.i.h.bf16 %v4184_v17  ;;  %v4185_v42 = vunpack.i.l.bf16 %v4184_v17 }
 0x17e   :  { %v4181_v15 = vunpack.i.h.bf16 %v4179_v5  ;;  %v4180_v62 = vunpack.i.l.bf16 %v4179_v5 }
 0x17f   :  { %v1128_v61 = vsel %vm1117_vm5, %v1111_v37, %v4185_v42  ;;  %v1129_v38 = vsel %vm1117_vm5, %v1112_v26, %v4186_v33 }
 0x180   :  { %v6159_v9 = vpop.permute.xlu1 %4193  ;;  %v1126_v50 = vsel %vm1117_vm5, %v1109_v36, %v4180_v62  ;;  %v1127_v40 = vsel %vm1117_vm5, %v1110_v0, %v4181_v15 }
 0x181   :  { %v4189_v1 = vpop.permute.xlu0 %4188  ;;  %v4196_v46 = vunpack.i.h.bf16 %v6159_v9  ;;  %v4195_v39 = vunpack.i.l.bf16 %v6159_v9 }
 0x182   :  { %v4191_v10 = vunpack.i.h.bf16 %v4189_v1  ;;  %v4190_v56 = vunpack.i.l.bf16 %v4189_v1 }
 0x183   :  { %v1145_v49 = vsel %vm1134_vm6, %v1128_v61, %v4195_v39  ;;  %v1146_v18 = vsel %vm1134_vm6, %v1129_v38, %v4196_v46 }
 0x184   :  { %v6169_v20 = vpop.permute.xlu1 %4203  ;;  %v1143_v27 = vsel %vm1134_vm6, %v1126_v50, %v4190_v56  ;;  %v1144_v19 = vsel %vm1134_vm6, %v1127_v40, %v4191_v10 }
 0x185   :  { %v4199_v58 = vpop.permute.xlu0 %4198  ;;  %v4205_v32 = vunpack.i.l.bf16 %v6169_v20 }
 0x186   :  { %v4201_v43 = vunpack.i.h.bf16 %v4199_v58  ;;  %v4200_v17 = vunpack.i.l.bf16 %v4199_v58  ;;  %v4206_v58 = vunpack.i.h.bf16 %v6169_v20 }
 0x187   :  { %v1162_v26 = vsel %vm1151_vm7, %v1145_v49, %v4205_v32  ;;  %v4957_v32 = vld [vmem:[%s8424_s1 + $0xd0] sm:$0xff] }
 0x188   :  { %v4214_v54 = vpop.permute.xlu1 %4213  ;;  %v1160_v24 = vsel %vm1151_vm7, %v1143_v27, %v4200_v17  ;;  %v1161_v2 = vsel %vm1151_vm7, %v1144_v19, %v4201_v43  ;;  %v1163_v0 = vsel %vm1151_vm7, %v1146_v18, %v4206_v58  ;;  %v4956_v19 = vld [vmem:[%s8424_s1 + $0xc0] sm:$0xff] }
 0x189   :  { %v4209_v52 = vpop.permute.xlu0 %4208  ;;  %v4216_v55 = vunpack.i.h.bf16 %v4214_v54  ;;  %v4215_v34 = vunpack.i.l.bf16 %v4214_v54  ;;  %v102_v58 = vmul.f32 %v4956_v19, %v5776_v53 }
 0x18a   :  { %v4211_v35 = vunpack.i.h.bf16 %v4209_v52  ;;  %v4210_v41 = vunpack.i.l.bf16 %v4209_v52 }
 0x18b   :  { %v1179_v43 = vsel %vm1168_vm8, %v1162_v26, %v4215_v34  ;;  %v1180_v17 = vsel %vm1168_vm8, %v1163_v0, %v4216_v55  ;;  %v4959_v34 = vld [vmem:[%s8424_s1 + $0xf0] sm:$0xff] }
 0x18c   :  { %v4224_v5 = vpop.permute.xlu1 %4223  ;;  %v1177_v9 = vsel %vm1168_vm8, %v1160_v24, %v4210_v41  ;;  %v1178_v42 = vsel %vm1168_vm8, %v1161_v2, %v4211_v35  ;;  %v103_v24 = vmul.f32 %v4957_v32, %v5823_v8  ;;  %v4958_v2 = vld [vmem:[%s8424_s1 + $0xe0] sm:$0xff] }
 0x18d   :  { %v4219_v22 = vpop.permute.xlu0 %4218  ;;  %v4226_v31 = vunpack.i.h.bf16 %v4224_v5  ;;  %v4225_v15 = vunpack.i.l.bf16 %v4224_v5  ;;  %v104_v55 = vmul.f32 %v4958_v2, %v5942_v3 }
 0x18e   :  { %v4221_v21 = vunpack.i.h.bf16 %v4219_v22  ;;  %v4220_v1 = vunpack.i.l.bf16 %v4219_v22 }
 0x18f   :  { %v1196_v61 = vsel %vm1185_vm9, %v1179_v43, %v4225_v15  ;;  %v1197_v38 = vsel %vm1185_vm9, %v1180_v17, %v4226_v31 }
 0x190   :  { %v4234_v60 = vpop.permute.xlu1 %4233  ;;  %v1194_v62 = vsel %vm1185_vm9, %v1177_v9, %v4220_v1  ;;  %v1195_v20 = vsel %vm1185_vm9, %v1178_v42, %v4221_v21 }
 0x191   :  { %v4229_v33 = vpop.permute.xlu0 %4228  ;;  %v4236_v9 = vunpack.i.h.bf16 %v4234_v60  ;;  %v4235_v53 = vunpack.i.l.bf16 %v4234_v60 }
 0x192   :  { %v4231_v52 = vunpack.i.h.bf16 %v4229_v33  ;;  %v4230_v12 = vunpack.i.l.bf16 %v4229_v33  ;;  %v105_v33 = vmul.f32 %v4959_v34, %v5952_v4 }
 0x193   :  { %v1096_v26 = vsel %vm1083_vm3, %v102_v58, %v4235_v53 }
 0x194   :  { %v1211_v54 = vsel %vm1202_vm10, %v1194_v62, %v4230_v12  ;;  %v1212_v37 = vsel %vm1202_vm10, %v1195_v20, %v4231_v52  ;;  %v4244_v36 = vpop.permute.xlu1 %4243 }
 0x195   :  { %v4239_v10 = vpop.permute.xlu0 %4238  ;;  %v1223_v56 = vpack.c.bf16 %v1212_v37, %v1211_v54  ;;  %v4246_v42 = vunpack.i.h.bf16 %v4244_v36  ;;  %v4245_v52 = vunpack.i.l.bf16 %v4244_v36  ;;  %v1097_v37 = vsel %vm1083_vm3, %v103_v24, %v4236_v9 }
 0x196   :  { %v4241_v5 = vunpack.i.h.bf16 %v4239_v10  ;;  %v4240_v22 = vunpack.i.l.bf16 %v4239_v10 }
 0x197   :  { %3947 = vmatprep.mubr.msk.bf16.mxu0 %vm1249_vm11, %v1223_v56  ;;  %v1099_v4 = vsel %vm1083_vm3, %v105_v33, %v4246_v42  ;;  %v1098_v60 = vsel %vm1083_vm3, %v104_v55, %v4245_v52 }
 0x198   :  { %v1214_v50 = vsel %vm1202_vm10, %v1197_v38, %v4241_v5  ;;  %v1213_v40 = vsel %vm1202_vm10, %v1196_v61, %v4240_v22  ;;  %v4254_v35 = vpop.permute.xlu1 %4253 }
 0x199   :  { %v4249_v41 = vpop.permute.xlu0 %4248  ;;  %v1224_v46 = vpack.c.bf16 %v1214_v50, %v1213_v40  ;;  %v4256_v12 = vunpack.i.h.bf16 %v4254_v35  ;;  %v4255_v31 = vunpack.i.l.bf16 %v4254_v35 }
 0x19a   :  { %v4251_v15 = vunpack.i.h.bf16 %v4249_v41  ;;  %v4250_v8 = vunpack.i.l.bf16 %v4249_v41 }
 0x19b   :  { %3948 = vmatmul.mubr.msk.bf16.gmra.mxu0 %vm1249_vm11, %v1224_v46  ;;  %v1115_v0 = vsel %vm1100_vm4, %v1098_v60, %v4255_v31  ;;  %v1116_v36 = vsel %vm1100_vm4, %v1099_v4, %v4256_v12 }
 0x19c   :  { %v4264_v39 = vpop.permute.xlu1 %4263  ;;  %v1114_v10 = vsel %vm1100_vm4, %v1097_v37, %v4251_v15  ;;  %v1113_v56 = vsel %vm1100_vm4, %v1096_v26, %v4250_v8 }
 0x19d   :  { %v4259_v21 = vpop.permute.xlu0 %4258  ;;  %v4266_v49 = vunpack.i.h.bf16 %v4264_v39  ;;  %v4265_v18 = vunpack.i.l.bf16 %v4264_v39 }
 0x19e   :  { %v4261_v54 = vunpack.i.h.bf16 %v4259_v21  ;;  %v4260_v3 = vunpack.i.l.bf16 %v4259_v21 }
 0x19f   :  { %v1132_v50 = vsel %vm1117_vm5, %v1115_v0, %v4265_v18  ;;  %v1133_v40 = vsel %vm1117_vm5, %v1116_v36, %v4266_v49 }
 0x1a0   :  { %v4274_v1 = vpop.permute.xlu1 %4273  ;;  %v1130_v35 = vsel %vm1117_vm5, %v1113_v56, %v4260_v3  ;;  %v1131_v41 = vsel %vm1117_vm5, %v1114_v10, %v4261_v54 }
 0x1a1   :  { %v4269_v27 = vpop.permute.xlu0 %4268  ;;  %v4276_v5 = vunpack.i.h.bf16 %v4274_v1  ;;  %v4275_v22 = vunpack.i.l.bf16 %v4274_v1 }
 0x1a2   :  { %v4271_v61 = vunpack.i.h.bf16 %v4269_v27  ;;  %v4270_v38 = vunpack.i.l.bf16 %v4269_v27 }
 0x1a3   :  { %v1149_v27 = vsel %vm1134_vm6, %v1132_v50, %v4275_v22  ;;  %v1150_v34 = vsel %vm1134_vm6, %v1133_v40, %v4276_v5  ;;  %v6272_v40 = vld [vmem:[%s8424_s1 + $0x200] ss:$0 sm:$0xff] }
 0x1a4   :  { %v4284_v62 = vpop.permute.xlu1 %4283  ;;  %v1147_v33 = vsel %vm1134_vm6, %v1130_v35, %v4270_v38  ;;  %v1148_v9 = vsel %vm1134_vm6, %v1131_v41, %v4271_v61 }
 0x1a5   :  { %v4279_v20 = vpop.permute.xlu0 %4278  ;;  %v4286_v46 = vunpack.i.h.bf16 %v4284_v62  ;;  %v4285_v39 = vunpack.i.l.bf16 %v4284_v62 }
 0x1a6   :  { %v4281_v21 = vunpack.i.h.bf16 %v4279_v20  ;;  %v4280_v19 = vunpack.i.l.bf16 %v4279_v20 }
 0x1a7   :  { %v1167_v31 = vsel %vm1151_vm7, %v1150_v34, %v4286_v46  ;;  %v1166_v15 = vsel %vm1151_vm7, %v1149_v27, %v4285_v39 }
 0x1a8   :  { %v4294_v43 = vpop.permute.xlu1 %4293  ;;  %v1164_v8 = vsel %vm1151_vm7, %v1147_v33, %v4280_v19  ;;  %v1165_v62 = vsel %vm1151_vm7, %v1148_v9, %v4281_v21 }
 0x1a9   :  { %v4289_v17 = vpop.permute.xlu0 %4288  ;;  %v4296_v58 = vunpack.i.h.bf16 %v4294_v43  ;;  %v4295_v32 = vunpack.i.l.bf16 %v4294_v43 }
 0x1aa   :  { %v4291_v24 = vunpack.i.h.bf16 %v4289_v17  ;;  %v4290_v2 = vunpack.i.l.bf16 %v4289_v17 }
 0x1ab   :  { %v1184_v20 = vsel %vm1168_vm8, %v1167_v31, %v4296_v58  ;;  %v1183_v49 = vsel %vm1168_vm8, %v1166_v15, %v4295_v32  ;;  %v8712_v31 = vld [vmem:[#allocation5_spill] sm:$0xff] }
 0x1ac   :  { %v4304_v55 = vpop.permute.xlu1 %4303  ;;  %v1181_v18 = vsel %vm1168_vm8, %v1164_v8, %v4290_v2  ;;  %v1182_v54 = vsel %vm1168_vm8, %v1165_v62, %v4291_v24 }
 0x1ad   :  { %v4299_v1 = vpop.permute.xlu0 %4298  ;;  %v4306_v53 = vunpack.i.h.bf16 %v4304_v55  ;;  %v4305_v42 = vunpack.i.l.bf16 %v4304_v55 }
 0x1ae   :  { %v4301_v52 = vunpack.i.h.bf16 %v4299_v1  ;;  %v4300_v12 = vunpack.i.l.bf16 %v4299_v1 }
 0x1af   :  { %v1200_v36 = vsel %vm1185_vm9, %v1183_v49, %v4305_v42  ;;  %v1201_v10 = vsel %vm1185_vm9, %v1184_v20, %v4306_v53  ;;  %v8713_v20 = vld [vmem:[#allocation25_spill] sm:$0xff] }
 0x1b0   :  { %v4314_v3 = vpop.permute.xlu1 %4313  ;;  %v1198_v56 = vsel %vm1185_vm9, %v1181_v18, %v4300_v12  ;;  %v1199_v43 = vsel %vm1185_vm9, %v1182_v54, %v4301_v52 }
 0x1b1   :  { %v4309_v37 = vpop.permute.xlu0 %4308  ;;  %v4316_v26 = vunpack.i.h.bf16 %v4314_v3  ;;  %v4315_v4 = vunpack.i.l.bf16 %v4314_v3  ;;  %v8714_v3 = vld [vmem:[#allocation24_spill] sm:$0xff] }
 0x1b2   :  { %v4311_v60 = vunpack.i.h.bf16 %v4309_v37  ;;  %v4310_v0 = vunpack.i.l.bf16 %v4309_v37 }
 0x1b3   :  { %v1217_v17 = vsel %vm1202_vm10, %v1200_v36, %v4315_v4  ;;  %v1218_v5 = vsel %vm1202_vm10, %v1201_v10, %v4316_v26  ;;  %v8716_v10 = vld [vmem:[#allocation10_spill] sm:$0xff] }
 0x1b4   :  { %v1215_v22 = vsel %vm1202_vm10, %v1198_v56, %v4310_v0  ;;  %v1216_v61 = vsel %vm1202_vm10, %v1199_v43, %v4311_v60  ;;  %v1226_v50 = vpack.c.bf16 %v1218_v5, %v1217_v17  ;;  %v8715_v0 = vld [vmem:[#allocation11_spill] sm:$0xff]  ;;  %v8717_v17 = vld [vmem:[#allocation17_spill] sm:$0xff] }
 0x1b5   :  { %v1225_v38 = vpack.c.bf16 %v1216_v61, %v1215_v22  ;;  %v8718_v22 = vld [vmem:[#allocation16_spill] sm:$0xff] }
 0x1b7   :  { %3951 = vmatprep.mubr.msk.bf16.mxu0 %vm1249_vm11, %v1225_v38 }
 0x1b8   :  { %3952 = vmatmul.mubr.msk.bf16.gmra.mxu0 %vm1249_vm11, %v1226_v50 }
 0x21b   :  { %v3941_v35 = vpop.f32.mrf.mxu0 }
 0x21c   :  { %v1321_v41 = vadd.f32 %v3941_v35, %v6272_v40 }
 0x21d   :  { %v1312_v46 = vpop.f32.mrf.mxu0 }
 0x21e   :  { %v1313_v39 = vadd.f32 %v1312_v46, %v6272_v40  ;;  %v1377_v58 = vmax.f32 %v1321_v41, 0.0  ;;  %v8719_v46 = vld [vmem:[#allocation15_spill] sm:$0xff] }
 0x21f   :  { %v3942_v21 = vpop.f32.mrf.mxu0 }
 0x220   :  { %v1324_v19 = vadd.f32 %v3942_v21, %v6272_v40  ;;  %v6277_v32 = vmax.f32 %v1313_v39, 0.0  ;;  %v1464_v33 = vrot.slane %v1377_v58, 1  ;;  %v1449_v53 = vmul.f32 %v1377_v58, %v5182_v14 }
 0x221   :  { %v1315_v24 = vpop.f32.mrf.mxu0  ;;  %v1400_v8 = vrot.slane %v1377_v58, 7  ;;  %v1559_v37 = vmul.f32 %v1377_v58, %v8714_v3 }
 0x222   :  { %v6279_v2 = vmax.f32 %v1324_v19, 0.0  ;;  %v1316_v55 = vadd.f32 %v1315_v24, %v6272_v40  ;;  %v8589_v9 = vrot.slane %v6277_v32, 1  ;;  %v8588_v60 = vrot.slane %v6277_v32, 7  ;;  %v8720_v19 = vld [vmem:[#allocation14_spill] sm:$0xff]  ;;  %v8721_v24 = vld [vmem:[#allocation21_spill] sm:$0xff] }
 0x224   :  { %v1465_v1 = vrot.slane %v6279_v2, 1  ;;  %v1376_v27 = vmax.f32 %v1316_v55, 0.0  ;;  %v4317_v34 = vpack.i.bf16 %v6279_v2, %v1377_v58  ;;  %v1401_v62 = vrot.slane %v6279_v2, 7 }
 0x226   :  { %v1399_v42 = vrot.slane %v1376_v27, 7  ;;  %v1463_v52 = vrot.slane %v1376_v27, 1  ;;  %4318 = vrot.lane.b32.xlu1 %v4317_v34, %s5055_s27  ;;  %v4322_v12 = vpack.i.bf16 %v1376_v27, %v6277_v32  ;;  %v1448_v15 = vmul.f32 %v1376_v27, %v8712_v31 }
 0x227   :  { %v1558_v49 = vmul.f32 %v1376_v27, %v8713_v20  ;;  %v6295_v18 = vsel %vm202_vm0, %v1464_v33, %v1465_v1  ;;  %v6323_v35 = vsel %vm57_vm1, %v1400_v8, %v1401_v62  ;;  %v8722_v27 = vld [vmem:[#allocation20_spill] sm:$0xff] }
 0x228   :  { %4323 = vrot.lane.b32.xlu0 %v4322_v12, %s5055_s27  ;;  %v4327_v54 = vpack.i.bf16 %v1449_v53, %v1448_v15  ;;  %v1491_v26 = vsel %vm202_vm0, %v1463_v52, %v1464_v33  ;;  %v6305_v4 = vsel %vm202_vm0, %v8589_v9, %v1463_v52  ;;  %v1497_v56 = vmul.f32 %v6295_v18, %v8716_v10  ;;  %v4961_v12 = vld [vmem:[%s8424_s1 + $0x18] sm:$0xff] }
 0x229   :  { %v1496_v36 = vmul.f32 %v1491_v26, %v8715_v0  ;;  %v4332_v43 = vpack.i.bf16 %v1559_v37, %v1558_v49  ;;  %v1526_v5 = vmul.f32 %v6305_v4, %v8717_v17  ;;  %v1527_v61 = vmul.f32 %v1491_v26, %v8718_v22 }
 0x22a   :  { %4328 = vrot.lane.b32.xlu1 %v4327_v54, %s5052_s14  ;;  %v6317_v38 = vsel %vm57_vm1, %v1399_v42, %v1400_v8  ;;  %v6329_v41 = vsel %vm57_vm1, %v8588_v60, %v1399_v42  ;;  %v1513_v58 = vmul.f32 %v6323_v35, %v8720_v19  ;;  %v4960_v42 = vld [vmem:[%s8424_s1 + $0x8] sm:$0xff]  ;;  %v1575_v15 = vmul.f32 %v4961_v12, %v6295_v18 }
 0x22b   :  { %v4337_v50 = vpack.i.bf16 %v1497_v56, %v1496_v36  ;;  %v1512_v39 = vmul.f32 %v6317_v38, %v8719_v46  ;;  %v4347_v21 = vpack.i.bf16 %v1527_v61, %v1526_v5  ;;  %v1542_v55 = vmul.f32 %v6329_v41, %v8721_v24  ;;  %v8723_v61 = vld [vmem:[#allocation27_spill] sm:$0xff] }
 0x22c   :  { %4333 = vrot.lane.b32.xlu0 %v4332_v43, %s5058_s4  ;;  %v1543_v34 = vmul.f32 %v6317_v38, %v8722_v27  ;;  %v1574_v52 = vmul.f32 %v4960_v42, %v1491_v26  ;;  %v8725_v42 = vld [vmem:[#allocation28_spill] sm:$0xff] }
 0x22d   :  { %v4342_v33 = vpack.i.bf16 %v1513_v58, %v1512_v39  ;;  %v8724_v39 = vld [vmem:[#allocation26_spill] sm:$0xff] }
 0x22e   :  { %4338 = vrot.lane.b32.xlu1 %v4337_v50, %s5053_s15  ;;  %v4352_v53 = vpack.i.bf16 %v1543_v34, %v1542_v55  ;;  %v4357_v8 = vpack.i.bf16 %v1575_v15, %v1574_v52  ;;  %v1560_v50 = vmul.f32 %v6279_v2, %v8723_v61 }
 0x230   :  { %4348 = vrot.lane.b32.xlu0 %v4347_v21, %s5056_s5 }
 0x232   :  { %4343 = vrot.lane.b32.xlu1 %v4342_v33, %s5054_s19 }
 0x234   :  { %4353 = vrot.lane.b32.xlu0 %v4352_v53, %s5057_s20 }
 0x238   :  { %4358 = vrot.lane.b32.xlu0 %v4357_v8, %s5049_s23 }
 0x23b   :  { %v3945_v49 = vpop.f32.mrf.mxu0 }
 0x23c   :  { %v1337_v56 = vadd.f32 %v3945_v49, %v6272_v40  ;;  %v8726_v49 = vld [vmem:[#allocation29_spill] sm:$0xff] }
 0x23d   :  { %v1328_v54 = vpop.f32.mrf.mxu0 }
 0x23e   :  { %v1329_v37 = vadd.f32 %v1328_v54, %v6272_v40  ;;  %v6358_v58 = vmax.f32 %v1337_v56, 0.0  ;;  %v1450_v54 = vmul.f32 %v6279_v2, %v8726_v49 }
 0x23f   :  { %v3946_v36 = vpop.f32.mrf.mxu0 }
 0x240   :  { %v1379_v43 = vmax.f32 %v1329_v37, 0.0  ;;  %v1340_v33 = vadd.f32 %v3946_v36, %v6272_v40  ;;  %v1563_v37 = vmul.f32 %v6358_v58, %v5471_v30 }
 0x241   :  { %v1331_v26 = vpop.f32.mrf.mxu0 }
 0x242   :  { %v1332_v5 = vadd.f32 %v1331_v26, %v6272_v40  ;;  %v1561_v21 = vmul.f32 %v1379_v43, %v8724_v39  ;;  %v1466_v34 = vrot.slane %v1379_v43, 1  ;;  %v1451_v52 = vmul.f32 %v1379_v43, %v8725_v42 }
 0x243   :  { %v6371_v56 = vmax.f32 %v1340_v33, 0.0  ;;  %v4963_v33 = vld [vmem:[%s8424_s1 + $0x28] sm:$0xff] }
 0x244   :  { %v1380_v55 = vmax.f32 %v1332_v5, 0.0  ;;  %v4362_v53 = vpack.i.bf16 %v1561_v21, %v1560_v50  ;;  %v4367_v26 = vpack.i.bf16 %v1451_v52, %v1450_v54  ;;  %v1489_v5 = vsel %vm202_vm0, %v1465_v1, %v1466_v34 }
 0x245   :  { %v1402_v50 = vrot.slane %v1379_v43, 7  ;;  %v1576_v52 = vmul.f32 %v4963_v33, %v1489_v5  ;;  %v4372_v1 = vpack.i.bf16 %v6371_v56, %v6358_v58  ;;  %v1468_v33 = vrot.slane %v6358_v58, 1 }
 0x246   :  { %v1467_v12 = vrot.slane %v1380_v55, 1  ;;  %v4377_v15 = vpack.i.bf16 %v1380_v55, %v1379_v43  ;;  %v1562_v8 = vmul.f32 %v1380_v55, %v5473_v13  ;;  %4363 = vrot.lane.b32.xlu1 %v4362_v53, %s5058_s4  ;;  %v4962_v53 = vld [vmem:[%s8424_s1 + $0x38] sm:$0xff]  ;;  %v1403_v60 = vrot.slane %v1380_v55, 7  ;;  %v8727_v43 = vld [vmem:[#allocation18_spill] sm:$0xff] }
 0x248   :  { %4378 = vrot.lane.b32.xlu0 %v4377_v15, %s5055_s27  ;;  %v1488_v36 = vsel %vm202_vm0, %v1466_v34, %v1467_v12  ;;  %v4397_v21 = vpack.i.bf16 %v1563_v37, %v1562_v8  ;;  %v1529_v34 = vmul.f32 %v1489_v5, %v8727_v43  ;;  %v6393_v37 = vsel %vm57_vm1, %v1401_v62, %v1402_v50 }
 0x249   :  { %v1577_v15 = vmul.f32 %v4962_v53, %v1488_v36  ;;  %v1499_v54 = vmul.f32 %v1488_v36, %v5282_v44  ;;  %v6400_v53 = vsel %vm57_vm1, %v1402_v50, %v1403_v60  ;;  %v8730_v44 = vld [vmem:[#allocation36_spill] sm:$0xff] }
 0x24a   :  { %4368 = vrot.lane.b32.xlu1 %v4367_v26, %s5052_s14  ;;  %v8728_v26 = vld [vmem:[#allocation19_spill] sm:$0xff] }
 0x24b   :  { %v4402_v8 = vpack.i.bf16 %v1577_v15, %v1576_v52  ;;  %v1498_v15 = vmul.f32 %v1489_v5, %v5284_v45  ;;  %v8729_v52 = vld [vmem:[#allocation22_spill] sm:$0xff]  ;;  %v8733_v45 = vld [vmem:[#allocation31_spill] sm:$0xff] }
 0x24c   :  { %4398 = vrot.lane.b32.xlu0 %v4397_v21, %s5058_s4  ;;  %v1528_v21 = vmul.f32 %v6295_v18, %v8728_v26  ;;  %v1545_v62 = vmul.f32 %v6393_v37, %v8729_v52  ;;  %v8731_v18 = vld [vmem:[#allocation23_spill] sm:$0xff]  ;;  %v8735_v26 = vld [vmem:[#allocation40_spill] sm:$0xff]  ;;  %v8772_v52 = vld [vmem:[#allocation9_spill] sm:$0xff] }
 0x24d   :  { %v4407_v9 = vpack.i.bf16 %v1499_v54, %v1498_v15  ;;  %v1544_v50 = vmul.f32 %v6323_v35, %v8731_v18  ;;  %v1404_v54 = vrot.slane %v6358_v58, 7 }
 0x24e   :  { %4373 = vrot.lane.b32.xlu1 %v4372_v1, %s5055_s27  ;;  %v4382_v2 = vpack.i.bf16 %v1529_v34, %v1528_v21  ;;  %v1515_v1 = vmul.f32 %v6400_v53, %v8730_v44  ;;  %v8732_v34 = vld [vmem:[#allocation37_spill] sm:$0xff]  ;;  %v1452_v44 = vmul.f32 %v1380_v55, %v8733_v45  ;;  %v8737_v55 = vrot.slane %v6371_v56, 1 }
 0x24f   :  { %v1514_v21 = vmul.f32 %v6393_v37, %v8732_v34  ;;  %v4387_v15 = vpack.i.bf16 %v1545_v62, %v1544_v50 }
 0x250   :  { %4403 = vrot.lane.b32.xlu0 %v4402_v8, %s5049_s23  ;;  %v1487_v8 = vsel %vm202_vm0, %v1467_v12, %v1468_v33  ;;  %v8736_v12 = vld [vmem:[#allocation30_spill] sm:$0xff] }
 0x251   :  { %v4417_v30 = vpack.i.bf16 %v1515_v1, %v1514_v21  ;;  %v1531_v43 = vmul.f32 %v1487_v8, %v8735_v26  ;;  %v1453_v5 = vmul.f32 %v6358_v58, %v8736_v12  ;;  %v8738_v1 = vld [vmem:[#allocation35_spill] sm:$0xff]  ;;  %v8740_v26 = vld [vmem:[#allocation44_spill] sm:$0xff] }
 0x252   :  { %4383 = vrot.lane.b32.xlu1 %v4382_v2, %s5056_s5  ;;  %v8734_v2 = vld [vmem:[#allocation41_spill] sm:$0xff]  ;;  %v1500_v50 = vmul.f32 %v1487_v8, %v8738_v1 }
 0x253   :  { %v1530_v13 = vmul.f32 %v1488_v36, %v8734_v2  ;;  %v6435_v36 = vsel %vm202_vm0, %v1468_v33, %v8737_v55  ;;  %v4392_v62 = vpack.i.bf16 %v1453_v5, %v1452_v44  ;;  %v8742_v33 = vrot.slane %v6371_v56, 7  ;;  %v8743_v5 = vld [vmem:[#allocation39_spill] sm:$0xff] }
 0x254   :  { %4408 = vrot.lane.b32.xlu0 %v4407_v9, %s5053_s15  ;;  %v6427_v9 = vsel %vm57_vm1, %v1403_v60, %v1404_v54 }
 0x255   :  { %v4427_v21 = vpack.i.bf16 %v1531_v43, %v1530_v13  ;;  %v1547_v60 = vmul.f32 %v6427_v9, %v8740_v26  ;;  %v6450_v44 = vsel %vm57_vm1, %v1404_v54, %v8742_v33  ;;  %v1516_v55 = vmul.f32 %v6427_v9, %v8743_v5 }
 0x256   :  { %4388 = vrot.lane.b32.xlu1 %v4387_v15, %s5057_s20  ;;  %v8739_v15 = vld [vmem:[#allocation45_spill] sm:$0xff] }
 0x257   :  { %v1546_v58 = vmul.f32 %v6400_v53, %v8739_v15  ;;  %v8744_v15 = vld [vmem:[#allocation38_spill] sm:$0xff] }
 0x258   :  { %4418 = vrot.lane.b32.xlu0 %v4417_v30, %s5054_s19  ;;  %v8741_v30 = vld [vmem:[#allocation34_spill] sm:$0xff]  ;;  %v1517_v54 = vmul.f32 %v6450_v44, %v8744_v15 }
 0x259   :  { %v1501_v2 = vmul.f32 %v6435_v36, %v8741_v30  ;;  %v4964_v30 = vld [vmem:[%s8424_s1 + $0x48] sm:$0xff] }
 0x25a   :  { %4393 = vrot.lane.b32.xlu1 %v4392_v62, %s5052_s14  ;;  %v4432_v62 = vpack.i.bf16 %v1547_v60, %v1546_v58  ;;  %v1578_v26 = vmul.f32 %v4964_v30, %v1487_v8 }
 0x25b   :  { %v3949_v34 = vpop.f32.mrf.mxu0  ;;  %v4412_v43 = vpack.i.bf16 %v1501_v2, %v1500_v50  ;;  %v4965_v50 = vld [vmem:[%s8424_s1 + $0x58] sm:$0xff] }
 0x25c   :  { %4428 = vrot.lane.b32.xlu0 %v4427_v21, %s5056_s5  ;;  %v1353_v33 = vadd.f32 %v3949_v34, %v6272_v40  ;;  %v1579_v58 = vmul.f32 %v4965_v50, %v6435_v36  ;;  %v8746_v34 = vld [vmem:[#allocation50_spill] sm:$0xff] }
 0x25d   :  { %v1344_v13 = vpop.f32.mrf.mxu0 }
 0x25e   :  { %v1345_v1 = vadd.f32 %v1344_v13, %v6272_v40  ;;  %4413 = vrot.lane.b32.xlu1 %v4412_v43, %s5053_s15  ;;  %v4422_v13 = vpack.i.bf16 %v1517_v54, %v1516_v55  ;;  %v4437_v30 = vpack.i.bf16 %v1579_v58, %v1578_v26  ;;  %v8745_v43 = vld [vmem:[#allocation51_spill] sm:$0xff]  ;;  %v6472_v5 = vmax.f32 %v1353_v33, 0.0  ;;  %v8747_v55 = vld [vmem:[#allocation52_spill] sm:$0xff] }
 0x25f   :  { %v3950_v21 = vpop.f32.mrf.mxu0  ;;  %v1564_v15 = vmul.f32 %v6371_v56, %v8745_v43 }
 0x260   :  { %v1383_v2 = vmax.f32 %v1345_v1, 0.0  ;;  %4433 = vrot.lane.b32.xlu0 %v4432_v62, %s5057_s20  ;;  %v1356_v50 = vadd.f32 %v3950_v21, %v6272_v40  ;;  %v1567_v33 = vmul.f32 %v6472_v5, %v5748_v47  ;;  %v8753_v47 = vld [vmem:[#allocation46_spill] sm:$0xff] }
 0x261   :  { %v1347_v60 = vpop.f32.mrf.mxu0 }
 0x262   :  { %v1348_v8 = vadd.f32 %v1347_v60, %v6272_v40  ;;  %4423 = vrot.lane.b32.xlu1 %v4422_v13, %s5054_s19  ;;  %v1565_v1 = vmul.f32 %v1383_v2, %v8746_v34  ;;  %v1470_v12 = vrot.slane %v1383_v2, 1  ;;  %v1455_v54 = vmul.f32 %v1383_v2, %v8747_v55  ;;  %v8748_v13 = vld [vmem:[#allocation53_spill] sm:$0xff] }
 0x263   :  { %v1454_v43 = vmul.f32 %v6371_v56, %v8748_v13 }
 0x264   :  { %v1384_v62 = vmax.f32 %v1348_v8, 0.0  ;;  %4438 = vrot.lane.b32.xlu0 %v4437_v30, %s5049_s23  ;;  %v4442_v45 = vpack.i.bf16 %v1565_v1, %v1564_v15  ;;  %v6486_v15 = vmax.f32 %v1356_v50, 0.0  ;;  %v8749_v30 = vrot.slane %v6371_v56, 1 }
 0x265   :  { %v4447_v8 = vpack.i.bf16 %v1455_v54, %v1454_v43  ;;  %v4967_v43 = vld [vmem:[%s8424_s1 + $0x68] sm:$0xff] }
 0x266   :  { %v1471_v60 = vrot.slane %v1384_v62, 1  ;;  %v4457_v26 = vpack.i.bf16 %v1384_v62, %v1383_v2  ;;  %v1566_v58 = vmul.f32 %v1384_v62, %v5750_v63  ;;  %4443 = vrot.lane.b32.xlu1 %v4442_v45, %s5058_s4  ;;  %v1485_v1 = vsel %vm202_vm0, %v8749_v30, %v1470_v12 }
 0x267   :  { %v1406_v45 = vrot.slane %v1383_v2, 7  ;;  %v1407_v55 = vrot.slane %v1384_v62, 7  ;;  %v1580_v50 = vmul.f32 %v4967_v43, %v1485_v1  ;;  %v8750_v2 = vld [vmem:[#allocation42_spill] sm:$0xff]  ;;  %v8751_v30 = vrot.slane %v6371_v56, 7 }
 0x268   :  { %4458 = vrot.lane.b32.xlu0 %v4457_v26, %s5055_s27  ;;  %v1484_v21 = vsel %vm202_vm0, %v1470_v12, %v1471_v60  ;;  %v4477_v63 = vpack.i.bf16 %v1567_v33, %v1566_v58  ;;  %v4966_v26 = vld [vmem:[%s8424_s1 + $0x78] sm:$0xff]  ;;  %v4452_v12 = vpack.i.bf16 %v6486_v15, %v6472_v5  ;;  %v1533_v54 = vmul.f32 %v1485_v1, %v8750_v2 }
 0x269   :  { %v1581_v13 = vmul.f32 %v4966_v26, %v1484_v21  ;;  %v1503_v33 = vmul.f32 %v1484_v21, %v5573_v23  ;;  %v6515_v43 = vsel %vm57_vm1, %v1406_v45, %v1407_v55 }
 0x26a   :  { %4448 = vrot.lane.b32.xlu1 %v4447_v8, %s5052_s14  ;;  %v6508_v8 = vsel %vm57_vm1, %v8751_v30, %v1406_v45 }
 0x26b   :  { %v4482_v58 = vpack.i.bf16 %v1581_v13, %v1580_v50  ;;  %v1502_v13 = vmul.f32 %v1485_v1, %v5575_v29  ;;  %v1472_v50 = vrot.slane %v6472_v5, 1  ;;  %v1549_v30 = vmul.f32 %v6508_v8, %v8753_v47  ;;  %v8756_v29 = vld [vmem:[#allocation55_spill] sm:$0xff] }
 0x26c   :  { %4478 = vrot.lane.b32.xlu0 %v4477_v63, %s5058_s4  ;;  %v8752_v63 = vld [vmem:[#allocation43_spill] sm:$0xff]  ;;  %v1473_v1 = vrot.slane %v6486_v15, 1 }
 0x26d   :  { %v1532_v26 = vmul.f32 %v6435_v36, %v8752_v63  ;;  %v4487_v23 = vpack.i.bf16 %v1503_v33, %v1502_v13  ;;  %v8754_v36 = vld [vmem:[#allocation47_spill] sm:$0xff]  ;;  %v1408_v33 = vrot.slane %v6472_v5, 7  ;;  %v8758_v63 = vld [vmem:[#allocation64_spill] sm:$0xff] }
 0x26e   :  { %4453 = vrot.lane.b32.xlu1 %v4452_v12, %s5055_s27  ;;  %v1519_v12 = vmul.f32 %v6515_v43, %v5622_v48  ;;  %v1548_v45 = vmul.f32 %v6450_v44, %v8754_v36  ;;  %v1456_v48 = vmul.f32 %v1384_v62, %v8756_v29  ;;  %v1482_v62 = vsel %vm202_vm0, %v1472_v50, %v1473_v1 }
 0x26f   :  { %v4462_v56 = vpack.i.bf16 %v1533_v54, %v1532_v26  ;;  %v8755_v54 = vld [vmem:[#allocation61_spill] sm:$0xff] }
 0x270   :  { %4483 = vrot.lane.b32.xlu0 %v4482_v58, %s5049_s23  ;;  %v1483_v58 = vsel %vm202_vm0, %v1471_v60, %v1472_v50  ;;  %v1518_v26 = vmul.f32 %v6508_v8, %v8755_v54  ;;  %v4467_v13 = vpack.i.bf16 %v1549_v30, %v1548_v45  ;;  %v8759_v60 = vld [vmem:[#allocation54_spill] sm:$0xff]  ;;  %v1409_v54 = vrot.slane %v6486_v15, 7  ;;  %v8760_v30 = vld [vmem:[#allocation59_spill] sm:$0xff] }
 0x271   :  { %v1535_v36 = vmul.f32 %v1483_v58, %v8758_v63  ;;  %v1457_v2 = vmul.f32 %v6472_v5, %v8759_v60  ;;  %v8762_v60 = vld [vmem:[#allocation68_spill] sm:$0xff]  ;;  %v8763_v63 = vld [vmem:[#allocation58_spill] sm:$0xff] }
 0x272   :  { %4463 = vrot.lane.b32.xlu1 %v4462_v56, %s5056_s5  ;;  %v4497_v34 = vpack.i.bf16 %v1519_v12, %v1518_v26  ;;  %v8757_v56 = vld [vmem:[#allocation65_spill] sm:$0xff]  ;;  %v1504_v12 = vmul.f32 %v1483_v58, %v8760_v30 }
 0x273   :  { %v1534_v47 = vmul.f32 %v1484_v21, %v8757_v56  ;;  %v4472_v21 = vpack.i.bf16 %v1457_v2, %v1456_v48  ;;  %v6559_v48 = vsel %vm57_vm1, %v1408_v33, %v1409_v54 }
 0x274   :  { %4488 = vrot.lane.b32.xlu0 %v4487_v23, %s5053_s15  ;;  %v6542_v23 = vsel %vm57_vm1, %v1407_v55, %v1408_v33  ;;  %v8765_v33 = vld [vmem:[#allocation62_spill] sm:$0xff] }
 0x275   :  { %v4507_v26 = vpack.i.bf16 %v1535_v36, %v1534_v47  ;;  %v1551_v55 = vmul.f32 %v6542_v23, %v8762_v60  ;;  %v8764_v36 = vld [vmem:[#allocation63_spill] sm:$0xff] }
 0x276   :  { %4468 = vrot.lane.b32.xlu1 %v4467_v13, %s5057_s20  ;;  %v8761_v13 = vld [vmem:[#allocation69_spill] sm:$0xff]  ;;  %v1520_v30 = vmul.f32 %v6542_v23, %v8764_v36 }
 0x277   :  { %v1550_v5 = vmul.f32 %v6515_v43, %v8761_v13  ;;  %v8771_v13 = vld [vmem:[#allocation76_spill] sm:$0xff] }
 0x278   :  { %v3953_v18 = vpop.f32.mrf.mxu0  ;;  %4498 = vrot.lane.b32.xlu0 %v4497_v34, %s5054_s19  ;;  %v1505_v34 = vmul.f32 %v1482_v62, %v8763_v63 }
 0x27a   :  { %v1360_v45 = vpop.f32.mrf.mxu0  ;;  %4473 = vrot.lane.b32.xlu1 %v4472_v21, %s5052_s14  ;;  %v4492_v50 = vpack.i.bf16 %v1505_v34, %v1504_v12  ;;  %v4968_v21 = vld [vmem:[%s8424_s1 + $0x88] sm:$0xff] }
 0x27b   :  { %v1361_v29 = vadd.f32 %v1360_v45, %v6272_v40  ;;  %v4512_v45 = vpack.i.bf16 %v1551_v55, %v1550_v5  ;;  %v1582_v63 = vmul.f32 %v4968_v21, %v1483_v58  ;;  %v8766_v55 = vld [vmem:[#allocation74_spill] sm:$0xff] }
 0x27c   :  { %v3954_v56 = vpop.f32.mrf.mxu0  ;;  %4508 = vrot.lane.b32.xlu0 %v4507_v26, %s5056_s5  ;;  %v4921_v26 = vld [vmem:[%s8425_s2 + $0x38] ss:$0 sps:$4 sm:$0x77]   ;;  %v8767_v21 = vld [vmem:[#allocation6_spill] sm:$0xff] }
 0x27d   :  { %v6561_v47 = vmax.f32 %v1361_v29, 0.0  ;;  %v1372_v2 = vadd.f32 %v3954_v56, %v6272_v40  ;;  %v1521_v29 = vmul.f32 %v6559_v48, %v8765_v33  ;;  %v4969_v56 = vld [vmem:[%s8424_s1 + $0x98] sm:$0xff]  ;;  %3980 = vmatprep.subr.msk.bf16.mxu1 %vm1274_vm2, %v4921_v26 }
 0x27e   :  { %4493 = vrot.lane.b32.xlu1 %v4492_v50, %s5053_s15  ;;  %v1583_v12 = vmul.f32 %v4969_v56, %v1482_v62  ;;  %v8768_v33 = vld [vmem:[#allocation75_spill] sm:$0xff] }
 0x27f   :  { %v6569_v60 = vmax.f32 %v1372_v2, 0.0  ;;  %v4502_v5 = vpack.i.bf16 %v1521_v29, %v1520_v30  ;;  %v1569_v34 = vmul.f32 %v6561_v47, %v8766_v55  ;;  %v1474_v2 = vrot.slane %v6561_v47, 1 }
 0x280   :  { %4513 = vrot.lane.b32.xlu0 %v4512_v45, %s5057_s20  ;;  %v4517_v50 = vpack.i.bf16 %v1583_v12, %v1582_v63  ;;  %v1568_v36 = vmul.f32 %v6486_v15, %v8768_v33  ;;  %v8769_v30 = vrot.slane %v6277_v32, 1  ;;  %v1363_v63 = vpop.f32.mrf.mxu0  ;;  %v8770_v12 = vld [vmem:[#allocation7_spill] sm:$0xff] }
 0x281   :  { %v8599_v58 = vrot.slane %v6569_v60, 1  ;;  %v1446_v45 = vmul.f32 %v6569_v60, %v8767_v21  ;;  %v1447_v55 = vmul.f32 %v6277_v32, %v8770_v12 }
 0x282   :  { %4503 = vrot.lane.b32.xlu1 %v4502_v5, %s5054_s19  ;;  %v4522_v56 = vpack.i.bf16 %v1569_v34, %v1568_v36  ;;  %v1459_v5 = vmul.f32 %v6561_v47, %v8771_v13  ;;  %v1458_v36 = vmul.f32 %v6486_v15, %v5799_v7  ;;  %v8773_v34 = vrot.slane %v6277_v32, 7 }
 0x283   :  { %v6598_v29 = vsel %vm202_vm0, %v8599_v58, %v8769_v30  ;;  %v4532_v21 = vpack.i.bf16 %v1447_v55, %v1446_v45  ;;  %v6610_v30 = vsel %vm202_vm0, %v1473_v1, %v1474_v2  ;;  %v1364_v58 = vadd.f32 %v1363_v63, %v6272_v40  ;;  %v8775_v45 = vld [vmem:[#allocation8_spill] sm:$0xff]  ;;  %v8776_v63 = vld [vmem:[#allocation66_spill] sm:$0xff] }
 0x284   :  { %4518 = vrot.lane.b32.xlu0 %v4517_v50, %s5049_s23  ;;  %v1494_v61 = vmul.f32 %v6598_v29, %v8772_v52  ;;  %v8774_v50 = vrot.slane %v6569_v60, 7  ;;  %v1495_v1 = vmul.f32 %v6305_v4, %v8775_v45  ;;  %v4527_v33 = vpack.i.bf16 %v1459_v5, %v1458_v36  ;;  %v8777_v52 = vld [vmem:[#allocation13_spill] sm:$0xff]  ;;  %v8779_v5 = vld [vmem:[#allocation67_spill] sm:$0xff] }
 0x285   :  { %v8778_v7 = vrot.slane %v6561_v47, 7  ;;  %v1536_v36 = vmul.f32 %v1482_v62, %v8779_v5  ;;  %v4922_v62 = vld [vmem:[%s8425_s2 + $0x30] sm:$0xff]  }
 0x286   :  { %4523 = vrot.lane.b32.xlu1 %v4522_v56, %s5058_s4  ;;  %v6622_v55 = vsel %vm57_vm1, %v8774_v50, %v8773_v34  ;;  %v1537_v56 = vmul.f32 %v6610_v30, %v8776_v63  ;;  %v4552_v13 = vpack.i.bf16 %v1495_v1, %v1494_v61  ;;  %v1369_v34 = vadd.f32 %v3953_v18, %v6272_v40  ;;  %v8780_v61 = vld [vmem:[#allocation12_spill] sm:$0xff]  ;;  %v8781_v63 = vld [vmem:[#allocation70_spill] sm:$0xff]  ;;  %v8782_v18 = vld [vmem:[#allocation71_spill] sm:$0xff] }
 0x287   :  { %v1510_v15 = vmul.f32 %v6622_v55, %v8777_v52  ;;  %v6635_v12 = vsel %vm57_vm1, %v1409_v54, %v8778_v7  ;;  %v1511_v50 = vmul.f32 %v6329_v41, %v8780_v61  ;;  %v1552_v54 = vmul.f32 %v6559_v48, %v8782_v18 }
 0x288   :  { %4533 = vrot.lane.b32.xlu0 %v4532_v21, %s5052_s14  ;;  %v6638_v21 = vmax.f32 %v1364_v58, 0.0  ;;  %v4537_v1 = vpack.i.bf16 %v1537_v56, %v1536_v36  ;;  %v1553_v52 = vmul.f32 %v6635_v12, %v8781_v63  ;;  %v6647_v7 = vmax.f32 %v1369_v34, 0.0 }
 0x289   :  { %v4557_v45 = vpack.i.bf16 %v1511_v50, %v1510_v15  ;;  %v2285_v15 = vsel %vm1274_vm2, %v4921_v26, 0  ;;  %v4923_v26 = vld [vmem:[%s8425_s2 + $0x28] sm:$0xff]  }
 0x28a   :  { %4528 = vrot.lane.b32.xlu1 %v4527_v33, %s5052_s14  ;;  %v1475_v40 = vrot.slane %v6638_v21, 1  ;;  %v1460_v33 = vmul.f32 %v6638_v21, %v5807_v28  ;;  %v4562_v58 = vpack.i.bf16 %v6638_v21, %v6561_v47  ;;  %v1570_v56 = vmul.f32 %v6638_v21, %v5989_v57  ;;  %3956 = vmatpush3.bf16.msra.mxu1 %v2285_v15 }
 0x28b   :  { %v1571_v36 = vmul.f32 %v6647_v7, %v5987_v11  ;;  %3957 = vmatprep.subr.bf16.mxu1 %v4922_v62  ;;  %v1411_v15 = vrot.slane %v6638_v21, 7  ;;  %v4567_v21 = vpack.i.bf16 %v6569_v60, %v6647_v7  ;;  %v8789_v11 = vld [vmem:[#allocation84_spill] sm:$0xff] }
 0x28c   :  { %4553 = vrot.lane.b32.xlu0 %v4552_v13, %s5053_s15  ;;  %v4542_v13 = vpack.i.bf16 %v1553_v52, %v1552_v54  ;;  %v1480_v34 = vsel %vm202_vm0, %v1474_v2, %v1475_v40  ;;  %v1476_v52 = vrot.slane %v6647_v7, 1  ;;  %v4970_v54 = vld [vmem:[%s8424_s1 + $0xb8] sm:$0xff] }
 0x28d   :  { %v1585_v2 = vmul.f32 %v4970_v54, %v1480_v34  ;;  %v8784_v54 = vrot.slane %v6569_v60, 7 }
 0x28e   :  { %4538 = vrot.lane.b32.xlu1 %v4537_v1, %s5056_s5  ;;  %v4572_v1 = vpack.i.bf16 %v1571_v36, %v1570_v56  ;;  %3958 = vmatpush3.bf16.msra.mxu1 %v4922_v62  ;;  %v1541_v36 = vmul.f32 %v6598_v29, %v5934_v16 }
 0x28f   :  { %3959 = vmatprep.subr.bf16.mxu1 %v4923_v26 }
 0x290   :  { %4558 = vrot.lane.b32.xlu0 %v4557_v45, %s5054_s19  ;;  %v1461_v45 = vmul.f32 %v6647_v7, %v5805_v25  ;;  %v1412_v25 = vrot.slane %v6647_v7, 7 }
 0x292   :  { %4543 = vrot.lane.b32.xlu1 %v4542_v13, %s5057_s20  ;;  %v4547_v50 = vpack.i.bf16 %v1461_v45, %v1460_v33  ;;  %v8783_v13 = vrot.slane %v6569_v60, 1  ;;  %v4971_v33 = vld [vmem:[%s8424_s1 + $0xa8] sm:$0xff]  ;;  %v4924_v45 = vld [vmem:[%s8425_s2 + $0x20] sm:$0xff]   ;;  %3960 = vmatpush3.bf16.msra.mxu1 %v4923_v26  ;;  %v1479_v26 = vsel %vm202_vm0, %v1475_v40, %v1476_v52 }
 0x293   :  { %v1584_v56 = vmul.f32 %v4971_v33, %v6610_v30  ;;  %v8785_v33 = vrot.slane %v6561_v47, 7  ;;  %3961 = vmatprep.subr.bf16.mxu1 %v4924_v45 }
 0x294   :  { %4563 = vrot.lane.b32.xlu0 %v4562_v58, %s5055_s27  ;;  %v6683_v58 = vsel %vm202_vm0, %v1476_v52, %v8783_v13  ;;  %v6707_v13 = vsel %vm57_vm1, %v1412_v25, %v8784_v54 }
 0x295   :  { %v1540_v62 = vmul.f32 %v6683_v58, %v5936_v59  ;;  %v6714_v7 = vsel %vm57_vm1, %v8785_v33, %v1411_v15  ;;  %v8787_v59 = vld [vmem:[#allocation95_spill] sm:$0xff] }
 0x296   :  { %4548 = vrot.lane.b32.xlu1 %v4547_v50, %s5052_s14  ;;  %v4587_v50 = vpack.i.bf16 %v1585_v2, %v1584_v56  ;;  %v8786_v2 = vld [vmem:[#allocation81_spill] sm:$0xff]  ;;  %v1556_v54 = vmul.f32 %v6707_v13, %v8787_v59  ;;  %v1523_v33 = vmul.f32 %v6714_v7, %v8789_v11  ;;  %3962 = vmatpush3.bf16.msra.mxu1 %v4924_v45 }
 0x297   :  { %v1506_v56 = vmul.f32 %v6610_v30, %v8786_v2  ;;  %v4577_v16 = vpack.i.bf16 %v1541_v36, %v1540_v62  ;;  %v8790_v30 = vld [vmem:[#allocation85_spill] sm:$0xff]  ;;  %v6738_v11 = vsel %vm57_vm1, %v1411_v15, %v1412_v25  ;;  %v8797_v15 = vld [vmem:[#allocation92_spill] sm:$0xff] }
 0x298   :  { %4573 = vrot.lane.b32.xlu0 %v4572_v1, %s5058_s4  ;;  %v1507_v1 = vmul.f32 %v1480_v34, %v5832_v6  ;;  %v8788_v6 = vld [vmem:[#allocation94_spill] sm:$0xff]  ;;  %v1522_v62 = vmul.f32 %v6635_v12, %v8790_v30  ;;  %v8792_v2 = vld [vmem:[#allocation89_spill] sm:$0xff]  ;;  %v6740_v40 = vpop.permute.xlu1 %4318 }
 0x29a   :  { %4568 = vrot.lane.b32.xlu1 %v4567_v21, %s5055_s27  ;;  %v1557_v21 = vmul.f32 %v6622_v55, %v8788_v6  ;;  %v6723_v28 = vpop.permute.xlu0 %4323  ;;  %v4592_v47 = vpack.i.bf16 %v1507_v1, %v1506_v56  ;;  %v4602_v59 = vpack.i.bf16 %v1523_v33, %v1522_v62  ;;  %v1538_v1 = vmul.f32 %v1480_v34, %v8792_v2  ;;  %v8793_v56 = vld [vmem:[#allocation88_spill] sm:$0xff]  ;;  %v8796_v33 = vld [vmem:[#allocation93_spill] sm:$0xff] }
 0x29b   :  { %v1539_v57 = vmul.f32 %v1479_v26, %v8793_v56  ;;  %v1554_v25 = vmul.f32 %v6714_v7, %v8796_v33  ;;  %v1555_v62 = vmul.f32 %v6738_v11, %v8797_v15 }
 0x29c   :  { %4588 = vrot.lane.b32.xlu0 %v4587_v50, %s5049_s23  ;;  %v4582_v36 = vpack.i.bf16 %v1557_v21, %v1556_v54  ;;  %v8791_v50 = vld [vmem:[#allocation83_spill] sm:$0xff] }
 0x29d   :  { %v1508_v6 = vmul.f32 %v1479_v26, %v8791_v50  ;;  %v8795_v21 = vld [vmem:[#allocation87_spill] sm:$0xff]  ;;  %v4329_v50 = vpop.permute.xlu1 %4328 }
 0x29e   :  { %4578 = vrot.lane.b32.xlu1 %v4577_v16, %s5056_s5  ;;  %v8794_v16 = vld [vmem:[#allocation82_spill] sm:$0xff]  ;;  %v6745_v45 = vpop.permute.xlu0 %4333  ;;  %v1524_v34 = vmul.f32 %v6738_v11, %v8795_v21 }
 0x29f   :  { %v1509_v52 = vmul.f32 %v6683_v58, %v8794_v16 }
 0x2a0   :  { %4593 = vrot.lane.b32.xlu0 %v4592_v47, %s5053_s15  ;;  %v4617_v47 = vpack.i.bf16 %v1539_v57, %v1538_v1  ;;  %v4622_v57 = vpack.i.bf16 %v1555_v62, %v1554_v25  ;;  %v4972_v1 = vld [vmem:[%s8424_s1 + $0xc8] sm:$0xff] }
 0x2a1   :  { %v4597_v54 = vpack.i.bf16 %v1509_v52, %v1508_v6  ;;  %v8799_v6 = vld [vmem:[#allocation99_spill] sm:$0xff]  ;;  %v1586_v15 = vmul.f32 %v4972_v1, %v1479_v26  ;;  %v4339_v62 = vpop.permute.xlu1 %4338 }
 0x2a2   :  { %4583 = vrot.lane.b32.xlu1 %v4582_v36, %s5057_s20  ;;  %v8798_v36 = vld [vmem:[#allocation86_spill] sm:$0xff]  ;;  %v1572_v52 = vmul.f32 %v6569_v60, %v8799_v6  ;;  %v6760_v21 = vpop.permute.xlu0 %4348  ;;  %v4321_v6 = vunpack.i.h.bf16 %v6740_v40 }
 0x2a3   :  { %v1525_v16 = vmul.f32 %v6707_v13, %v8798_v36 }
 0x2a4   :  { %4603 = vrot.lane.b32.xlu0 %v4602_v59, %s5054_s19 }
 0x2a5   :  { %v4607_v59 = vpack.i.bf16 %v1525_v16, %v1524_v34  ;;  %v4973_v16 = vld [vmem:[%s8424_s1 + $0xd8] sm:$0xff] }
 0x2a6   :  { %4598 = vrot.lane.b32.xlu1 %v4597_v54, %s5053_s15  ;;  %v8800_v54 = vld [vmem:[#allocation98_spill] sm:$0xff]  ;;  %v1587_v60 = vmul.f32 %v4973_v16, %v6683_v58 }
 0x2a7   :  { %v1573_v36 = vmul.f32 %v6277_v32, %v8800_v54  ;;  %v4975_v32 = vld [vmem:[%s8424_s1 + $0xf8] sm:$0xff] }
 0x2a8   :  { %4618 = vrot.lane.b32.xlu0 %v4617_v47, %s5056_s5  ;;  %v4974_v47 = vld [vmem:[%s8424_s1 + $0xe8] sm:$0xff]  ;;  %v4627_v25 = vpack.i.bf16 %v1587_v60, %v1586_v15  ;;  %v4331_v60 = vunpack.i.h.bf16 %v4329_v50 }
 0x2a9   :  { %v4612_v34 = vpack.i.bf16 %v1573_v36, %v1572_v52  ;;  %v1588_v26 = vmul.f32 %v4974_v47, %v6598_v29  ;;  %v4344_v36 = vpop.permute.xlu1 %4343  ;;  %v4341_v47 = vunpack.i.h.bf16 %v4339_v62 }
 0x2aa   :  { %4608 = vrot.lane.b32.xlu1 %v4607_v59, %s5054_s19  ;;  %v1589_v59 = vmul.f32 %v4975_v32, %v6305_v4  ;;  %v4340_v4 = vunpack.i.l.bf16 %v4339_v62  ;;  %v4346_v33 = vunpack.i.h.bf16 %v4344_v36  ;;  %v4345_v56 = vunpack.i.l.bf16 %v4344_v36 }
 0x2ac   :  { %4623 = vrot.lane.b32.xlu0 %v4622_v57, %s5057_s20  ;;  %v6782_v57 = vpop.permute.xlu0 %4353  ;;  %v4632_v58 = vpack.i.bf16 %v1589_v59, %v1588_v26  ;;  %v4976_v26 = vld [vmem:[%s8424_s1 + $0x20] sm:$0xff]  ;;  %v4977_v59 = vld [vmem:[%s8424_s1 + $0x30] sm:$0xff] }
 0x2ae   :  { %4613 = vrot.lane.b32.xlu1 %v4612_v34, %s5058_s4  ;;  %v4330_v34 = vunpack.i.l.bf16 %v4329_v50 }
 0x2b0   :  { %4628 = vrot.lane.b32.xlu0 %v4627_v25, %s5049_s23  ;;  %v6786_v52 = vpop.permute.xlu0 %4358  ;;  %v1432_v25 = vmul.f32 %v4976_v26, %v6329_v41 }
 0x2b2   :  { %4633 = vrot.lane.b32.xlu1 %v4632_v58, %s5049_s23  ;;  %v1433_v58 = vmul.f32 %v4977_v59, %v6317_v38  ;;  %v2104_v50 = vsel %vm1083_vm3, %v1432_v25, %v4330_v34  ;;  %v4320_v38 = vunpack.i.l.bf16 %v6740_v40 }
 0x2b3   :  { %v2120_v30 = vsel %vm1100_vm4, %v2104_v50, %v4340_v4 }
 0x2b4   :  { %v2105_v62 = vsel %vm1083_vm3, %v1433_v58, %v4331_v60  ;;  %v2136_v41 = vsel %vm1117_vm5, %v2120_v30, %v4345_v56  ;;  %v4978_v60 = vld [vmem:[%s8424_s1 + $0x40] sm:$0xff] }
 0x2b5   :  { %v2121_v18 = vsel %vm1100_vm4, %v2105_v62, %v4341_v47  ;;  %v1434_v34 = vmul.f32 %v4978_v60, %v6323_v35  ;;  %v4979_v47 = vld [vmem:[%s8424_s1 + $0x50] sm:$0xff]  ;;  %v2152_v4 = vsel %vm1134_vm6, %v2136_v41, %v4320_v38 }
 0x2b6   :  { %v2137_v26 = vsel %vm1117_vm5, %v2121_v18, %v4346_v33  ;;  %v1435_v30 = vmul.f32 %v4979_v47, %v6393_v37 }
 0x2b7   :  { %v2153_v40 = vsel %vm1134_vm6, %v2137_v26, %v4321_v6 }
 0x2b8   :  { %v4364_v29 = vpop.permute.xlu1 %4363 }
 0x2b9   :  { %v4366_v56 = vunpack.i.h.bf16 %v4364_v29  ;;  %v4365_v33 = vunpack.i.l.bf16 %v4364_v29 }
 0x2ba   :  { %v6788_v15 = vpop.permute.xlu0 %4378 }
 0x2bc   :  { %v4369_v1 = vpop.permute.xlu1 %4368 }
 0x2bd   :  { %v4370_v18 = vunpack.i.l.bf16 %v4369_v1  ;;  %v4371_v25 = vunpack.i.h.bf16 %v4369_v1 }
 0x2be   :  { %v6790_v16 = vpop.permute.xlu0 %4398 }
 0x2bf   :  { %v2106_v37 = vsel %vm1083_vm3, %v1434_v34, %v4370_v18 }
 0x2c0   :  { %v6792_v32 = vpop.permute.xlu1 %4373 }
 0x2c2   :  { %v4404_v2 = vpop.permute.xlu0 %4403 }
 0x2c3   :  { %v4406_v6 = vunpack.i.h.bf16 %v4404_v2  ;;  %v4405_v26 = vunpack.i.l.bf16 %v4404_v2 }
 0x2c4   :  { %v4384_v63 = vpop.permute.xlu1 %4383 }
 0x2c5   :  { %v4386_v36 = vunpack.i.h.bf16 %v4384_v63  ;;  %v4385_v59 = vunpack.i.l.bf16 %v4384_v63 }
 0x2c6   :  { %v4409_v5 = vpop.permute.xlu0 %4408 }
 0x2c7   :  { %v4410_v58 = vunpack.i.l.bf16 %v4409_v5  ;;  %v2168_v35 = vsel %vm1151_vm7, %v2152_v4, %v4385_v59  ;;  %v2169_v60 = vsel %vm1151_vm7, %v2153_v40, %v4386_v36  ;;  %v4411_v61 = vunpack.i.h.bf16 %v4409_v5 }
 0x2c8   :  { %v4389_v63 = vpop.permute.xlu1 %4388  ;;  %v2107_v59 = vsel %vm1083_vm3, %v1435_v30, %v4371_v25  ;;  %v4381_v40 = vunpack.i.h.bf16 %v6788_v15  ;;  %v4380_v25 = vunpack.i.l.bf16 %v6788_v15  ;;  %v4400_v15 = vunpack.i.l.bf16 %v6790_v16 }
 0x2c9   :  { %v4391_v50 = vunpack.i.h.bf16 %v4389_v63  ;;  %v4390_v62 = vunpack.i.l.bf16 %v4389_v63  ;;  %v2122_v36 = vsel %vm1100_vm4, %v2106_v37, %v4410_v58  ;;  %v2123_v4 = vsel %vm1100_vm4, %v2107_v59, %v4411_v61 }
 0x2ca   :  { %v4419_v54 = vpop.permute.xlu0 %4418 }
 0x2cb   :  { %v4420_v39 = vunpack.i.l.bf16 %v4419_v54  ;;  %v2184_v29 = vsel %vm1168_vm8, %v2168_v35, %v4390_v62  ;;  %v2185_v41 = vsel %vm1168_vm8, %v2169_v60, %v4391_v50  ;;  %v4421_v38 = vunpack.i.h.bf16 %v4419_v54 }
 0x2cc   :  { %v2200_v1 = vsel %vm1185_vm9, %v2184_v29, %v4365_v33  ;;  %v2201_v47 = vsel %vm1185_vm9, %v2185_v41, %v4366_v56  ;;  %v4394_v63 = vpop.permute.xlu1 %4393 }
 0x2cd   :  { %v2138_v34 = vsel %vm1117_vm5, %v2122_v36, %v4420_v39  ;;  %v6832_v18 = vsel %vm1202_vm10, %v2200_v1, %v4405_v26  ;;  %v6835_v54 = vsel %vm1202_vm10, %v2201_v47, %v4406_v6  ;;  %v2139_v2 = vsel %vm1117_vm5, %v2123_v4, %v4421_v38 }
 0x2ce   :  { %v4429_v5 = vpop.permute.xlu0 %4428  ;;  %v2154_v39 = vsel %vm1134_vm6, %v2138_v34, %v4380_v25  ;;  %v2155_v50 = vsel %vm1134_vm6, %v2139_v2, %v4381_v40  ;;  %v4401_v6 = vunpack.i.h.bf16 %v6790_v16  ;;  %v4396_v40 = vunpack.i.h.bf16 %v4394_v63 }
 0x2cf   :  { %v4431_v33 = vunpack.i.h.bf16 %v4429_v5  ;;  %v4430_v56 = vunpack.i.l.bf16 %v4429_v5  ;;  %v4395_v25 = vunpack.i.l.bf16 %v4394_v63 }
 0x2d0   :  { %v4414_v61 = vpop.permute.xlu1 %4413 }
 0x2d1   :  { %v2170_v60 = vsel %vm1151_vm7, %v2154_v39, %v4430_v56  ;;  %v2171_v37 = vsel %vm1151_vm7, %v2155_v50, %v4431_v33  ;;  %v4415_v39 = vunpack.i.l.bf16 %v4414_v61 }
 0x2d2   :  { %v4434_v58 = vpop.permute.xlu0 %4433 }
 0x2d3   :  { %v4436_v62 = vunpack.i.h.bf16 %v4434_v58  ;;  %v4435_v35 = vunpack.i.l.bf16 %v4434_v58  ;;  %v4416_v58 = vunpack.i.h.bf16 %v4414_v61 }
 0x2d4   :  { %v4424_v38 = vpop.permute.xlu1 %4423 }
 0x2d5   :  { %v2186_v29 = vsel %vm1168_vm8, %v2170_v60, %v4435_v35  ;;  %v2187_v41 = vsel %vm1168_vm8, %v2171_v37, %v4436_v62  ;;  %v4980_v62 = vld [vmem:[%s8424_s1 + $0x60] sm:$0xff]  ;;  %v4981_v60 = vld [vmem:[%s8424_s1 + $0x70] sm:$0xff] }
 0x2d6   :  { %v4439_v26 = vpop.permute.xlu0 %4438  ;;  %v2202_v59 = vsel %vm1185_vm9, %v2186_v29, %v4400_v15  ;;  %v2203_v36 = vsel %vm1185_vm9, %v2187_v41, %v4401_v6  ;;  %v1436_v35 = vmul.f32 %v4980_v62, %v6400_v53  ;;  %v1437_v37 = vmul.f32 %v4981_v60, %v6427_v9 }
 0x2d7   :  { %v4441_v1 = vunpack.i.h.bf16 %v4439_v26  ;;  %v4440_v47 = vunpack.i.l.bf16 %v4439_v26  ;;  %v4426_v29 = vunpack.i.h.bf16 %v4424_v38  ;;  %v4425_v41 = vunpack.i.l.bf16 %v4424_v38 }
 0x2d8   :  { %v4444_v34 = vpop.permute.xlu1 %4443  ;;  %v2109_v63 = vsel %vm1083_vm3, %v1437_v37, %v4396_v40  ;;  %v2108_v61 = vsel %vm1083_vm3, %v1436_v35, %v4395_v25  ;;  %v4375_v9 = vunpack.i.l.bf16 %v6792_v32  ;;  %v4982_v40 = vld [vmem:[%s8424_s1 + $0x80] sm:$0xff] }
 0x2d9   :  { %v6853_v5 = vsel %vm1202_vm10, %v2202_v59, %v4440_v47  ;;  %v6856_v4 = vsel %vm1202_vm10, %v2203_v36, %v4441_v1  ;;  %v2124_v15 = vsel %vm1100_vm4, %v2108_v61, %v4415_v39  ;;  %v2125_v26 = vsel %vm1100_vm4, %v2109_v63, %v4416_v58  ;;  %v4983_v58 = vld [vmem:[%s8424_s1 + $0x90] sm:$0xff] }
 0x2da   :  { %v6858_v2 = vpop.permute.xlu0 %4458  ;;  %v2140_v53 = vsel %vm1117_vm5, %v2124_v15, %v4425_v41  ;;  %v2141_v47 = vsel %vm1117_vm5, %v2125_v26, %v4426_v29  ;;  %v4376_v36 = vunpack.i.h.bf16 %v6792_v32  ;;  %v1438_v25 = vmul.f32 %v4982_v40, %v6450_v44 }
 0x2db   :  { %v1439_v39 = vmul.f32 %v4983_v58, %v6508_v8  ;;  %v4446_v60 = vunpack.i.h.bf16 %v4444_v34  ;;  %v4445_v37 = vunpack.i.l.bf16 %v4444_v34  ;;  %v2156_v29 = vsel %vm1134_vm6, %v2140_v53, %v4375_v9 }
 0x2dc   :  { %v4449_v16 = vpop.permute.xlu1 %4448  ;;  %v2157_v32 = vsel %vm1134_vm6, %v2141_v47, %v4376_v36 }
 0x2dd   :  { %v4450_v35 = vunpack.i.l.bf16 %v4449_v16  ;;  %v4451_v63 = vunpack.i.h.bf16 %v4449_v16 }
 0x2de   :  { %v6862_v56 = vpop.permute.xlu0 %4478 }
 0x2df   :  { %v2110_v8 = vsel %vm1083_vm3, %v1438_v25, %v4450_v35 }
 0x2e0   :  { %v6864_v50 = vpop.permute.xlu1 %4453 }
 0x2e2   :  { %v4484_v6 = vpop.permute.xlu0 %4483 }
 0x2e3   :  { %v4486_v47 = vunpack.i.h.bf16 %v4484_v6  ;;  %v4485_v36 = vunpack.i.l.bf16 %v4484_v6 }
 0x2e4   :  { %v4464_v1 = vpop.permute.xlu1 %4463 }
 0x2e5   :  { %v4466_v38 = vunpack.i.h.bf16 %v4464_v1  ;;  %v4465_v62 = vunpack.i.l.bf16 %v4464_v1 }
 0x2e6   :  { %v4489_v59 = vpop.permute.xlu0 %4488 }
 0x2e7   :  { %v4490_v61 = vunpack.i.l.bf16 %v4489_v59  ;;  %v2172_v44 = vsel %vm1151_vm7, %v2156_v29, %v4465_v62  ;;  %v2173_v40 = vsel %vm1151_vm7, %v2157_v32, %v4466_v38  ;;  %v4491_v33 = vunpack.i.h.bf16 %v4489_v59 }
 0x2e8   :  { %v4469_v41 = vpop.permute.xlu1 %4468  ;;  %v2111_v62 = vsel %vm1083_vm3, %v1439_v39, %v4451_v63  ;;  %v4461_v63 = vunpack.i.h.bf16 %v6858_v2  ;;  %v4456_v39 = vunpack.i.h.bf16 %v6864_v50 }
 0x2e9   :  { %v4471_v15 = vunpack.i.h.bf16 %v4469_v41  ;;  %v4470_v26 = vunpack.i.l.bf16 %v4469_v41  ;;  %v2126_v59 = vsel %vm1100_vm4, %v2110_v8, %v4490_v61  ;;  %v2127_v25 = vsel %vm1100_vm4, %v2111_v62, %v4491_v33 }
 0x2ea   :  { %v4499_v1 = vpop.permute.xlu0 %4498  ;;  %v4460_v61 = vunpack.i.l.bf16 %v6858_v2  ;;  %v4481_v2 = vunpack.i.h.bf16 %v6862_v56 }
 0x2eb   :  { %v4500_v30 = vunpack.i.l.bf16 %v4499_v1  ;;  %v2188_v34 = vsel %vm1168_vm8, %v2172_v44, %v4470_v26  ;;  %v2189_v53 = vsel %vm1168_vm8, %v2173_v40, %v4471_v15  ;;  %v4501_v9 = vunpack.i.h.bf16 %v4499_v1 }
 0x2ec   :  { %v2204_v16 = vsel %vm1185_vm9, %v2188_v34, %v4445_v37  ;;  %v2205_v58 = vsel %vm1185_vm9, %v2189_v53, %v4446_v60  ;;  %v6899_v41 = vpop.permute.xlu1 %4473 }
 0x2ed   :  { %v2142_v35 = vsel %vm1117_vm5, %v2126_v59, %v4500_v30  ;;  %v6906_v29 = vsel %vm1202_vm10, %v2204_v16, %v4485_v36  ;;  %v6909_v6 = vsel %vm1202_vm10, %v2205_v58, %v4486_v47  ;;  %v2143_v37 = vsel %vm1117_vm5, %v2127_v25, %v4501_v9 }
 0x2ee   :  { %v4509_v38 = vpop.permute.xlu0 %4508  ;;  %v2158_v15 = vsel %vm1134_vm6, %v2142_v35, %v4460_v61  ;;  %v2159_v26 = vsel %vm1134_vm6, %v2143_v37, %v4461_v63  ;;  %v4480_v47 = vunpack.i.l.bf16 %v6862_v56  ;;  %v4984_v56 = vld [vmem:[%s8424_s1 + $0xa0] sm:$0xff]  ;;  %v4985_v63 = vld [vmem:[%s8424_s1 + $0xb0] sm:$0xff] }
 0x2ef   :  { %v4511_v60 = vunpack.i.h.bf16 %v4509_v38  ;;  %v4510_v32 = vunpack.i.l.bf16 %v4509_v38  ;;  %v1441_v61 = vmul.f32 %v4985_v63, %v6542_v23  ;;  %v4336_v23 = vunpack.i.h.bf16 %v6745_v45 }
 0x2f0   :  { %v6916_v33 = vpop.permute.xlu1 %4493 }
 0x2f1   :  { %v2174_v40 = vsel %vm1151_vm7, %v2158_v15, %v4510_v32  ;;  %v2175_v8 = vsel %vm1151_vm7, %v2159_v26, %v4511_v60  ;;  %v1440_v32 = vmul.f32 %v4984_v56, %v6515_v43  ;;  %v4987_v26 = vld [vmem:[%s8424_s1 + $0x10] sm:$0xff]  ;;  %v4326_v43 = vunpack.i.h.bf16 %v6723_v28 }
 0x2f2   :  { %v4514_v30 = vpop.permute.xlu0 %4513  ;;  %v4496_v63 = vunpack.i.h.bf16 %v6916_v33 }
 0x2f3   :  { %v4516_v1 = vunpack.i.h.bf16 %v4514_v30  ;;  %v4515_v44 = vunpack.i.l.bf16 %v4514_v30  ;;  %v4986_v30 = vld [vmem:[%s8424_s1] sm:$0xff] }
 0x2f4   :  { %v6924_v9 = vpop.permute.xlu1 %4503  ;;  %v1430_v15 = vmul.f32 %v4986_v30, %v6707_v13  ;;  %v4350_v13 = vunpack.i.l.bf16 %v6760_v21 }
 0x2f5   :  { %v2190_v34 = vsel %vm1168_vm8, %v2174_v40, %v4515_v44  ;;  %v2191_v53 = vsel %vm1168_vm8, %v2175_v8, %v4516_v1  ;;  %v1431_v1 = vmul.f32 %v4987_v26, %v6622_v55  ;;  %v4325_v40 = vunpack.i.l.bf16 %v6723_v28 }
 0x2f6   :  { %v4519_v36 = vpop.permute.xlu0 %4518  ;;  %v2206_v62 = vsel %vm1185_vm9, %v2190_v34, %v4480_v47  ;;  %v2207_v59 = vsel %vm1185_vm9, %v2191_v53, %v4481_v2  ;;  %v4335_v8 = vunpack.i.l.bf16 %v6745_v45  ;;  %v4351_v53 = vunpack.i.h.bf16 %v6760_v21 }
 0x2f7   :  { %v4521_v16 = vunpack.i.h.bf16 %v4519_v36  ;;  %v4520_v58 = vunpack.i.l.bf16 %v4519_v36  ;;  %v4356_v36 = vunpack.i.h.bf16 %v6782_v57  ;;  %v4355_v55 = vunpack.i.l.bf16 %v6782_v57 }
 0x2f8   :  { %v6936_v35 = vpop.permute.xlu1 %4523  ;;  %v4360_v28 = vunpack.i.l.bf16 %v6786_v52  ;;  %v4475_v45 = vunpack.i.l.bf16 %v6899_v41  ;;  %v4495_v21 = vunpack.i.l.bf16 %v6916_v33  ;;  %v4505_v30 = vunpack.i.l.bf16 %v6924_v9 }
 0x2f9   :  { %v6931_v38 = vsel %vm1202_vm10, %v2206_v62, %v4520_v58  ;;  %v6934_v25 = vsel %vm1202_vm10, %v2207_v59, %v4521_v16  ;;  %v4361_v62 = vunpack.i.h.bf16 %v6786_v52  ;;  %v4476_v59 = vunpack.i.h.bf16 %v6899_v41 }
 0x2fa   :  { %v4534_v37 = vpop.permute.xlu0 %4533  ;;  %v4455_v41 = vunpack.i.l.bf16 %v6864_v50  ;;  %v2112_v19 = vsel %vm1083_vm3, %v1440_v32, %v4475_v45 }
 0x2fb   :  { %v4536_v2 = vunpack.i.h.bf16 %v4534_v37  ;;  %v4535_v47 = vunpack.i.l.bf16 %v4534_v37  ;;  %v4506_v37 = vunpack.i.h.bf16 %v6924_v9  ;;  %v2113_v33 = vsel %vm1083_vm3, %v1441_v61, %v4476_v59 }
 0x2fc   :  { %v6956_v44 = vpop.permute.xlu1 %4528 }
 0x2fd   :  { %v2103_v26 = vsel %vm1083_vm3, %v1431_v1, %v4536_v2 }
 0x2fe   :  { %v4554_v34 = vpop.permute.xlu0 %4553 }
 0x2ff   :  { %v4556_v16 = vunpack.i.h.bf16 %v4554_v34  ;;  %v4555_v58 = vunpack.i.l.bf16 %v4554_v34  ;;  %v2102_v34 = vsel %vm1083_vm3, %v1430_v15, %v4535_v47  ;;  %v2128_v15 = vsel %vm1100_vm4, %v2112_v19, %v4495_v21 }
 0x300   :  { %v4539_v56 = vpop.permute.xlu1 %4538  ;;  %v2129_v47 = vsel %vm1100_vm4, %v2113_v33, %v4496_v63 }
 0x301   :  { %v2118_v49 = vsel %vm1100_vm4, %v2102_v34, %v4555_v58  ;;  %v2119_v42 = vsel %vm1100_vm4, %v2103_v26, %v4556_v16  ;;  %v2144_v16 = vsel %vm1117_vm5, %v2128_v15, %v4505_v30  ;;  %v2145_v61 = vsel %vm1117_vm5, %v2129_v47, %v4506_v37 }
 0x302   :  { %v4559_v57 = vpop.permute.xlu0 %4558 }
 0x303   :  { %v4561_v60 = vunpack.i.h.bf16 %v4559_v57  ;;  %v4560_v52 = vunpack.i.l.bf16 %v4559_v57 }
 0x304   :  { %v4544_v2 = vpop.permute.xlu1 %4543 }
 0x305   :  { %v2135_v9 = vsel %vm1117_vm5, %v2119_v42, %v4561_v60  ;;  %v2134_v1 = vsel %vm1117_vm5, %v2118_v49, %v4560_v52  ;;  %v4541_v49 = vunpack.i.h.bf16 %v4539_v56  ;;  %v4540_v60 = vunpack.i.l.bf16 %v4539_v56 }
 0x306   :  { %v2151_v57 = vsel %vm1134_vm6, %v2135_v9, %v4326_v43  ;;  %v2150_v50 = vsel %vm1134_vm6, %v2134_v1, %v4325_v40  ;;  %v6988_v58 = vpop.permute.xlu0 %4563  ;;  %v4546_v45 = vunpack.i.h.bf16 %v4544_v2  ;;  %v4545_v43 = vunpack.i.l.bf16 %v4544_v2 }
 0x307   :  { %v2166_v32 = vsel %vm1151_vm7, %v2150_v50, %v4350_v13  ;;  %v2167_v42 = vsel %vm1151_vm7, %v2151_v57, %v4351_v53  ;;  %v2160_v56 = vsel %vm1134_vm6, %v2144_v16, %v4455_v41  ;;  %v8802_v9 = vpack.c.bf16 %v6856_v4, %v6853_v5 }
 0x308   :  { %v2182_v19 = vsel %vm1168_vm8, %v2166_v32, %v4355_v55  ;;  %v2183_v59 = vsel %vm1168_vm8, %v2167_v42, %v4356_v36  ;;  %v6996_v63 = vpop.permute.xlu1 %4548  ;;  %v2161_v55 = vsel %vm1134_vm6, %v2145_v61, %v4456_v39  ;;  %v2176_v36 = vsel %vm1151_vm7, %v2160_v56, %v4540_v60  ;;  %v4988_v42 = vld [vmem:[%s8424_s1 + $0xc0] sm:$0xff] }
 0x309   :  { %v2198_v40 = vsel %vm1185_vm9, %v2182_v19, %v4335_v8  ;;  %v2199_v21 = vsel %vm1185_vm9, %v2183_v59, %v4336_v23  ;;  %v2177_v26 = vsel %vm1151_vm7, %v2161_v55, %v4541_v49  ;;  %v2192_v34 = vsel %vm1168_vm8, %v2176_v36, %v4545_v43 }
 0x30a   :  { %v7000_v30 = vpop.permute.xlu0 %4573  ;;  %v2214_v13 = vsel %vm1202_vm10, %v2198_v40, %v4360_v28  ;;  %v2215_v53 = vsel %vm1202_vm10, %v2199_v21, %v4361_v62  ;;  %v2193_v8 = vsel %vm1168_vm8, %v2177_v26, %v4546_v45  ;;  %v4526_v28 = vunpack.i.h.bf16 %v6936_v35 }
 0x30b   :  { %v2230_v37 = vpack.c.bf16 %v2215_v53, %v2214_v13  ;;  %v4525_v62 = vunpack.i.l.bf16 %v6936_v35  ;;  %v8801_v39 = vpack.c.bf16 %v6835_v54, %v6832_v18  ;;  %v4531_v57 = vunpack.i.h.bf16 %v6956_v44 }
 0x30c   :  { %v7010_v23 = vpop.permute.xlu1 %4568  ;;  %v2209_v2 = vsel %vm1185_vm9, %v2193_v8, %v4526_v28  ;;  %v4530_v50 = vunpack.i.l.bf16 %v6956_v44  ;;  %v8803_v32 = vpack.c.bf16 %v6909_v6, %v6906_v29  ;;  %v1442_v49 = vmul.f32 %v4988_v42, %v6559_v48  ;;  %v4989_v44 = vld [vmem:[%s8424_s1 + $0xd0] sm:$0xff]  ;;  %v4990_v29 = vld [vmem:[%s8424_s1 + $0xe0] sm:$0xff] }
 0x30d   :  { %3963 = vmatprep.mubr.msk.bf16.mxu1 %vm1249_vm11, %v2230_v37  ;;  %v2208_v1 = vsel %vm1185_vm9, %v2192_v34, %v4525_v62  ;;  %v1443_v60 = vmul.f32 %v4989_v44, %v6635_v12  ;;  %v8804_v45 = vpack.c.bf16 %v6934_v25, %v6931_v38  ;;  %v1444_v6 = vmul.f32 %v4990_v29, %v6714_v7  ;;  %v4991_v48 = vld [vmem:[%s8424_s1 + $0xf0] sm:$0xff] }
 0x30e   :  { %v4589_v52 = vpop.permute.xlu0 %4588  ;;  %3964 = vmatmul.mubr.msk.bf16.vlgmr.msra.gmra.mxu1 %vm1249_vm11, %v8801_v39  ;;  %v1445_v43 = vmul.f32 %v4991_v48, %v6738_v11  ;;  %v4551_v12 = vunpack.i.h.bf16 %v6996_v63  ;;  %v4550_v40 = vunpack.i.l.bf16 %v6996_v63  ;;  %v2114_v25 = vsel %vm1083_vm3, %v1442_v49, %v4530_v50 }
 0x30f   :  { %v4591_v41 = vunpack.i.h.bf16 %v4589_v52  ;;  %v4590_v33 = vunpack.i.l.bf16 %v4589_v52  ;;  %3967 = vmatprep.mubr.msk.bf16.mxu1 %vm1249_vm11, %v8802_v9  ;;  %v2115_v38 = vsel %vm1083_vm3, %v1443_v60, %v4531_v57  ;;  %v4566_v21 = vunpack.i.h.bf16 %v6988_v58 }
 0x310   :  { %v7027_v47 = vpop.permute.xlu1 %4578  ;;  %v4565_v13 = vunpack.i.l.bf16 %v6988_v58  ;;  %v4576_v7 = vunpack.i.h.bf16 %v7000_v30  ;;  %v4575_v56 = vunpack.i.l.bf16 %v7000_v30  ;;  %v2117_v8 = vsel %vm1083_vm3, %v1445_v43, %v4551_v12 }
 0x311   :  { %v2225_v15 = vsel %vm1202_vm10, %v2209_v2, %v4591_v41  ;;  %v2224_v35 = vsel %vm1202_vm10, %v2208_v1, %v4590_v33  ;;  %v2116_v58 = vsel %vm1083_vm3, %v1444_v6, %v4550_v40  ;;  %v4571_v52 = vunpack.i.h.bf16 %v7010_v23 }
 0x312   :  { %v4594_v18 = vpop.permute.xlu0 %4593  ;;  %v2235_v54 = vpack.c.bf16 %v2225_v15, %v2224_v35  ;;  %v4570_v30 = vunpack.i.l.bf16 %v7010_v23  ;;  %v4581_v39 = vunpack.i.h.bf16 %v7027_v47  ;;  %v4580_v41 = vunpack.i.l.bf16 %v7027_v47 }
 0x313   :  { %v4596_v5 = vunpack.i.h.bf16 %v4594_v18  ;;  %v4595_v4 = vunpack.i.l.bf16 %v4594_v18 }
 0x314   :  { %v7031_v16 = vpop.permute.xlu1 %4583 }
 0x315   :  { %v2131_v55 = vsel %vm1100_vm4, %v2115_v38, %v4596_v5  ;;  %v2130_v11 = vsel %vm1100_vm4, %v2114_v25, %v4595_v4  ;;  %v4586_v60 = vunpack.i.h.bf16 %v7031_v16 }
 0x316   :  { %v4604_v61 = vpop.permute.xlu0 %4603  ;;  %3968 = vmatmul.mubr.msk.bf16.gmra.mxu1 %vm1249_vm11, %v8803_v32 }
 0x317   :  { %v4606_v19 = vunpack.i.h.bf16 %v4604_v61  ;;  %v4605_v59 = vunpack.i.l.bf16 %v4604_v61  ;;  %3971 = vmatprep.mubr.msk.bf16.mxu1 %vm1249_vm11, %v8804_v45 }
 0x318   :  { %v4599_v53 = vpop.permute.xlu1 %4598 }
 0x319   :  { %v2146_v63 = vsel %vm1117_vm5, %v2130_v11, %v4605_v59  ;;  %v2147_v36 = vsel %vm1117_vm5, %v2131_v55, %v4606_v19  ;;  %v4601_v26 = vunpack.i.h.bf16 %v4599_v53  ;;  %v4600_v34 = vunpack.i.l.bf16 %v4599_v53 }
 0x31a   :  { %v4619_v37 = vpop.permute.xlu0 %4618  ;;  %v2162_v9 = vsel %vm1134_vm6, %v2146_v63, %v4565_v13  ;;  %v2163_v1 = vsel %vm1134_vm6, %v2147_v36, %v4566_v21  ;;  %v4585_v19 = vunpack.i.l.bf16 %v7031_v16 }
 0x31b   :  { %v4621_v28 = vunpack.i.h.bf16 %v4619_v37  ;;  %v4620_v62 = vunpack.i.l.bf16 %v4619_v37  ;;  %v2133_v18 = vsel %vm1100_vm4, %v2117_v8, %v4601_v26  ;;  %v2132_v57 = vsel %vm1100_vm4, %v2116_v58, %v4600_v34 }
 0x31c   :  { %v4609_v33 = vpop.permute.xlu1 %4608 }
 0x31d   :  { %v4611_v2 = vunpack.i.h.bf16 %v4609_v33  ;;  %v4610_v15 = vunpack.i.l.bf16 %v4609_v33  ;;  %v2178_v5 = vsel %vm1151_vm7, %v2162_v9, %v4620_v62  ;;  %v2179_v47 = vsel %vm1151_vm7, %v2163_v1, %v4621_v28 }
 0x31e   :  { %v4624_v35 = vpop.permute.xlu0 %4623  ;;  %3972 = vmatmul.mubr.msk.bf16.gmra.mxu1 %vm1249_vm11, %v2235_v54 }
 0x31f   :  { %v4626_v50 = vunpack.i.h.bf16 %v4624_v35  ;;  %v4625_v23 = vunpack.i.l.bf16 %v4624_v35  ;;  %v2148_v4 = vsel %vm1117_vm5, %v2132_v57, %v4610_v15  ;;  %v2149_v61 = vsel %vm1117_vm5, %v2133_v18, %v4611_v2 }
 0x320   :  { %v2164_v32 = vsel %vm1134_vm6, %v2148_v4, %v4570_v30  ;;  %v2165_v42 = vsel %vm1134_vm6, %v2149_v61, %v4571_v52  ;;  %v4614_v44 = vpop.permute.xlu1 %4613 }
 0x321   :  { %v2194_v54 = vsel %vm1168_vm8, %v2178_v5, %v4625_v23  ;;  %v2195_v49 = vsel %vm1168_vm8, %v2179_v47, %v4626_v50  ;;  %v2180_v59 = vsel %vm1151_vm7, %v2164_v32, %v4580_v41  ;;  %v2181_v45 = vsel %vm1151_vm7, %v2165_v42, %v4581_v39 }
 0x322   :  { %v4629_v29 = vpop.permute.xlu0 %4628  ;;  %v4616_v6 = vunpack.i.h.bf16 %v4614_v44  ;;  %v4615_v48 = vunpack.i.l.bf16 %v4614_v44  ;;  %v2196_v40 = vsel %vm1168_vm8, %v2180_v59, %v4585_v19  ;;  %v2197_v38 = vsel %vm1168_vm8, %v2181_v45, %v4586_v60 }
 0x323   :  { %v4631_v43 = vunpack.i.h.bf16 %v4629_v29  ;;  %v4630_v12 = vunpack.i.l.bf16 %v4629_v29  ;;  %v2210_v25 = vsel %vm1185_vm9, %v2194_v54, %v4575_v56  ;;  %v2211_v21 = vsel %vm1185_vm9, %v2195_v49, %v4576_v7  ;;  %v7107_v7 = vld [vmem:[%s8424_s1 + $0x201] ss:$0 sm:$0xff]  ;;  %v4992_v29 = vld [vmem:[%s8424_s1 + $0x18] sm:$0xff] }
 0x324   :  { %v4634_v53 = vpop.permute.xlu1 %4633  ;;  %v2212_v63 = vsel %vm1185_vm9, %v2196_v40, %v4615_v48  ;;  %v2213_v36 = vsel %vm1185_vm9, %v2197_v38, %v4616_v6  ;;  %v4993_v48 = vld [vmem:[%s8424_s1 + $0x8] sm:$0xff] }
 0x325   :  { %v2226_v13 = vsel %vm1202_vm10, %v2210_v25, %v4630_v12  ;;  %v2227_v16 = vsel %vm1202_vm10, %v2211_v21, %v4631_v43  ;;  %v4636_v55 = vunpack.i.h.bf16 %v4634_v53  ;;  %v4635_v11 = vunpack.i.l.bf16 %v4634_v53 }
 0x326   :  { %v2236_v37 = vpack.c.bf16 %v2227_v16, %v2226_v13 }
 0x327   :  { %v2228_v26 = vsel %vm1202_vm10, %v2212_v63, %v4635_v11  ;;  %v2229_v34 = vsel %vm1202_vm10, %v2213_v36, %v4636_v55 }
 0x328   :  { %3975 = vmatprep.mubr.msk.bf16.mxu1 %vm1249_vm11, %v2236_v37  ;;  %v2237_v56 = vpack.c.bf16 %v2229_v34, %v2228_v26 }
 0x32a   :  { %3976 = vmatmul.mubr.msk.bf16.gmra.mxu1 %vm1249_vm11, %v2237_v56 }
 0x3ce   :  { %v3965_v8 = vpop.f32.mrf.mxu1 }
 0x3cf   :  { %v2330_v58 = vadd.f32 %v3965_v8, %v7107_v7 }
 0x3d0   :  { %v2321_v28 = vpop.f32.mrf.mxu1 }
 0x3d1   :  { %v2386_v30 = vmax.f32 %v2330_v58, 0.0  ;;  %v2322_v39 = vadd.f32 %v2321_v28, %v7107_v7  ;;  %v8806_v58 = vld [vmem:[#allocation28_spill] sm:$0xff] }
 0x3d2   :  { %v3966_v62 = vpop.f32.mrf.mxu1 }
 0x3d3   :  { %v2333_v52 = vadd.f32 %v3966_v62, %v7107_v7  ;;  %v2484_v35 = vrot.slane %v2386_v30, 1  ;;  %v7116_v18 = vmax.f32 %v2322_v39, 0.0  ;;  %v2579_v47 = vmul.f32 %v2386_v30, %v8714_v3 }
 0x3d4   :  { %v2324_v41 = vpop.f32.mrf.mxu1  ;;  %v2469_v49 = vmul.f32 %v2386_v30, %v5182_v14  ;;  %v2420_v44 = vrot.slane %v2386_v30, 7 }
 0x3d5   :  { %v7112_v33 = vmax.f32 %v2333_v52, 0.0  ;;  %v2325_v9 = vadd.f32 %v2324_v41, %v7107_v7  ;;  %v2482_v3 = vrot.slane %v7116_v18, 1  ;;  %v8808_v41 = vld [vmem:[#allocation26_spill] sm:$0xff] }
 0x3d6   :  { %v3969_v1 = vpop.f32.mrf.mxu1 }
 0x3d7   :  { %v2485_v2 = vrot.slane %v7112_v33, 1  ;;  %v2385_v15 = vmax.f32 %v2325_v9, 0.0  ;;  %v4637_v50 = vpack.i.bf16 %v7112_v33, %v2386_v30  ;;  %v2421_v25 = vrot.slane %v7112_v33, 7  ;;  %v8807_v30 = vld [vmem:[#allocation29_spill] sm:$0xff] }
 0x3d8   :  { %v2337_v57 = vpop.f32.mrf.mxu1  ;;  %v2346_v52 = vadd.f32 %v3969_v1, %v7107_v7  ;;  %v2470_v39 = vmul.f32 %v7112_v33, %v8807_v30  ;;  %v8820_v30 = vld [vmem:[#allocation32_spill] sm:$0xff] }
 0x3d9   :  { %v2419_v23 = vrot.slane %v2385_v15, 7  ;;  %v2483_v5 = vrot.slane %v2385_v15, 1  ;;  %4638 = vrot.lane.b32.xlu0 %v4637_v50, %s5059_s30  ;;  %v4642_v61 = vpack.i.bf16 %v2385_v15, %v7116_v18  ;;  %v2578_v32 = vmul.f32 %v2385_v15, %v8713_v20 }
 0x3da   :  { %v3970_v4 = vpop.f32.mrf.mxu1  ;;  %v2468_v42 = vmul.f32 %v2385_v15, %v8712_v31  ;;  %v7128_v54 = vsel %vm202_vm0, %v2484_v35, %v2485_v2  ;;  %v2418_v31 = vrot.slane %v7116_v18, 7  ;;  %v2338_v59 = vadd.f32 %v2337_v57, %v7107_v7 }
 0x3db   :  { %4643 = vrot.lane.b32.xlu1 %v4642_v61, %s5059_s30  ;;  %v4647_v19 = vpack.i.bf16 %v2579_v47, %v2578_v32  ;;  %v2511_v20 = vsel %vm202_vm0, %v2483_v5, %v2484_v35  ;;  %v2595_v14 = vmul.f32 %v4992_v29, %v7128_v54  ;;  %v7151_v12 = vsel %vm202_vm0, %v2482_v3, %v2483_v5  ;;  %v8812_v29 = vld [vmem:[#allocation18_spill] sm:$0xff] }
 0x3dc   :  { %v2340_v60 = vpop.f32.mrf.mxu1  ;;  %v4652_v45 = vpack.i.bf16 %v2469_v49, %v2468_v42  ;;  %v2594_v43 = vmul.f32 %v4993_v48, %v2511_v20  ;;  %v2547_v40 = vmul.f32 %v2511_v20, %v8718_v22  ;;  %v7156_v38 = vsel %vm57_vm1, %v2419_v23, %v2420_v44 }
 0x3dd   :  { %4648 = vrot.lane.b32.xlu0 %v4647_v19, %s5046_s16  ;;  %v2546_v13 = vmul.f32 %v7151_v12, %v8717_v17  ;;  %v7166_v16 = vsel %vm57_vm1, %v2418_v31, %v2419_v23  ;;  %v2563_v22 = vmul.f32 %v7156_v38, %v8722_v27  ;;  %v2388_v55 = vmax.f32 %v2338_v59, 0.0  ;;  %v8809_v23 = vld [vmem:[#allocation27_spill] sm:$0xff] }
 0x3de   :  { %v7142_v6 = vpop.f32.mrf.mxu1  ;;  %v3177_v21 = vpack.c.bf16 %v2595_v14, %v2594_v43  ;;  %v2562_v37 = vmul.f32 %v7166_v16, %v8721_v24  ;;  %v2516_v17 = vmul.f32 %v2511_v20, %v8715_v0  ;;  %v2517_v36 = vmul.f32 %v7128_v54, %v8716_v10  ;;  %v8805_v24 = vld [vmem:[#allocation14_spill] sm:$0xff] }
 0x3df   :  { %4653 = vrot.lane.b32.xlu1 %v4652_v45, %s5051_s25  ;;  %v4657_v11 = vpack.i.bf16 %v2547_v40, %v2546_v13  ;;  %v7181_v27 = vsel %vm57_vm1, %v2420_v44, %v2421_v25  ;;  %v2532_v26 = vmul.f32 %v7156_v38, %v8719_v46  ;;  %v2349_v56 = vadd.f32 %v3970_v4, %v7107_v7  ;;  %v8811_v45 = vld [vmem:[#allocation23_spill] sm:$0xff] }
 0x3e0   :  { %v7170_v53 = vpop.f32.mrf.mxu1  ;;  %3888 = vmatprep.mubr.msk.bf16.mxu0 %vm3058_vm12, %v3177_v21  ;;  %v4662_v63 = vpack.i.bf16 %v2563_v22, %v2562_v37  ;;  %v4667_v0 = vpack.i.bf16 %v2517_v36, %v2516_v17  ;;  %v2533_v8 = vmul.f32 %v7181_v27, %v8805_v24  ;;  %v2471_v28 = vmul.f32 %v2388_v55, %v8806_v58  ;;  %v8813_v40 = vld [vmem:[#allocation19_spill] sm:$0xff]  ;;  %v8814_v21 = vld [vmem:[#allocation49_spill] sm:$0xff] }
 0x3e1   :  { %4658 = vrot.lane.b32.xlu0 %v4657_v11, %s5048_s22  ;;  %v2422_v10 = vrot.slane %v2388_v55, 7  ;;  %v2341_v62 = vadd.f32 %v2340_v60, %v7107_v7  ;;  %v2581_v9 = vmul.f32 %v2388_v55, %v8808_v41  ;;  %v2486_v15 = vrot.slane %v2388_v55, 1  ;;  %v8810_v60 = vld [vmem:[#allocation22_spill] sm:$0xff]  ;;  %v8815_v11 = vld [vmem:[#allocation48_spill] sm:$0xff]  ;;  %v8816_v17 = vld [vmem:[#allocation31_spill] sm:$0xff] }
 0x3e2   :  { %v7185_v34 = vpop.f32.mrf.mxu1  ;;  %v4672_v46 = vpack.i.bf16 %v2533_v8, %v2532_v26  ;;  %v7200_v57 = vmax.f32 %v2349_v56, 0.0  ;;  %v4682_v50 = vpack.i.bf16 %v2471_v28, %v2470_v39  ;;  %v2580_v5 = vmul.f32 %v7112_v33, %v8809_v23  ;;  %v8818_v8 = vld [vmem:[#allocation36_spill] sm:$0xff] }
 0x3e3   :  { %4663 = vrot.lane.b32.xlu1 %v4662_v63, %s5047_s21  ;;  %v2389_v1 = vmax.f32 %v2341_v62, 0.0  ;;  %v7209_v4 = vsel %vm57_vm1, %v2421_v25, %v2422_v10  ;;  %v2390_v61 = vmax.f32 %v2346_v52, 0.0  ;;  %v7216_v42 = vsel %vm202_vm0, %v2485_v2, %v2486_v15  ;;  %v8819_v52 = vld [vmem:[#allocation37_spill] sm:$0xff] }
 0x3e4   :  { %v7198_v35 = vpop.f32.mrf.mxu1  ;;  %v4677_v32 = vpack.i.bf16 %v2581_v9, %v2580_v5  ;;  %v2565_v19 = vmul.f32 %v7209_v4, %v8810_v60  ;;  %v2564_v33 = vmul.f32 %v7181_v27, %v8811_v45  ;;  %v2549_v2 = vmul.f32 %v7216_v42, %v8812_v29  ;;  %v8821_v5 = vld [vmem:[#allocation33_spill] sm:$0xff]  ;;  %v8825_v45 = vld [vmem:[#allocation44_spill] sm:$0xff] }
 0x3e5   :  { %4668 = vrot.lane.b32.xlu0 %v4667_v0, %s5050_s24  ;;  %v4687_v44 = vpack.i.bf16 %v7200_v57, %v2390_v61  ;;  %v2423_v20 = vrot.slane %v2389_v1, 7  ;;  %v4692_v59 = vpack.i.bf16 %v2389_v1, %v2388_v55  ;;  %v2487_v14 = vrot.slane %v2389_v1, 1  ;;  %v8817_v0 = vld [vmem:[#allocation30_spill] sm:$0xff] }
 0x3e6   :  { %v4702_v43 = vpack.i.bf16 %v2565_v19, %v2564_v33  ;;  %v2548_v25 = vmul.f32 %v7128_v54, %v8813_v40  ;;  %v2582_v13 = vmul.f32 %v2389_v1, %v8814_v21  ;;  %v2583_v37 = vmul.f32 %v2390_v61, %v8815_v11  ;;  %v8827_v11 = vld [vmem:[#allocation34_spill] sm:$0xff] }
 0x3e7   :  { %4673 = vrot.lane.b32.xlu1 %v4672_v46, %s5049_s23  ;;  %v7235_v22 = vsel %vm57_vm1, %v2422_v10, %v2423_v20  ;;  %v2472_v63 = vmul.f32 %v2389_v1, %v8816_v17  ;;  %v2488_v36 = vrot.slane %v2390_v61, 1  ;;  %v7243_v56 = vsel %vm202_vm0, %v2486_v15, %v2487_v14  ;;  %v8828_v17 = vld [vmem:[#allocation39_spill] sm:$0xff] }
 0x3e8   :  { %v4697_v55 = vpack.i.bf16 %v2549_v2, %v2548_v25  ;;  %v4707_v54 = vpack.i.bf16 %v2583_v37, %v2582_v13  ;;  %v2473_v24 = vmul.f32 %v2390_v61, %v8817_v0  ;;  %v2535_v58 = vmul.f32 %v7235_v22, %v8818_v8 }
 0x3e9   :  { %4683 = vrot.lane.b32.xlu0 %v4682_v50, %s5051_s25  ;;  %v2424_v28 = vrot.slane %v2390_v61, 7  ;;  %v7251_v10 = vsel %vm202_vm0, %v2487_v14, %v2488_v36  ;;  %v2534_v46 = vmul.f32 %v7209_v4, %v8819_v52  ;;  %v2519_v39 = vmul.f32 %v7243_v56, %v8820_v30  ;;  %v8822_v61 = vld [vmem:[#allocation41_spill] sm:$0xff]  ;;  %v8831_v52 = vld [vmem:[#allocation7_spill] sm:$0xff] }
 0x3ea   :  { %v7205_v47 = vpop.f32.mrf.mxu1  ;;  %v4712_v62 = vpack.i.bf16 %v2473_v24, %v2472_v63  ;;  %v2489_v41 = vrot.slane %v7200_v57, 1  ;;  %v2354_v9 = vadd.f32 %v7170_v53, %v7107_v7  ;;  %v2518_v1 = vmul.f32 %v7216_v42, %v8821_v5  ;;  %v8830_v24 = vld [vmem:[#allocation6_spill] sm:$0xff]  ;;  %v8832_v30 = vld [vmem:[#allocation9_spill] sm:$0xff] }
 0x3eb   :  { %4678 = vrot.lane.b32.xlu1 %v4677_v32, %s5046_s16  ;;  %v7265_v50 = vsel %vm57_vm1, %v2423_v20, %v2424_v28  ;;  %v4722_v23 = vpack.i.bf16 %v2535_v58, %v2534_v46  ;;  %v2550_v32 = vmul.f32 %v7243_v56, %v8822_v61  ;;  %v2425_v53 = vrot.slane %v7200_v57, 7 }
 0x3ec   :  { %v7219_v49 = vpop.f32.mrf.mxu1  ;;  %v4717_v19 = vpack.i.bf16 %v2519_v39, %v2518_v1  ;;  %v2567_v33 = vmul.f32 %v7265_v50, %v8825_v45  ;;  %v7280_v29 = vmax.f32 %v2354_v9, 0.0  ;;  %v7285_v14 = vsel %vm202_vm0, %v2488_v36, %v2489_v41  ;;  %v8833_v1 = vld [vmem:[#allocation8_spill] sm:$0xff] }
 0x3ed   :  { %4688 = vrot.lane.b32.xlu0 %v4687_v44, %s5059_s30  ;;  %v8823_v44 = vld [vmem:[#allocation40_spill] sm:$0xff]  ;;  %v7293_v21 = vsel %vm57_vm1, %v2424_v28, %v2425_v53  ;;  %v2357_v13 = vadd.f32 %v7198_v35, %v7107_v7  ;;  %v2521_v37 = vmul.f32 %v7285_v14, %v8827_v11  ;;  %v2536_v63 = vmul.f32 %v7265_v50, %v8828_v17 }
 0x3ee   :  { %v3978_v48 = vpop.f32.mrf.mxu1  ;;  %v2551_v60 = vmul.f32 %v7251_v10, %v8823_v44  ;;  %v2490_v36 = vrot.slane %v7280_v29, 1  ;;  %v2426_v58 = vrot.slane %v7280_v29, 7  ;;  %v2467_v46 = vmul.f32 %v7116_v18, %v8831_v52 }
 0x3ef   :  { %4693 = vrot.lane.b32.xlu1 %v4692_v59, %s5059_s30  ;;  %v2381_v26 = vadd.f32 %v3978_v48, %v7107_v7  ;;  %v8824_v59 = vld [vmem:[#allocation45_spill] sm:$0xff]  ;;  %v2515_v61 = vmul.f32 %v7151_v12, %v8833_v1  ;;  %v2378_v17 = vadd.f32 %v7205_v47, %v7107_v7 }
 0x3f0   :  { %v2566_v20 = vmul.f32 %v7235_v22, %v8824_v59  ;;  %v4727_v48 = vpack.i.bf16 %v2551_v60, %v2550_v32  ;;  %v7334_v9 = vsel %vm202_vm0, %v2489_v41, %v2490_v36  ;;  %v8834_v32 = vld [vmem:[#allocation13_spill] sm:$0xff]  ;;  %v2365_v60 = vadd.f32 %v7185_v34, %v7107_v7 }
 0x3f1   :  { %4703 = vrot.lane.b32.xlu0 %v4702_v43, %s5047_s21  ;;  %v7261_v15 = vmax.f32 %v2381_v26, 0.0  ;;  %v8826_v43 = vld [vmem:[#allocation35_spill] sm:$0xff]  ;;  %v2370_v41 = vadd.f32 %v7219_v49, %v7107_v7 }
 0x3f2   :  { %v2520_v40 = vmul.f32 %v7251_v10, %v8826_v43 }
 0x3f3   :  { %4698 = vrot.lane.b32.xlu1 %v4697_v55, %s5048_s22  ;;  %v2497_v2 = vrot.slane %v7261_v15, 1  ;;  %v2433_v25 = vrot.slane %v7261_v15, 7  ;;  %v4732_v55 = vpack.i.bf16 %v2567_v33, %v2566_v20  ;;  %v2466_v8 = vmul.f32 %v7261_v15, %v8830_v24  ;;  %v8835_v20 = vld [vmem:[#allocation12_spill] sm:$0xff]  ;;  %v8836_v33 = vld [vmem:[#allocation42_spill] sm:$0xff] }
 0x3f4   :  { %v4737_v35 = vpack.i.bf16 %v2521_v37, %v2520_v40  ;;  %v2531_v45 = vmul.f32 %v7166_v16, %v8835_v20  ;;  %v8837_v40 = vld [vmem:[#allocation43_spill] sm:$0xff]  ;;  %v7366_v37 = vmax.f32 %v2365_v60, 0.0  ;;  %v8840_v24 = vld [vmem:[#allocation50_spill] sm:$0xff]  ;;  %v8846_v20 = vld [vmem:[#allocation60_spill] sm:$0xff] }
 0x3f5   :  { %4708 = vrot.lane.b32.xlu0 %v4707_v54, %s5046_s16  ;;  %v7309_v26 = vsel %vm202_vm0, %v2497_v2, %v2482_v3  ;;  %v8829_v54 = vld [vmem:[#allocation38_spill] sm:$0xff]  ;;  %v7323_v28 = vsel %vm57_vm1, %v2433_v25, %v2418_v31  ;;  %v7325_v3 = vmax.f32 %v2357_v13, 0.0  ;;  %v2372_v31 = vpop.f32.mrf.mxu1  ;;  %v4747_v5 = vpack.i.bf16 %v2467_v46, %v2466_v8 }
 0x3f6   :  { %v2537_v0 = vmul.f32 %v7293_v21, %v8829_v54  ;;  %v2514_v39 = vmul.f32 %v7309_v26, %v8832_v30  ;;  %v2530_v44 = vmul.f32 %v7323_v28, %v8834_v32  ;;  %v2373_v43 = vadd.f32 %v2372_v31, %v7107_v7  ;;  %v8839_v54 = vld [vmem:[#allocation47_spill] sm:$0xff]  ;;  %v8844_v32 = vld [vmem:[#allocation56_spill] sm:$0xff] }
 0x3f7   :  { %4713 = vrot.lane.b32.xlu1 %v4712_v62, %s5051_s25  ;;  %v2427_v34 = vrot.slane %v7325_v3, 7  ;;  %v2552_v13 = vmul.f32 %v7285_v14, %v8837_v40  ;;  %v2585_v8 = vmul.f32 %v7280_v29, %v8840_v24  ;;  %v8848_v40 = vld [vmem:[#allocation99_spill] sm:$0xff] }
 0x3f8   :  { %v4742_v62 = vpack.i.bf16 %v2537_v0, %v2536_v63  ;;  %v4752_v59 = vpack.i.bf16 %v2515_v61, %v2514_v39  ;;  %v7370_v63 = vmax.f32 %v2370_v41, 0.0  ;;  %v2568_v0 = vmul.f32 %v7293_v21, %v8839_v54  ;;  %v8845_v41 = vld [vmem:[#allocation53_spill] sm:$0xff] }
 0x3f9   :  { %4723 = vrot.lane.b32.xlu0 %v4722_v23, %s5049_s23  ;;  %v2362_v23 = vadd.f32 %v7142_v6, %v7107_v7  ;;  %v2491_v6 = vrot.slane %v7325_v3, 1  ;;  %v7379_v52 = vmax.f32 %v2373_v43, 0.0  ;;  %v7383_v46 = vsel %vm57_vm1, %v2426_v58, %v2427_v34  ;;  %v8841_v7 = vld [vmem:[#allocation98_spill] sm:$0xff] }
 0x3fa   :  { %v7387_v47 = vmul.f32 %v7116_v18, %v8841_v7  ;;  %v7397_v61 = vmax.f32 %v2378_v17, 0.0 }
 0x3fb   :  { %4718 = vrot.lane.b32.xlu1 %v4717_v19, %s5050_s24  ;;  %v7349_v19 = vsel %vm57_vm1, %v2425_v53, %v2426_v58  ;;  %v7359_v49 = vmax.f32 %v2362_v23, 0.0  ;;  %v4762_v53 = vpack.i.bf16 %v2531_v45, %v2530_v44  ;;  %v8842_v23 = vld [vmem:[#allocation51_spill] sm:$0xff]  ;;  %v2493_v58 = vrot.slane %v7366_v37, 1 }
 0x3fc   :  { %v2584_v31 = vmul.f32 %v7200_v57, %v8842_v23  ;;  %v2494_v44 = vrot.slane %v7370_v63, 1  ;;  %v2539_v45 = vmul.f32 %v7383_v46, %v8846_v20  ;;  %v2496_v7 = vrot.slane %v7397_v61, 1  ;;  %v8851_v23 = vld [vmem:[#allocation64_spill] sm:$0xff] }
 0x3fd   :  { %4728 = vrot.lane.b32.xlu0 %v4727_v48, %s5048_s22  ;;  %v2553_v48 = vmul.f32 %v7334_v9, %v8836_v33  ;;  %v2428_v30 = vrot.slane %v7359_v49, 7  ;;  %v2492_v1 = vrot.slane %v7359_v49, 1  ;;  %v2495_v33 = vrot.slane %v7379_v52, 1 }
 0x3fe   :  { %v4772_v60 = vpack.i.bf16 %v2585_v8, %v2584_v31  ;;  %v8852_v31 = vld [vmem:[#allocation69_spill] sm:$0xff] }
 0x3ff   :  { %4733 = vrot.lane.b32.xlu1 %v4732_v55, %s5047_s21  ;;  %v8838_v55 = vld [vmem:[#allocation46_spill] sm:$0xff] }
 0x400   :  { %v2569_v11 = vmul.f32 %v7349_v19, %v8838_v55 }
 0x401   :  { %4738 = vrot.lane.b32.xlu0 %v4737_v35, %s5050_s24  ;;  %v4757_v35 = vpack.i.bf16 %v2553_v48, %v2552_v13  ;;  %v8847_v48 = vld [vmem:[#allocation57_spill] sm:$0xff]  ;;  %v7415_v13 = vmul.f32 %v7261_v15, %v8848_v40 }
 0x402   :  { %v4767_v39 = vpack.i.bf16 %v2569_v11, %v2568_v0  ;;  %v2522_v43 = vmul.f32 %v7334_v9, %v8847_v48  ;;  %v8849_v11 = vld [vmem:[#allocation61_spill] sm:$0xff] }
 0x403   :  { %4743 = vrot.lane.b32.xlu1 %v4742_v62, %s5049_s23  ;;  %v2504_v62 = vsel %vm202_vm0, %v2490_v36, %v2491_v6  ;;  %v2538_v17 = vmul.f32 %v7349_v19, %v8849_v11  ;;  %v8850_v0 = vld [vmem:[#allocation65_spill] sm:$0xff]  ;;  %v4912_v8 = vpack.i.bf16 %v7387_v47, %v7415_v13  ;;  %v5001_v11 = vld [vmem:[%s8424_s1 + $0x98] sm:$0xff]  ;;  %v5008_v47 = vld [vmem:[%s8424_s1 + $0x30] sm:$0xff] }
 0x404   :  { %v2523_v18 = vmul.f32 %v2504_v62, %v8844_v32  ;;  %v2554_v24 = vmul.f32 %v2504_v62, %v8850_v0  ;;  %v2453_v13 = vmul.f32 %v5008_v47, %v7156_v38 }
 0x405   :  { %4748 = vrot.lane.b32.xlu0 %v4747_v5, %s5051_s25  ;;  %v8843_v5 = vld [vmem:[#allocation52_spill] sm:$0xff] }
 0x406   :  { %v2475_v36 = vmul.f32 %v7280_v29, %v8843_v5  ;;  %v4782_v54 = vpack.i.bf16 %v2523_v18, %v2522_v43  ;;  %v7440_v5 = vmul.f32 %v7383_v46, %v8852_v31  ;;  %v7447_v18 = vsel %vm202_vm0, %v2492_v1, %v2493_v58 }
 0x407   :  { %4753 = vrot.lane.b32.xlu1 %v4752_v59, %s5050_s24  ;;  %v2474_v59 = vmul.f32 %v7200_v57, %v8845_v41  ;;  %v4925_v57 = vld [vmem:[%s8425_s2 + $0x78] sm:$0xff]   ;;  %v7455_v41 = vsel %vm202_vm0, %v2494_v44, %v2495_v33  ;;  %v7482_v43 = vsel %vm202_vm0, %v2495_v33, %v2496_v7  ;;  %v2429_v31 = vrot.slane %v7366_v37, 7 }
 0x409   :  { %4763 = vrot.lane.b32.xlu0 %v4762_v53, %s5049_s23  ;;  %v7411_v53 = vsel %vm202_vm0, %v2491_v6, %v2492_v1  ;;  %v4777_v55 = vpack.i.bf16 %v2475_v36, %v2474_v59  ;;  %v7429_v6 = vsel %vm57_vm1, %v2427_v34, %v2428_v30  ;;  %v8608_v34 = vmov 0   ;;  %v8853_v36 = vld [vmem:[#allocation68_spill] sm:$0xff]  ;;  %v4926_v59 = vld [vmem:[%s8425_s2 + $0x70] sm:$0xff]   ;;  %v4994_v1 = vld [vmem:[%s8424_s1 + $0x28] sm:$0xff] }
 0x40a   :  { %3271 = vmatprep.subr.bf16.mxu0 %v8608_v34  ;;  %v2571_v32 = vmul.f32 %v7429_v6, %v8853_v36  ;;  %3705 = vmatprep.mubr.bf16.mxu1 %v8608_v34 }
 0x40b   :  { %4758 = vrot.lane.b32.xlu1 %v4757_v35, %s5048_s22  ;;  %v4792_v35 = vpack.i.bf16 %v7325_v3, %v7280_v29  ;;  %v2555_v29 = vmul.f32 %v7411_v53, %v8851_v23  ;;  %3272 = vmatpush1.bf16.msra.mxu0 %v4925_v57  ;;  %v4999_v57 = vld [vmem:[%s8424_s1 + $0x78] sm:$0xff] }
 0x40c   :  { %3273 = vmatprep.subr.bf16.mxu0 %v8608_v34 }
 0x40d   :  { %4768 = vrot.lane.b32.xlu0 %v4767_v39, %s5047_s21  ;;  %v4787_v39 = vpack.i.bf16 %v2539_v45, %v2538_v17  ;;  %v4996_v45 = vld [vmem:[%s8424_s1 + $0x48] sm:$0xff]  ;;  %v7521_v17 = vmul.f32 %v5001_v11, %v7447_v18  ;;  %v4797_v36 = vpack.i.bf16 %v2555_v29, %v2554_v24  ;;  %v8856_v11 = vld [vmem:[#allocation55_spill] sm:$0xff] }
 0x40e   :  { %v7478_v48 = vmul.f32 %v4996_v45, %v7251_v10  ;;  %v4998_v10 = vld [vmem:[%s8424_s1 + $0x68] sm:$0xff] }
 0x40f   :  { %4773 = vrot.lane.b32.xlu1 %v4772_v60, %s5046_s16  ;;  %v7451_v60 = vsel %vm202_vm0, %v2493_v58, %v2494_v44  ;;  %v7466_v58 = vmul.f32 %v4994_v1, %v7216_v42  ;;  %v4995_v44 = vld [vmem:[%s8424_s1 + $0x38] sm:$0xff]  ;;  %v7488_v42 = vsel %vm202_vm0, %v2496_v7, %v2497_v2  ;;  %v7500_v33 = vmul.f32 %v4998_v10, %v7334_v9  ;;  %v5004_v29 = vld [vmem:[%s8424_s1 + $0xc8] sm:$0xff] }
 0x410   :  { %v7472_v20 = vmul.f32 %v4995_v44, %v7243_v56  ;;  %v4997_v56 = vld [vmem:[%s8424_s1 + $0x58] sm:$0xff]  ;;  %3274 = vmatpush1.bf16.msra.mxu0 %v4926_v59  ;;  %v5002_v44 = vld [vmem:[%s8424_s1 + $0xa8] sm:$0xff]  ;;  %vm3142_vm0 = vcmask 785408  }
 0x411   :  { %4778 = vrot.lane.b32.xlu0 %v4777_v55, %s5051_s25  ;;  %v7494_v40 = vmul.f32 %v4997_v56, %v7285_v14  ;;  %v7509_v14 = vmul.f32 %v4999_v57, %v2504_v62  ;;  %v5000_v55 = vld [vmem:[%s8424_s1 + $0x88] sm:$0xff]  ;;  %v8855_v7 = vld [vmem:[#allocation72_spill] sm:$0xff]  ;;  %3275 = vmatprep.subr.bf16.mxu0 %v8608_v34  ;;  %v7543_v45 = vmul.f32 %v5002_v44, %v7451_v60 }
 0x412   :  { %v3179_v2 = vpack.c.bf16 %v7472_v20, %v7466_v58  ;;  %v7515_v9 = vmul.f32 %v5000_v55, %v7411_v53  ;;  %v2587_v62 = vmul.f32 %v7359_v49, %v8855_v7  ;;  %v7555_v56 = vmul.f32 %v5004_v29, %v7482_v43  ;;  %v5005_v10 = vld [vmem:[%s8424_s1 + $0xd8] sm:$0xff]  ;;  %v5006_v7 = vld [vmem:[%s8424_s1 + $0xe8] sm:$0xff] }
 0x413   :  { %4783 = vrot.lane.b32.xlu1 %v4782_v54, %s5050_s24  ;;  %v8854_v54 = vld [vmem:[#allocation73_spill] sm:$0xff]  ;;  %v3181_v23 = vpack.c.bf16 %v7494_v40, %v7478_v48  ;;  %v3183_v1 = vpack.c.bf16 %v7509_v14, %v7500_v33  ;;  %v7561_v57 = vmul.f32 %v5005_v10, %v7488_v42  ;;  %v4802_v55 = vpack.i.bf16 %v2571_v32, %v7440_v5  ;;  %v8861_v32 = vld [vmem:[#allocation62_spill] sm:$0xff] }
 0x414   :  { %v2586_v0 = vmul.f32 %v7325_v3, %v8854_v54  ;;  %v3185_v59 = vpack.c.bf16 %v7521_v17, %v7515_v9  ;;  %v2476_v54 = vmul.f32 %v7325_v3, %v8856_v11  ;;  %v7571_v44 = vmul.f32 %v5006_v7, %v7309_v26  ;;  %v4928_v3 = vld [vmem:[%s8425_s2 + $0x60] sm:$0xff]   ;;  %v8858_v7 = vld [vmem:[#allocation59_spill] sm:$0xff] }
 0x415   :  { %4788 = vrot.lane.b32.xlu0 %v4787_v39, %s5049_s23  ;;  %v4927_v39 = vld [vmem:[%s8425_s2 + $0x68] sm:$0xff]   ;;  %v5020_v17 = vld [vmem:[%s8424_s1 + $0xc0] sm:$0xff] }
 0x416   :  { %3276 = vmatpush1.bf16.msra.mxu0 %v4927_v39  ;;  %v4807_v11 = vpack.i.bf16 %v2587_v62, %v2586_v0  ;;  %v8859_v0 = vld [vmem:[#allocation58_spill] sm:$0xff]  ;;  %v4929_v39 = vld [vmem:[%s8425_s2 + $0x58] sm:$0xff]  }
 0x417   :  { %4793 = vrot.lane.b32.xlu1 %v4792_v35, %s5059_s30  ;;  %v5003_v35 = vld [vmem:[%s8424_s1 + $0xb8] sm:$0xff]  ;;  %3277 = vmatprep.subr.bf16.mxu0 %v8608_v34  ;;  %v2525_v62 = vmul.f32 %v7447_v18, %v8859_v0  ;;  %v8864_v0 = vld [vmem:[#allocation70_spill] sm:$0xff] }
 0x418   :  { %v7549_v24 = vmul.f32 %v5003_v35, %v7455_v41  ;;  %v5007_v35 = vld [vmem:[%s8424_s1 + $0xf8] sm:$0xff] }
 0x419   :  { %4798 = vrot.lane.b32.xlu0 %v4797_v36, %s5048_s22  ;;  %v7577_v29 = vmul.f32 %v5007_v35, %v7151_v12  ;;  %v8857_v36 = vld [vmem:[#allocation54_spill] sm:$0xff]  ;;  %v2524_v12 = vmul.f32 %v7411_v53, %v8858_v7  ;;  %v2430_v35 = vrot.slane %v7370_v63, 7  ;;  %v8860_v53 = vld [vmem:[#allocation63_spill] sm:$0xff] }
 0x41a   :  { %v2477_v5 = vmul.f32 %v7359_v49, %v8857_v36  ;;  %v7599_v36 = vsel %vm57_vm1, %v2428_v30, %v2429_v31  ;;  %v2540_v7 = vmul.f32 %v7429_v6, %v8860_v53  ;;  %3278 = vmatpush1.bf16.msra.mxu0 %v4928_v3  ;;  %v8862_v3 = vld [vmem:[#allocation66_spill] sm:$0xff] }
 0x41b   :  { %4803 = vrot.lane.b32.xlu1 %v4802_v55, %s5047_s21  ;;  %v4817_v10 = vpack.i.bf16 %v2525_v62, %v2524_v12  ;;  %v2541_v30 = vmul.f32 %v7599_v36, %v8861_v32  ;;  %3279 = vmatprep.subr.bf16.mxu0 %v8608_v34  ;;  %v4930_v12 = vld [vmem:[%s8425_s2 + $0x50] sm:$0xff]   ;;  %v4827_v32 = vpack.i.bf16 %v7366_v37, %v7359_v49  ;;  %v4931_v49 = vld [vmem:[%s8425_s2 + $0x48] sm:$0xff]  }
 0x41c   :  { %v4812_v55 = vpack.i.bf16 %v2477_v5, %v2476_v54  ;;  %v7615_v54 = vsel %vm57_vm1, %v2429_v31, %v2430_v35  ;;  %v8865_v62 = vld [vmem:[#allocation71_spill] sm:$0xff] }
 0x41d   :  { %4808 = vrot.lane.b32.xlu0 %v4807_v11, %s5046_s16  ;;  %v4822_v5 = vpack.i.bf16 %v2541_v30, %v2540_v7  ;;  %v2557_v11 = vmul.f32 %v7451_v60, %v8862_v3  ;;  %v2572_v53 = vmul.f32 %v7599_v36, %v8865_v62  ;;  %v8866_v7 = vld [vmem:[#allocation74_spill] sm:$0xff]  ;;  %v8870_v62 = vld [vmem:[#allocation97_spill] sm:$0xff] }
 0x41e   :  { %3280 = vmatpush1.bf16.msra.mxu0 %v4929_v39  ;;  %v2589_v30 = vmul.f32 %v7370_v63, %v8866_v7 }
 0x41f   :  { %4813 = vrot.lane.b32.xlu1 %v4812_v55, %s5051_s25  ;;  %v8863_v55 = vld [vmem:[#allocation67_spill] sm:$0xff]  ;;  %3281 = vmatprep.subr.bf16.mxu0 %v8608_v34 }
 0x420   :  { %v2556_v31 = vmul.f32 %v7447_v18, %v8863_v55  ;;  %v8868_v55 = vld [vmem:[#allocation76_spill] sm:$0xff] }
 0x421   :  { %4818 = vrot.lane.b32.xlu0 %v4817_v10, %s5050_s24  ;;  %v2573_v10 = vmul.f32 %v7615_v54, %v8864_v0 }
 0x422   :  { %v4832_v39 = vpack.i.bf16 %v2557_v11, %v2556_v31  ;;  %3282 = vmatpush1.bf16.msra.mxu0 %v4930_v12  ;;  %v2479_v11 = vmul.f32 %v7370_v63, %v8868_v55  ;;  %v8869_v31 = vld [vmem:[#allocation77_spill] sm:$0xff]  ;;  %v8873_v55 = vld [vmem:[#allocation78_spill] sm:$0xff] }
 0x423   :  { %4823 = vrot.lane.b32.xlu1 %v4822_v5, %s5049_s23  ;;  %v4837_v18 = vpack.i.bf16 %v2573_v10, %v2572_v53  ;;  %v8867_v5 = vld [vmem:[#allocation75_spill] sm:$0xff]  ;;  %3283 = vmatprep.subr.bf16.mxu0 %v8608_v34  ;;  %v2478_v0 = vmul.f32 %v7366_v37, %v8869_v31  ;;  %v4932_v10 = vld [vmem:[%s8425_s2 + $0x40] sm:$0xff]   ;;  %v2590_v53 = vmul.f32 %v7379_v52, %v8870_v62  ;;  %v2432_v31 = vrot.slane %v7397_v61, 7 }
 0x424   :  { %v2588_v3 = vmul.f32 %v7366_v37, %v8867_v5  ;;  %v4852_v37 = vpack.i.bf16 %v7379_v52, %v7370_v63 }
 0x425   :  { %4828 = vrot.lane.b32.xlu0 %v4827_v32, %s5059_s30  ;;  %v2431_v32 = vrot.slane %v7379_v52, 7 }
 0x426   :  { %v4842_v12 = vpack.i.bf16 %v2589_v30, %v2588_v3  ;;  %3284 = vmatpush1.bf16.msra.mxu0 %v4931_v49  ;;  %v8871_v30 = vld [vmem:[#allocation96_spill] sm:$0xff] }
 0x427   :  { %4833 = vrot.lane.b32.xlu1 %v4832_v39, %s5048_s22  ;;  %v4847_v39 = vpack.i.bf16 %v2479_v11, %v2478_v0  ;;  %3285 = vmatprep.subr.bf16.mxu0 %v8608_v34  ;;  %v7658_v7 = vsel %vm57_vm1, %v2430_v35, %v2431_v32  ;;  %v2591_v49 = vmul.f32 %v7397_v61, %v8871_v30  ;;  %v4933_v3 = vld [vmem:[%s8425_s2 + $0x80] sm:$0xff]  }
 0x428   :  { %v2481_v11 = vmul.f32 %v7397_v61, %v8873_v55  ;;  %v8875_v0 = vld [vmem:[#allocation85_spill] sm:$0xff] }
 0x429   :  { %4838 = vrot.lane.b32.xlu0 %v4837_v18, %s5047_s21  ;;  %v8872_v18 = vld [vmem:[#allocation79_spill] sm:$0xff]  ;;  %v4857_v35 = vpack.i.bf16 %v2591_v49, %v2590_v53  ;;  %v7684_v53 = vsel %vm57_vm1, %v2431_v32, %v2432_v31  ;;  %v8877_v30 = vld [vmem:[#allocation81_spill] sm:$0xff] }
 0x42a   :  { %v2480_v5 = vmul.f32 %v7379_v52, %v8872_v18  ;;  %3286 = vmatpush1.bf16.msra.mxu0 %v4932_v10  ;;  %v2542_v10 = vmul.f32 %v7615_v54, %v8875_v0  ;;  %v2526_v49 = vmul.f32 %v7451_v60, %v8877_v30  ;;  %v8878_v18 = vld [vmem:[#allocation89_spill] sm:$0xff]  ;;  %v8881_v0 = vld [vmem:[#allocation92_spill] sm:$0xff] }
 0x42b   :  { %4843 = vrot.lane.b32.xlu1 %v4842_v12, %s5046_s16  ;;  %v8874_v12 = vld [vmem:[#allocation84_spill] sm:$0xff]  ;;  %3301 = vmatprep.subr.bf16.mxu0 %v8608_v34 }
 0x42c   :  { %v2543_v63 = vmul.f32 %v7658_v7, %v8874_v12  ;;  %v4862_v52 = vpack.i.bf16 %v2481_v11, %v2480_v5  ;;  %v2558_v5 = vmul.f32 %v7455_v41, %v8878_v18  ;;  %v8880_v12 = vld [vmem:[#allocation93_spill] sm:$0xff] }
 0x42d   :  { %4848 = vrot.lane.b32.xlu0 %v4847_v39, %s5051_s25  ;;  %v8876_v39 = vld [vmem:[#allocation80_spill] sm:$0xff]  ;;  %v2574_v32 = vmul.f32 %v7658_v7, %v8880_v12 }
 0x42e   :  { %v2527_v62 = vmul.f32 %v7455_v41, %v8876_v39  ;;  %3302 = vmatpush2.bf16.msra.mxu0 %v4933_v3  ;;  %v2575_v3 = vmul.f32 %v7684_v53, %v8881_v0 }
 0x42f   :  { %4853 = vrot.lane.b32.xlu1 %v4852_v37, %s5059_s30  ;;  %v4872_v37 = vpack.i.bf16 %v2543_v63, %v2542_v10  ;;  %v8883_v10 = vld [vmem:[#allocation90_spill] sm:$0xff] }
 0x430   :  { %v4867_v11 = vpack.i.bf16 %v2527_v62, %v2526_v49  ;;  %v4887_v60 = vpack.i.bf16 %v2575_v3, %v2574_v32  ;;  %v2561_v39 = vmul.f32 %v7309_v26, %v8883_v10  ;;  %v4882_v62 = vpack.i.bf16 %v7261_v15, %v7397_v61  ;;  %v8888_v15 = vld [vmem:[#allocation95_spill] sm:$0xff] }
 0x431   :  { %4858 = vrot.lane.b32.xlu0 %v4857_v35, %s5046_s16  ;;  %v8879_v35 = vld [vmem:[#allocation88_spill] sm:$0xff]  ;;  %v7713_v49 = vsel %vm57_vm1, %v2432_v31, %v2433_v25  ;;  %v8889_v25 = vld [vmem:[#allocation94_spill] sm:$0xff]  ;;  %vm3159_vm1 = vcmask 916480  }
 0x432   :  { %v2559_v55 = vmul.f32 %v7482_v43, %v8879_v35  ;;  %v8886_v35 = vld [vmem:[#allocation87_spill] sm:$0xff]  ;;  %v2576_v51 = vmul.f32 %v7713_v49, %v8888_v15  ;;  %v2577_v31 = vmul.f32 %v7323_v28, %v8889_v25 }
 0x433   :  { %4863 = vrot.lane.b32.xlu1 %v4862_v52, %s5051_s25  ;;  %v8882_v52 = vld [vmem:[#allocation91_spill] sm:$0xff] }
 0x434   :  { %v4877_v63 = vpack.i.bf16 %v2559_v55, %v2558_v5  ;;  %v2560_v41 = vmul.f32 %v7488_v42, %v8882_v52  ;;  %v8885_v5 = vld [vmem:[#allocation82_spill] sm:$0xff]  ;;  %v2544_v55 = vmul.f32 %v7684_v53, %v8886_v35 }
 0x435   :  { %4873 = vrot.lane.b32.xlu0 %v4872_v37, %s5049_s23  ;;  %v8884_v37 = vld [vmem:[#allocation83_spill] sm:$0xff]  ;;  %v2529_v26 = vmul.f32 %v7488_v42, %v8885_v5  ;;  %v4902_v42 = vpack.i.bf16 %v2577_v31, %v2576_v51 }
 0x436   :  { %v2528_v30 = vmul.f32 %v7482_v43, %v8884_v37  ;;  %v4892_v18 = vpack.i.bf16 %v2561_v39, %v2560_v41 }
 0x437   :  { %4868 = vrot.lane.b32.xlu1 %v4867_v11, %s5050_s24  ;;  %v8887_v11 = vld [vmem:[#allocation86_spill] sm:$0xff] }
 0x438   :  { %v4897_v61 = vpack.i.bf16 %v2529_v26, %v2528_v30  ;;  %v2545_v43 = vmul.f32 %v7713_v49, %v8887_v11 }
 0x439   :  { %4878 = vrot.lane.b32.xlu0 %v4877_v63, %s5048_s22 }
 0x43a   :  { %v4907_v12 = vpack.i.bf16 %v2545_v43, %v2544_v55 }
 0x43b   :  { %4888 = vrot.lane.b32.xlu1 %v4887_v60, %s5047_s21 }
 0x43d   :  { %4883 = vrot.lane.b32.xlu0 %v4882_v62, %s5059_s30 }
 0x43f   :  { %4893 = vrot.lane.b32.xlu1 %v4892_v18, %s5048_s22 }
 0x441   :  { %4898 = vrot.lane.b32.xlu0 %v4897_v61, %s5050_s24 }
 0x443   :  { %4908 = vrot.lane.b32.xlu1 %v4907_v12, %s5049_s23 }
 0x445   :  { %4903 = vrot.lane.b32.xlu0 %v4902_v42, %s5047_s21 }
 0x447   :  { %4913 = vrot.lane.b32.xlu1 %v4912_v8, %s5046_s16  ;;  %v5009_v8 = vld [vmem:[%s8424_s1 + $0x20] sm:$0xff] }
 0x448   :  { %v2452_v26 = vmul.f32 %v5009_v8, %v7166_v16 }
 0x44b   :  { %v4639_v32 = vpop.permute.xlu0 %4638 }
 0x44c   :  { %v4641_v16 = vunpack.i.h.bf16 %v4639_v32  ;;  %v4640_v42 = vunpack.i.l.bf16 %v4639_v32 }
 0x44d   :  { %v7734_v0 = vpop.permute.xlu1 %4643 }
 0x44f   :  { %v7736_v3 = vpop.permute.xlu0 %4648 }
 0x451   :  { %v4654_v63 = vpop.permute.xlu1 %4653 }
 0x452   :  { %v4656_v62 = vunpack.i.h.bf16 %v4654_v63  ;;  %v4655_v37 = vunpack.i.l.bf16 %v4654_v63 }
 0x453   :  { %v7738_v60 = vpop.permute.xlu0 %4658 }
 0x454   :  { %v3062_v55 = vsel %vm3058_vm12, %v2453_v13, %v4656_v62  ;;  %v3061_v61 = vsel %vm3058_vm12, %v2452_v26, %v4655_v37 }
 0x455   :  { %v7740_v52 = vpop.permute.xlu1 %4663 }
 0x457   :  { %v4669_v41 = vpop.permute.xlu0 %4668 }
 0x458   :  { %v4671_v30 = vunpack.i.h.bf16 %v4669_v41  ;;  %v4670_v18 = vunpack.i.l.bf16 %v4669_v41 }
 0x459   :  { %v4674_v10 = vpop.permute.xlu1 %4673 }
 0x45a   :  { %v4676_v11 = vunpack.i.h.bf16 %v4674_v10  ;;  %v4675_v43 = vunpack.i.l.bf16 %v4674_v10  ;;  %v3079_v15 = vsel %vm3075_vm13, %v3062_v55, %v4671_v30  ;;  %v3078_v51 = vsel %vm3075_vm13, %v3061_v61, %v4670_v18 }
 0x45b   :  { %v4684_v39 = vpop.permute.xlu0 %4683 }
 0x45c   :  { %v3095_v31 = vsel %vm1202_vm10, %v3079_v15, %v4676_v11  ;;  %v3094_v12 = vsel %vm1202_vm10, %v3078_v51, %v4675_v43  ;;  %v4686_v43 = vunpack.i.h.bf16 %v4684_v39  ;;  %v4685_v15 = vunpack.i.l.bf16 %v4684_v39  ;;  %v5011_v39 = vld [vmem:[%s8424_s1 + $0x50] sm:$0xff] }
 0x45d   :  { %v4679_v5 = vpop.permute.xlu1 %4678  ;;  %v3111_v30 = vsel %vm3108_vm14, %v3094_v12, %v4640_v42  ;;  %v3112_v18 = vsel %vm3108_vm14, %v3095_v31, %v4641_v16  ;;  %v5010_v12 = vld [vmem:[%s8424_s1 + $0x40] sm:$0xff]  ;;  %v2455_v42 = vmul.f32 %v5011_v39, %v7209_v4 }
 0x45e   :  { %v4681_v13 = vunpack.i.h.bf16 %v4679_v5  ;;  %v4680_v8 = vunpack.i.l.bf16 %v4679_v5  ;;  %v2454_v16 = vmul.f32 %v5010_v12, %v7181_v27 }
 0x45f   :  { %v7750_v35 = vpop.permute.xlu0 %4688 }
 0x461   :  { %v4694_v38 = vpop.permute.xlu1 %4693 }
 0x462   :  { %v4696_v27 = vunpack.i.h.bf16 %v4694_v38 }
 0x463   :  { %v4704_v25 = vpop.permute.xlu0 %4703 }
 0x464   :  { %v4706_v10 = vunpack.i.h.bf16 %v4704_v25  ;;  %v4705_v37 = vunpack.i.l.bf16 %v4704_v25 }
 0x465   :  { %v4699_v63 = vpop.permute.xlu1 %4698 }
 0x466   :  { %v4701_v41 = vunpack.i.h.bf16 %v4699_v63  ;;  %v4700_v62 = vunpack.i.l.bf16 %v4699_v63  ;;  %v5012_v63 = vld [vmem:[%s8424_s1 + $0x70] sm:$0xff] }
 0x467   :  { %v4709_v47 = vpop.permute.xlu0 %4708 }
 0x468   :  { %v3128_v26 = vsel %vm3125_vm15, %v3111_v30, %v4700_v62  ;;  %v3129_v55 = vsel %vm3125_vm15, %v3112_v18, %v4701_v41  ;;  %v2457_v41 = vmul.f32 %v5012_v63, %v7265_v50  ;;  %v4711_v39 = vunpack.i.h.bf16 %v4709_v47 }
 0x469   :  { %v4714_v32 = vpop.permute.xlu1 %4713  ;;  %v3145_v61 = vsel %vm3142_vm0, %v3128_v26, %v4705_v37  ;;  %v3146_v11 = vsel %vm3142_vm0, %v3129_v55, %v4706_v10  ;;  %v3064_v10 = vsel %vm3058_vm12, %v2455_v42, %v4686_v43  ;;  %v3063_v37 = vsel %vm3058_vm12, %v2454_v16, %v4685_v15 }
 0x46a   :  { %v7765_v51 = vsel %vm3159_vm1, %v3145_v61, %v4680_v8  ;;  %v7768_v25 = vsel %vm3159_vm1, %v3146_v11, %v4681_v13  ;;  %v4695_v13 = vunpack.i.l.bf16 %v4694_v38  ;;  %v4716_v50 = vunpack.i.h.bf16 %v4714_v32 }
 0x46b   :  { %v4724_v31 = vpop.permute.xlu0 %4723  ;;  %v3178_v5 = vpack.c.bf16 %v7768_v25, %v7765_v51  ;;  %v4715_v34 = vunpack.i.l.bf16 %v4714_v32  ;;  %v5018_v51 = vld [vmem:[%s8424_s1 + $0xa0] sm:$0xff] }
 0x46c   :  { %v4726_v8 = vunpack.i.h.bf16 %v4724_v31  ;;  %v4725_v26 = vunpack.i.l.bf16 %v4724_v31  ;;  %v2460_v25 = vmul.f32 %v5018_v51, %v7383_v46 }
 0x46d   :  { %v4719_v62 = vpop.permute.xlu1 %4718 }
 0x46e   :  { %v4721_v30 = vunpack.i.h.bf16 %v4719_v62  ;;  %v4720_v18 = vunpack.i.l.bf16 %v4719_v62  ;;  %v4710_v62 = vunpack.i.l.bf16 %v4709_v47 }
 0x46f   :  { %v4729_v55 = vpop.permute.xlu0 %4728 }
 0x470   :  { %v3081_v4 = vsel %vm3075_vm13, %v3064_v10, %v4721_v30  ;;  %v3080_v61 = vsel %vm3075_vm13, %v3063_v37, %v4720_v18  ;;  %v4731_v11 = vunpack.i.h.bf16 %v4729_v55  ;;  %v4730_v12 = vunpack.i.l.bf16 %v4729_v55 }
 0x471   :  { %v3097_v63 = vsel %vm1202_vm10, %v3081_v4, %v4726_v8  ;;  %v3096_v43 = vsel %vm1202_vm10, %v3080_v61, %v4725_v26  ;;  %v4734_v15 = vpop.permute.xlu1 %4733  ;;  %v3066_v61 = vsel %vm3058_vm12, %v2457_v41, %v4716_v50 }
 0x472   :  { %v3113_v16 = vsel %vm3108_vm14, %v3096_v43, %v4695_v13  ;;  %v3114_v38 = vsel %vm3108_vm14, %v3097_v63, %v4696_v27  ;;  %v4736_v42 = vunpack.i.h.bf16 %v4734_v15  ;;  %v4735_v31 = vunpack.i.l.bf16 %v4734_v15  ;;  %v5013_v13 = vld [vmem:[%s8424_s1 + $0x60] sm:$0xff]  ;;  %v5015_v63 = vld [vmem:[%s8424_s1 + $0x10] sm:$0xff] }
 0x473   :  { %v3130_v10 = vsel %vm3125_vm15, %v3113_v16, %v4730_v12  ;;  %v3131_v37 = vsel %vm3125_vm15, %v3114_v38, %v4731_v11  ;;  %v4739_v30 = vpop.permute.xlu0 %4738  ;;  %v2456_v27 = vmul.f32 %v5013_v13, %v7235_v22  ;;  %v5014_v11 = vld [vmem:[%s8424_s1] sm:$0xff]  ;;  %v2451_v22 = vmul.f32 %v5015_v63, %v7323_v28 }
 0x474   :  { %v3147_v18 = vsel %vm3142_vm0, %v3130_v10, %v4735_v31  ;;  %v3148_v8 = vsel %vm3142_vm0, %v3131_v37, %v4736_v42  ;;  %v4741_v55 = vunpack.i.h.bf16 %v4739_v30  ;;  %v4740_v26 = vunpack.i.l.bf16 %v4739_v30  ;;  %v5016_v43 = vld [vmem:[%s8424_s1 + $0x80] sm:$0xff] }
 0x475   :  { %v4744_v4 = vpop.permute.xlu1 %4743  ;;  %v7801_v47 = vsel %vm3159_vm1, %v3147_v18, %v4710_v62  ;;  %v7804_v32 = vsel %vm3159_vm1, %v3148_v8, %v4711_v39  ;;  %v2450_v12 = vmul.f32 %v5014_v11, %v7713_v49  ;;  %v7819_v39 = vmul.f32 %v5016_v43, %v7293_v21 }
 0x476   :  { %v3065_v41 = vsel %vm3058_vm12, %v2456_v27, %v4715_v34  ;;  %v4746_v50 = vunpack.i.h.bf16 %v4744_v4  ;;  %v4745_v15 = vunpack.i.l.bf16 %v4744_v4  ;;  %v3180_v49 = vpack.c.bf16 %v7804_v32, %v7801_v47 }
 0x477   :  { %v4749_v16 = vpop.permute.xlu0 %4748  ;;  %v3082_v38 = vsel %vm3075_vm13, %v3065_v41, %v4740_v26  ;;  %v3083_v42 = vsel %vm3075_vm13, %v3066_v61, %v4741_v55  ;;  %v4646_v62 = vunpack.i.h.bf16 %v7734_v0  ;;  %v4645_v10 = vunpack.i.l.bf16 %v7734_v0 }
 0x478   :  { %v4751_v28 = vunpack.i.h.bf16 %v4749_v16  ;;  %v4750_v31 = vunpack.i.l.bf16 %v4749_v16  ;;  %v4651_v21 = vunpack.i.h.bf16 %v7736_v3  ;;  %v4650_v34 = vunpack.i.l.bf16 %v7736_v3 }
 0x479   :  { %v4754_v37 = vpop.permute.xlu1 %4753  ;;  %v4661_v26 = vunpack.i.h.bf16 %v7738_v60  ;;  %v4660_v55 = vunpack.i.l.bf16 %v7738_v60  ;;  %v3098_v27 = vsel %vm1202_vm10, %v3082_v38, %v4745_v15  ;;  %v3099_v4 = vsel %vm1202_vm10, %v3083_v42, %v4746_v50 }
 0x47a   :  { %v3059_v30 = vsel %vm3058_vm12, %v2450_v12, %v4750_v31  ;;  %v3060_v18 = vsel %vm3058_vm12, %v2451_v22, %v4751_v28  ;;  %v4756_v8 = vunpack.i.h.bf16 %v4754_v37  ;;  %v4755_v13 = vunpack.i.l.bf16 %v4754_v37 }
 0x47b   :  { %v4764_v0 = vpop.permute.xlu0 %4763  ;;  %v4666_v12 = vunpack.i.h.bf16 %v7740_v52  ;;  %v4665_v22 = vunpack.i.l.bf16 %v7740_v52  ;;  %v4691_v43 = vunpack.i.h.bf16 %v7750_v35  ;;  %v4690_v41 = vunpack.i.l.bf16 %v7750_v35 }
 0x47c   :  { %v3077_v61 = vsel %vm3075_vm13, %v3060_v18, %v4756_v8  ;;  %v3076_v3 = vsel %vm3075_vm13, %v3059_v30, %v4755_v13  ;;  %v4766_v11 = vunpack.i.h.bf16 %v4764_v0  ;;  %v4765_v63 = vunpack.i.l.bf16 %v4764_v0 }
 0x47d   :  { %v4759_v60 = vpop.permute.xlu1 %4758  ;;  %v3115_v31 = vsel %vm3108_vm14, %v3098_v27, %v4690_v41  ;;  %v3116_v37 = vsel %vm3108_vm14, %v3099_v4, %v4691_v43 }
 0x47e   :  { %v3093_v15 = vsel %vm1202_vm10, %v3077_v61, %v4766_v11  ;;  %v3092_v50 = vsel %vm1202_vm10, %v3076_v3, %v4765_v63  ;;  %v4761_v16 = vunpack.i.h.bf16 %v4759_v60  ;;  %v4760_v38 = vunpack.i.l.bf16 %v4759_v60  ;;  %v5017_v63 = vld [vmem:[%s8424_s1 + $0x90] sm:$0xff] }
 0x47f   :  { %v3110_v42 = vsel %vm3108_vm14, %v3093_v15, %v4646_v62  ;;  %v3109_v28 = vsel %vm3108_vm14, %v3092_v50, %v4645_v10  ;;  %v4769_v52 = vpop.permute.xlu0 %4768 }
 0x480   :  { %v3127_v30 = vsel %vm3125_vm15, %v3110_v42, %v4661_v26  ;;  %v3126_v35 = vsel %vm3125_vm15, %v3109_v28, %v4660_v55  ;;  %v3132_v18 = vsel %vm3125_vm15, %v3115_v31, %v4760_v38  ;;  %v3133_v8 = vsel %vm3125_vm15, %v3116_v37, %v4761_v16 }
 0x481   :  { %v3144_v13 = vsel %vm3142_vm0, %v3127_v30, %v4666_v12  ;;  %v3143_v0 = vsel %vm3142_vm0, %v3126_v35, %v4665_v22  ;;  %v4771_v62 = vunpack.i.h.bf16 %v4769_v52  ;;  %v4770_v61 = vunpack.i.l.bf16 %v4769_v52  ;;  %v4774_v10 = vpop.permute.xlu1 %4773 }
 0x482   :  { %v4776_v3 = vunpack.i.h.bf16 %v4774_v10  ;;  %v4775_v27 = vunpack.i.l.bf16 %v4774_v10  ;;  %v3160_v4 = vsel %vm3159_vm1, %v3143_v0, %v4650_v34  ;;  %v3161_v11 = vsel %vm3159_vm1, %v3144_v13, %v4651_v21 }
 0x483   :  { %v3150_v26 = vsel %vm3142_vm0, %v3133_v8, %v4771_v62  ;;  %v3149_v55 = vsel %vm3142_vm0, %v3132_v18, %v4770_v61  ;;  %v2459_v12 = vmul.f32 %v5017_v63, %v7349_v19  ;;  %v4779_v22 = vpop.permute.xlu0 %4778  ;;  %v3176_v43 = vpack.c.bf16 %v3161_v11, %v3160_v4 }
 0x484   :  { %v4781_v41 = vunpack.i.h.bf16 %v4779_v22  ;;  %v4780_v60 = vunpack.i.l.bf16 %v4779_v22  ;;  %v7863_v15 = vsel %vm3159_vm1, %v3149_v55, %v4775_v27  ;;  %v7866_v34 = vsel %vm3159_vm1, %v3150_v26, %v4776_v3 }
 0x485   :  { %v4784_v21 = vpop.permute.xlu1 %4783  ;;  %3304 = vmatmul.mubr.bf16.vlgmr.msra.gmra.mxu0 %v3176_v43  ;;  %v3182_v50 = vpack.c.bf16 %v7866_v34, %v7863_v15 }
 0x486   :  { %v3068_v16 = vsel %vm3058_vm12, %v2459_v12, %v4781_v41  ;;  %v3067_v19 = vsel %vm3058_vm12, %v7819_v39, %v4780_v60  ;;  %v4786_v38 = vunpack.i.h.bf16 %v4784_v21  ;;  %v4785_v42 = vunpack.i.l.bf16 %v4784_v21  ;;  %3889 = vmatprep.mubr.msk.bf16.mxu0 %vm3058_vm12, %v3179_v2 }
 0x487   :  { %v4789_v28 = vpop.permute.xlu0 %4788 }
 0x488   :  { %v3084_v31 = vsel %vm3075_vm13, %v3067_v19, %v4785_v42  ;;  %v3085_v37 = vsel %vm3075_vm13, %v3068_v16, %v4786_v38  ;;  %v4791_v52 = vunpack.i.h.bf16 %v4789_v28  ;;  %v4790_v30 = vunpack.i.l.bf16 %v4789_v28 }
 0x489   :  { %v4794_v35 = vpop.permute.xlu1 %4793 }
 0x48a   :  { %v3100_v18 = vsel %vm1202_vm10, %v3084_v31, %v4790_v30  ;;  %v3101_v8 = vsel %vm1202_vm10, %v3085_v37, %v4791_v52  ;;  %v4796_v39 = vunpack.i.h.bf16 %v4794_v35  ;;  %v4795_v13 = vunpack.i.l.bf16 %v4794_v35 }
 0x48b   :  { %v4799_v0 = vpop.permute.xlu0 %4798 }
 0x48c   :  { %v3117_v62 = vsel %vm3108_vm14, %v3100_v18, %v4795_v13  ;;  %v3118_v58 = vsel %vm3108_vm14, %v3101_v8, %v4796_v39  ;;  %v4801_v20 = vunpack.i.h.bf16 %v4799_v0  ;;  %v4800_v2 = vunpack.i.l.bf16 %v4799_v0 }
 0x48d   :  { %v4804_v61 = vpop.permute.xlu1 %4803  ;;  %3312 = vmatmul.mubr.bf16.gmra.mxu0 %v3178_v5  ;;  %v5019_v5 = vld [vmem:[%s8424_s1 + $0xb0] sm:$0xff] }
 0x48e   :  { %v3134_v10 = vsel %vm3125_vm15, %v3117_v62, %v4800_v2  ;;  %v3135_v3 = vsel %vm3125_vm15, %v3118_v58, %v4801_v20  ;;  %v4806_v27 = vunpack.i.h.bf16 %v4804_v61  ;;  %v4805_v4 = vunpack.i.l.bf16 %v4804_v61  ;;  %3890 = vmatprep.mubr.msk.bf16.mxu0 %vm3058_vm12, %v3181_v23 }
 0x48f   :  { %v4809_v11 = vpop.permute.xlu0 %4808  ;;  %v2461_v48 = vmul.f32 %v5019_v5, %v7429_v6 }
 0x490   :  { %v3151_v26 = vsel %vm3142_vm0, %v3134_v10, %v4805_v4  ;;  %v3152_v55 = vsel %vm3142_vm0, %v3135_v3, %v4806_v27  ;;  %v4811_v63 = vunpack.i.h.bf16 %v4809_v11  ;;  %v4810_v12 = vunpack.i.l.bf16 %v4809_v11 }
 0x491   :  { %v4814_v40 = vpop.permute.xlu1 %4813 }
 0x492   :  { %v4816_v23 = vunpack.i.h.bf16 %v4814_v40  ;;  %v4815_v22 = vunpack.i.l.bf16 %v4814_v40  ;;  %v3168_v43 = vsel %vm3159_vm1, %v3151_v26, %v4810_v12  ;;  %v3169_v41 = vsel %vm3159_vm1, %v3152_v55, %v4811_v63  ;;  %v5021_v12 = vld [vmem:[%s8424_s1 + $0xd0] sm:$0xff] }
 0x493   :  { %v4819_v60 = vpop.permute.xlu0 %4818  ;;  %v3184_v21 = vpack.c.bf16 %v3169_v41, %v3168_v43  ;;  %v8890_v63 = vpack.c.bf16 %v7549_v24, %v7543_v45  ;;  %v2463_v51 = vmul.f32 %v5021_v12, %v7615_v54 }
 0x494   :  { %v3070_v16 = vsel %vm3058_vm12, %v2461_v48, %v4816_v23  ;;  %v3069_v19 = vsel %vm3058_vm12, %v2460_v25, %v4815_v22  ;;  %v4821_v46 = vunpack.i.h.bf16 %v4819_v60  ;;  %v4820_v38 = vunpack.i.l.bf16 %v4819_v60 }
 0x495   :  { %v4824_v42 = vpop.permute.xlu1 %4823  ;;  %3320 = vmatmul.mubr.bf16.gmra.mxu0 %v3180_v49 }
 0x496   :  { %v3087_v6 = vsel %vm3075_vm13, %v3070_v16, %v4821_v46  ;;  %v3086_v28 = vsel %vm3075_vm13, %v3069_v19, %v4820_v38  ;;  %v4826_v31 = vunpack.i.h.bf16 %v4824_v42  ;;  %v4825_v37 = vunpack.i.l.bf16 %v4824_v42  ;;  %3891 = vmatprep.mubr.msk.bf16.mxu0 %vm3058_vm12, %v3183_v1 }
 0x497   :  { %v4829_v52 = vpop.permute.xlu0 %4828 }
 0x498   :  { %v3102_v30 = vsel %vm1202_vm10, %v3086_v28, %v4825_v37  ;;  %v3103_v35 = vsel %vm1202_vm10, %v3087_v6, %v4826_v31  ;;  %v4831_v18 = vunpack.i.h.bf16 %v4829_v52  ;;  %v4830_v8 = vunpack.i.l.bf16 %v4829_v52 }
 0x499   :  { %v4834_v47 = vpop.permute.xlu1 %4833  ;;  %v8891_v31 = vpack.c.bf16 %v7561_v57, %v7555_v56 }
 0x49a   :  { %v3119_v32 = vsel %vm3108_vm14, %v3102_v30, %v4830_v8  ;;  %v3120_v49 = vsel %vm3108_vm14, %v3103_v35, %v4831_v18  ;;  %v4836_v39 = vunpack.i.h.bf16 %v4834_v47  ;;  %v4835_v13 = vunpack.i.l.bf16 %v4834_v47 }
 0x49b   :  { %v4839_v0 = vpop.permute.xlu0 %4838 }
 0x49c   :  { %v3136_v62 = vsel %vm3125_vm15, %v3119_v32, %v4835_v13  ;;  %v3137_v33 = vsel %vm3125_vm15, %v3120_v49, %v4836_v39  ;;  %v4841_v14 = vunpack.i.h.bf16 %v4839_v0  ;;  %v4840_v1 = vunpack.i.l.bf16 %v4839_v0  ;;  %v5022_v0 = vld [vmem:[%s8424_s1 + $0xe0] sm:$0xff] }
 0x49d   :  { %v4844_v58 = vpop.permute.xlu1 %4843  ;;  %3328 = vmatmul.mubr.bf16.gmra.mxu0 %v3182_v50 }
 0x49e   :  { %v3153_v20 = vsel %vm3142_vm0, %v3136_v62, %v4840_v1  ;;  %v3154_v2 = vsel %vm3142_vm0, %v3137_v33, %v4841_v14  ;;  %v4846_v61 = vunpack.i.h.bf16 %v4844_v58  ;;  %v4845_v10 = vunpack.i.l.bf16 %v4844_v58  ;;  %3892 = vmatprep.mubr.msk.bf16.mxu0 %vm3058_vm12, %v3185_v59  ;;  %v5023_v33 = vld [vmem:[%s8424_s1 + $0xf0] sm:$0xff] }
 0x49f   :  { %v4849_v3 = vpop.permute.xlu0 %4848  ;;  %v2462_v59 = vmul.f32 %v5020_v17, %v7599_v36  ;;  %v2464_v62 = vmul.f32 %v5022_v0, %v7658_v7  ;;  %v2465_v14 = vmul.f32 %v5023_v33, %v7684_v53 }
 0x4a0   :  { %v3170_v27 = vsel %vm3159_vm1, %v3153_v20, %v4845_v10  ;;  %v3171_v4 = vsel %vm3159_vm1, %v3154_v2, %v4846_v61  ;;  %v4851_v50 = vunpack.i.h.bf16 %v4849_v3  ;;  %v4850_v55 = vunpack.i.l.bf16 %v4849_v3 }
 0x4a1   :  { %v4854_v11 = vpop.permute.xlu1 %4853  ;;  %v3186_v26 = vpack.c.bf16 %v3171_v4, %v3170_v27 }
 0x4a2   :  { %v3072_v5 = vsel %vm3058_vm12, %v2463_v51, %v4851_v50  ;;  %v3071_v45 = vsel %vm3058_vm12, %v2462_v59, %v4850_v55  ;;  %v4856_v40 = vunpack.i.h.bf16 %v4854_v11  ;;  %v4855_v23 = vunpack.i.l.bf16 %v4854_v11 }
 0x4a3   :  { %v4859_v15 = vpop.permute.xlu0 %4858  ;;  %v8892_v11 = vpack.c.bf16 %v7577_v29, %v7571_v44 }
 0x4a4   :  { %v4861_v37 = vunpack.i.h.bf16 %v4859_v15  ;;  %v4860_v52 = vunpack.i.l.bf16 %v4859_v15 }
 0x4a5   :  { %v4864_v34 = vpop.permute.xlu1 %4863  ;;  %3336 = vmatmul.mubr.bf16.gmra.mxu0 %v3184_v21 }
 0x4a6   :  { %3893 = vmatprep.mubr.msk.bf16.mxu0 %vm3058_vm12, %v8890_v63  ;;  %v4866_v32 = vunpack.i.h.bf16 %v4864_v34  ;;  %v4865_v49 = vunpack.i.l.bf16 %v4864_v34 }
 0x4a7   :  { %v4874_v9 = vpop.permute.xlu0 %4873 }
 0x4a8   :  { %v4876_v22 = vunpack.i.h.bf16 %v4874_v9  ;;  %v4875_v43 = vunpack.i.l.bf16 %v4874_v9  ;;  %v3074_v2 = vsel %vm3058_vm12, %v2465_v14, %v4866_v32  ;;  %v3073_v61 = vsel %vm3058_vm12, %v2464_v62, %v4865_v49 }
 0x4a9   :  { %v4869_v25 = vpop.permute.xlu1 %4868 }
 0x4aa   :  { %v4871_v24 = vunpack.i.h.bf16 %v4869_v25  ;;  %v4870_v48 = vunpack.i.l.bf16 %v4869_v25 }
 0x4ab   :  { %v4879_v41 = vpop.permute.xlu0 %4878 }
 0x4ac   :  { %v3088_v36 = vsel %vm3075_vm13, %v3071_v45, %v4870_v48  ;;  %v3089_v60 = vsel %vm3075_vm13, %v3072_v5, %v4871_v24  ;;  %v4881_v21 = vunpack.i.h.bf16 %v4879_v41  ;;  %v4880_v16 = vunpack.i.l.bf16 %v4879_v41 }
 0x4ad   :  { %v3104_v54 = vsel %vm1202_vm10, %v3088_v36, %v4875_v43  ;;  %v3105_v19 = vsel %vm1202_vm10, %v3089_v60, %v4876_v22  ;;  %v4889_v46 = vpop.permute.xlu1 %4888  ;;  %3344 = vmatmul.mubr.bf16.gmra.mxu0 %v3186_v26  ;;  %v7991_v22 = vld [vmem:[%s8424_s1 + $0x202] ss:$0 sm:$0xff] }
 0x4ae   :  { %v3121_v38 = vsel %vm3108_vm14, %v3104_v54, %v4855_v23  ;;  %v3122_v42 = vsel %vm3108_vm14, %v3105_v19, %v4856_v40  ;;  %v4891_v6 = vunpack.i.h.bf16 %v4889_v46  ;;  %v4890_v28 = vunpack.i.l.bf16 %v4889_v46  ;;  %3894 = vmatprep.mubr.msk.bf16.mxu0 %vm3058_vm12, %v8891_v31 }
 0x4af   :  { %v3138_v30 = vsel %vm3125_vm15, %v3121_v38, %v4880_v16  ;;  %v3139_v35 = vsel %vm3125_vm15, %v3122_v42, %v4881_v21  ;;  %v4884_v18 = vpop.permute.xlu0 %4883 }
 0x4b0   :  { %v3155_v8 = vsel %vm3142_vm0, %v3138_v30, %v4890_v28  ;;  %v3156_v47 = vsel %vm3142_vm0, %v3139_v35, %v4891_v6  ;;  %v4886_v53 = vunpack.i.h.bf16 %v4884_v18  ;;  %v4885_v26 = vunpack.i.l.bf16 %v4884_v18 }
 0x4b1   :  { %v4894_v39 = vpop.permute.xlu1 %4893  ;;  %v3172_v13 = vsel %vm3159_vm1, %v3155_v8, %v4860_v52  ;;  %v3173_v56 = vsel %vm3159_vm1, %v3156_v47, %v4861_v37 }
 0x4b2   :  { %v3188_v57 = vpack.c.bf16 %v3173_v56, %v3172_v13  ;;  %v4896_v15 = vunpack.i.h.bf16 %v4894_v39  ;;  %v4895_v34 = vunpack.i.l.bf16 %v4894_v39 }
 0x4b3   :  { %v4899_v1 = vpop.permute.xlu0 %4898 }
 0x4b4   :  { %v4901_v58 = vunpack.i.h.bf16 %v4899_v1  ;;  %v4900_v20 = vunpack.i.l.bf16 %v4899_v1 }
 0x4b5   :  { %v4909_v10 = vpop.permute.xlu1 %4908  ;;  %3352 = vmatmul.mubr.bf16.gmra.mxu0 %v3188_v57 }
 0x4b6   :  { %v3091_v3 = vsel %vm3075_vm13, %v3074_v2, %v4901_v58  ;;  %v3090_v27 = vsel %vm3075_vm13, %v3073_v61, %v4900_v20  ;;  %v4911_v7 = vunpack.i.h.bf16 %v4909_v10  ;;  %v4910_v4 = vunpack.i.l.bf16 %v4909_v10  ;;  %3895 = vmatprep.mubr.msk.bf16.mxu0 %vm3058_vm12, %v8892_v11 }
 0x4b7   :  { %v4904_v50 = vpop.permute.xlu0 %4903 }
 0x4b8   :  { %v3106_v55 = vsel %vm1202_vm10, %v3090_v27, %v4910_v4  ;;  %v3107_v63 = vsel %vm1202_vm10, %v3091_v3, %v4911_v7  ;;  %v4906_v9 = vunpack.i.h.bf16 %v4904_v50  ;;  %v4905_v17 = vunpack.i.l.bf16 %v4904_v50 }
 0x4b9   :  { %v3123_v59 = vsel %vm3108_vm14, %v3106_v55, %v4885_v26  ;;  %v3124_v12 = vsel %vm3108_vm14, %v3107_v63, %v4886_v53  ;;  %v4914_v51 = vpop.permute.xlu1 %4913 }
 0x4ba   :  { %v3140_v44 = vsel %vm3125_vm15, %v3123_v59, %v4895_v34  ;;  %v3141_v29 = vsel %vm3125_vm15, %v3124_v12, %v4896_v15  ;;  %v4916_v25 = vunpack.i.h.bf16 %v4914_v51  ;;  %v4915_v5 = vunpack.i.l.bf16 %v4914_v51 }
 0x4bb   :  { %v3157_v45 = vsel %vm3142_vm0, %v3140_v44, %v4905_v17  ;;  %v3158_v24 = vsel %vm3142_vm0, %v3141_v29, %v4906_v9 }
 0x4bc   :  { %v3174_v48 = vsel %vm3159_vm1, %v3157_v45, %v4915_v5  ;;  %v3175_v40 = vsel %vm3159_vm1, %v3158_v24, %v4916_v25  ;;  %v3413_v45 = vld [vmem:[%s8424_s1 + $0x1e8] sm:$0xff]  ;;  %v3415_v24 = vld [vmem:[%s8424_s1 + $0x1f8] sm:$0xff] }
 0x4bd   :  { %v3190_v23 = vpack.c.bf16 %v3175_v40, %v3174_v48 }
 0x4bf   :  { %3360 = vmatmul.mubr.bf16.gmra.mxu0 %v3190_v23 }
 0x545   :  { %v3305_v43 = vpop.f32.mrf.mxu0 }
 0x546   :  { %v7994_v41 = vadd.f32 %v3305_v43, %v7991_v22 }
 0x547   :  { %v3307_v36 = vpop.f32.mrf.mxu0 }
 0x549   :  { %v3308_v60 = vpop.f32.mrf.mxu0 }
 0x54a   :  { %v7997_v21 = vadd.f32 %v3308_v60, %v7991_v22 }
 0x54b   :  { %v3310_v16 = vpop.f32.mrf.mxu0 }
 0x54c   :  { %v8138_v16 = vmax.f32 %v7994_v41, 0.0 }
 0x54d   :  { %v3313_v54 = vpop.f32.mrf.mxu0 }
 0x54e   :  { %v8000_v19 = vadd.f32 %v3313_v54, %v7991_v22  ;;  %v8145_v54 = vmax.f32 %v7997_v21, 0.0 }
 0x54f   :  { %v3315_v46 = vpop.f32.mrf.mxu0 }
 0x550   :  { %v8120_v36 = vmax.f32 %v8000_v19, 0.0 }
 0x551   :  { %v3316_v38 = vpop.f32.mrf.mxu0 }
 0x552   :  { %v8003_v42 = vadd.f32 %v3316_v38, %v7991_v22 }
 0x553   :  { %v3318_v6 = vpop.f32.mrf.mxu0 }
 0x554   :  { %v8127_v60 = vmax.f32 %v8003_v42, 0.0 }
 0x555   :  { %v3321_v28 = vpop.f32.mrf.mxu0 }
 0x556   :  { %v3322_v31 = vadd.f32 %v3321_v28, %v7991_v22 }
 0x557   :  { %v3323_v37 = vpop.f32.mrf.mxu0 }
 0x558   :  { %v8006_v52 = vmax.f32 %v3322_v31, 0.0 }
 0x559   :  { %v3324_v30 = vpop.f32.mrf.mxu0 }
 0x55a   :  { %v3325_v35 = vadd.f32 %v3324_v30, %v7991_v22  ;;  %3440 = vrot.lane.b32.xlu0 %v8006_v52, %s5050_s24 }
 0x55b   :  { %v3326_v18 = vpop.f32.mrf.mxu0 }
 0x55c   :  { %v8011_v8 = vmax.f32 %v3325_v35, 0.0 }
 0x55d   :  { %v3329_v47 = vpop.f32.mrf.mxu0 }
 0x55e   :  { %v3330_v32 = vadd.f32 %v3329_v47, %v7991_v22  ;;  %3442 = vrot.lane.b32.xlu1 %v8011_v8, %s5050_s24  ;;  %3488 = vrot.lane.b32.xlu0 %v8006_v52, %s5059_s30 }
 0x55f   :  { %v3331_v49 = vpop.f32.mrf.mxu0 }
 0x560   :  { %v8018_v39 = vmax.f32 %v3330_v32, 0.0 }
 0x561   :  { %v3332_v13 = vpop.f32.mrf.mxu0 }
 0x562   :  { %v3333_v56 = vadd.f32 %v3332_v13, %v7991_v22  ;;  %3490 = vrot.lane.b32.xlu1 %v8011_v8, %s5059_s30  ;;  %3444 = vrot.lane.b32.xlu0 %v8018_v39, %s5050_s24 }
 0x563   :  { %v3334_v57 = vpop.f32.mrf.mxu0 }
 0x564   :  { %v8025_v0 = vmax.f32 %v3333_v56, 0.0  ;;  %v3396_v57 = vld [vmem:[%s8424_s1 + $0x160] sm:$0xff] }
 0x565   :  { %v3337_v62 = vpop.f32.mrf.mxu0 }
 0x566   :  { %3446 = vrot.lane.b32.xlu1 %v8025_v0, %s5050_s24  ;;  %3492 = vrot.lane.b32.xlu0 %v8018_v39, %s5059_s30  ;;  %v3338_v14 = vadd.f32 %v3337_v62, %v7991_v22  ;;  %v3398_v62 = vld [vmem:[%s8424_s1 + $0x170] sm:$0xff] }
 0x567   :  { %v3339_v33 = vpop.f32.mrf.mxu0 }
 0x568   :  { %v8036_v20 = vmax.f32 %v3338_v14, 0.0 }
 0x569   :  { %v3340_v1 = vpop.f32.mrf.mxu0 }
 0x56a   :  { %3494 = vrot.lane.b32.xlu1 %v8025_v0, %s5059_s30  ;;  %3540 = vrot.lane.b32.xlu0 %v8018_v39, %s5047_s21  ;;  %v3341_v2 = vadd.f32 %v3340_v1, %v7991_v22 }
 0x56b   :  { %v3342_v58 = vpop.f32.mrf.mxu0 }
 0x56c   :  { %v8043_v3 = vmax.f32 %v3341_v2, 0.0 }
 0x56d   :  { %v3345_v61 = vpop.f32.mrf.mxu0 }
 0x56e   :  { %3542 = vrot.lane.b32.xlu1 %v8025_v0, %s5047_s21  ;;  %3448 = vrot.lane.b32.xlu0 %v8036_v20, %s5050_s24  ;;  %v3346_v4 = vadd.f32 %v3345_v61, %v7991_v22 }
 0x56f   :  { %v3347_v10 = vpop.f32.mrf.mxu0 }
 0x570   :  { %v8054_v26 = vmax.f32 %v3346_v4, 0.0 }
 0x571   :  { %v3348_v27 = vpop.f32.mrf.mxu0 }
 0x572   :  { %3450 = vrot.lane.b32.xlu1 %v8043_v3, %s5050_s24  ;;  %3496 = vrot.lane.b32.xlu0 %v8036_v20, %s5059_s30  ;;  %v3349_v15 = vadd.f32 %v3348_v27, %v7991_v22 }
 0x573   :  { %v3350_v7 = vpop.f32.mrf.mxu0 }
 0x574   :  { %v8061_v55 = vmax.f32 %v3349_v15, 0.0 }
 0x575   :  { %v3353_v11 = vpop.f32.mrf.mxu0 }
 0x576   :  { %3498 = vrot.lane.b32.xlu1 %v8043_v3, %s5059_s30  ;;  %3544 = vrot.lane.b32.xlu0 %v8036_v20, %s5047_s21  ;;  %v3354_v9 = vadd.f32 %v3353_v11, %v7991_v22 }
 0x577   :  { %v3355_v53 = vpop.f32.mrf.mxu0 }
 0x578   :  { %v8073_v51 = vmax.f32 %v3354_v9, 0.0 }
 0x579   :  { %v3356_v34 = vpop.f32.mrf.mxu0 }
 0x57a   :  { %3546 = vrot.lane.b32.xlu1 %v8043_v3, %s5047_s21  ;;  %3452 = vrot.lane.b32.xlu0 %v8054_v26, %s5050_s24  ;;  %v3357_v44 = vadd.f32 %v3356_v34, %v7991_v22 }
 0x57b   :  { %v3358_v50 = vpop.f32.mrf.mxu0 }
 0x57c   :  { %v8091_v40 = vmax.f32 %v3357_v44, 0.0 }
 0x57e   :  { %3454 = vrot.lane.b32.xlu1 %v8061_v55, %s5050_s24  ;;  %3500 = vrot.lane.b32.xlu0 %v8054_v26, %s5059_s30 }
 0x57f   :  { %v3361_v63 = vpop.f32.mrf.mxu0 }
 0x580   :  { %v3362_v17 = vadd.f32 %v3361_v63, %v7991_v22 }
 0x581   :  { %v3363_v59 = vpop.f32.mrf.mxu0 }
 0x582   :  { %3502 = vrot.lane.b32.xlu1 %v8061_v55, %s5059_s30  ;;  %3548 = vrot.lane.b32.xlu0 %v8054_v26, %s5047_s21  ;;  %v8076_v29 = vmax.f32 %v3362_v17, 0.0 }
 0x583   :  { %v3364_v12 = vpop.f32.mrf.mxu0 }
 0x584   :  { %v3365_v25 = vadd.f32 %v3364_v12, %v7991_v22  ;;  %v3653_v23 = vmul.f32 %v3413_v45, %v8076_v29 }
 0x585   :  { %v3366_v5 = vpop.f32.mrf.mxu0 }
 0x586   :  { %v8085_v48 = vmax.f32 %v3365_v25, 0.0  ;;  %3550 = vrot.lane.b32.xlu1 %v8061_v55, %s5047_s21  ;;  %3456 = vrot.lane.b32.xlu0 %v8073_v51, %s5050_s24 }
 0x588   :  { %v3655_v22 = vmul.f32 %v3415_v24, %v8085_v48 }
 0x58a   :  { %3458 = vrot.lane.b32.xlu1 %v8091_v40, %s5050_s24  ;;  %3504 = vrot.lane.b32.xlu0 %v8073_v51, %s5059_s30  ;;  %v3671_v43 = vpack.c.bf16 %v3655_v22, %v3653_v23 }
 0x58c   :  { %3673 = vmatprep.subr.bf16.mxu1 %v3671_v43 }
 0x58e   :  { %3506 = vrot.lane.b32.xlu1 %v8091_v40, %s5059_s30  ;;  %3552 = vrot.lane.b32.xlu0 %v8073_v51, %s5047_s21 }
 0x592   :  { %3554 = vrot.lane.b32.xlu1 %v8091_v40, %s5047_s21  ;;  %3460 = vrot.lane.b32.xlu0 %v8076_v29, %s5050_s24 }
 0x596   :  { %3462 = vrot.lane.b32.xlu1 %v8085_v48, %s5050_s24  ;;  %3508 = vrot.lane.b32.xlu0 %v8076_v29, %s5059_s30 }
 0x59a   :  { %3510 = vrot.lane.b32.xlu1 %v8085_v48, %s5059_s30  ;;  %3556 = vrot.lane.b32.xlu0 %v8076_v29, %s5047_s21 }
 0x59e   :  { %3558 = vrot.lane.b32.xlu1 %v8085_v48, %s5047_s21  ;;  %3536 = vrot.lane.b32.xlu0 %v8006_v52, %s5047_s21 }
 0x5a2   :  { %3538 = vrot.lane.b32.xlu1 %v8011_v8, %s5047_s21  ;;  %3436 = vrot.lane.b32.xlu0 %v8120_v36, %s5050_s24 }
 0x5a6   :  { %3438 = vrot.lane.b32.xlu1 %v8127_v60, %s5050_s24  ;;  %3484 = vrot.lane.b32.xlu0 %v8120_v36, %s5059_s30 }
 0x5aa   :  { %3486 = vrot.lane.b32.xlu1 %v8127_v60, %s5059_s30  ;;  %3532 = vrot.lane.b32.xlu0 %v8120_v36, %s5047_s21 }
 0x5ae   :  { %3534 = vrot.lane.b32.xlu1 %v8127_v60, %s5047_s21  ;;  %3432 = vrot.lane.b32.xlu0 %v8138_v16, %s5050_s24 }
 0x5b2   :  { %3434 = vrot.lane.b32.xlu1 %v8145_v54, %s5050_s24  ;;  %3480 = vrot.lane.b32.xlu0 %v8138_v16, %s5059_s30 }
 0x5b6   :  { %3482 = vrot.lane.b32.xlu1 %v8145_v54, %s5059_s30  ;;  %3528 = vrot.lane.b32.xlu0 %v8138_v16, %s5047_s21 }
 0x5ba   :  { %3530 = vrot.lane.b32.xlu1 %v8145_v54, %s5047_s21  ;;  %s5061_s21 = smov [#allocation2]  }
 0x5bb   :  { %s3847_s24 = sshll.u32 %s5061_s21, 4  ;;  %s3848_s24 = int_to_ptr.vmem [resolvable:$true] %s3847_s24 }
 0x5bc   :  { %p5029_p1 = scmp.lt.s32.totalorder %s3848_s24, %s3848_s24 }
 0x5cc   :  { %v3441_v41 = vpop.permute.xlu0 %3440 }
 0x5cd   :  { %v3580_v21 = vsel %vm3075_vm13, %v8006_v52, %v3441_v41 }
 0x5d0   :  { %v3443_v19 = vpop.permute.xlu1 %3442  ;;  %v3489_v46 = vpop.permute.xlu0 %3488 }
 0x5d1   :  { %v8160_v38 = vsel %vm3108_vm14, %v3580_v21, %v3489_v46  ;;  %v3581_v42 = vsel %vm3075_vm13, %v8011_v8, %v3443_v19  ;;  %v3411_v19 = vld [vmem:[%s8424_s1 + $0x1d8] sm:$0xff] }
 0x5d4   :  { %v3491_v6 = vpop.permute.xlu1 %3490  ;;  %v3445_v28 = vpop.permute.xlu0 %3444 }
 0x5d5   :  { %v8165_v31 = vsel %vm3108_vm14, %v3581_v42, %v3491_v6  ;;  %v3582_v37 = vsel %vm3075_vm13, %v8018_v39, %v3445_v28  ;;  %v3412_v6 = vld [vmem:[%s8424_s1 + $0x1e0] sm:$0xff] }
 0x5d8   :  { %v3447_v30 = vpop.permute.xlu1 %3446  ;;  %v3493_v35 = vpop.permute.xlu0 %3492 }
 0x5d9   :  { %v3598_v18 = vsel %vm3108_vm14, %v3582_v37, %v3493_v35  ;;  %v3583_v47 = vsel %vm3075_vm13, %v8025_v0, %v3447_v30 }
 0x5dc   :  { %v3495_v32 = vpop.permute.xlu1 %3494  ;;  %v3541_v49 = vpop.permute.xlu0 %3540 }
 0x5dd   :  { %v3599_v13 = vsel %vm3108_vm14, %v3583_v47, %v3495_v32  ;;  %v3614_v56 = vsel %vm3142_vm0, %v3598_v18, %v3541_v49  ;;  %v3410_v32 = vld [vmem:[%s8424_s1 + $0x1d0] sm:$0xff] }
 0x5de   :  { %v8183_v58 = vmul.f32 %v3614_v56, %v3396_v57  ;;  %v3651_v56 = vmul.f32 %v3411_v19, %v8091_v40  ;;  %v3407_v57 = vld [vmem:[%s8424_s1 + $0x1b8] sm:$0xff] }
 0x5e0   :  { %v3543_v33 = vpop.permute.xlu1 %3542  ;;  %v8180_v14 = vpop.permute.xlu0 %3448 }
 0x5e1   :  { %v3615_v1 = vsel %vm3142_vm0, %v3599_v13, %v3543_v33 }
 0x5e2   :  { %v8185_v2 = vmul.f32 %v3615_v1, %v3398_v62 }
 0x5e4   :  { %v3662_v61 = vpack.c.bf16 %v8185_v2, %v8183_v58  ;;  %v8189_v10 = vpop.permute.xlu1 %3450  ;;  %v8191_v27 = vpop.permute.xlu0 %3496  ;;  %v3385_v58 = vld [vmem:[%s8424_s1 + $0x108] sm:$0xff] }
 0x5e8   :  { %v8193_v7 = vpop.permute.xlu1 %3498  ;;  %v8195_v4 = vpop.permute.xlu0 %3544 }
 0x5ec   :  { %v8197_v11 = vpop.permute.xlu1 %3546  ;;  %v3453_v53 = vpop.permute.xlu0 %3452 }
 0x5f0   :  { %v3455_v15 = vpop.permute.xlu1 %3454  ;;  %v3501_v34 = vpop.permute.xlu0 %3500 }
 0x5f4   :  { %v3503_v50 = vpop.permute.xlu1 %3502  ;;  %v8199_v63 = vpop.permute.xlu0 %3548 }
 0x5f8   :  { %v3551_v9 = vpop.permute.xlu1 %3550  ;;  %v3457_v17 = vpop.permute.xlu0 %3456 }
 0x5f9   :  { %v3588_v47 = vsel %vm3075_vm13, %v8073_v51, %v3457_v17  ;;  %v3587_v17 = vsel %vm3075_vm13, %v8061_v55, %v3455_v15 }
 0x5fa   :  { %v3603_v15 = vsel %vm3108_vm14, %v3587_v17, %v3503_v50 }
 0x5fb   :  { %v3619_v50 = vsel %vm3142_vm0, %v3603_v15, %v3551_v9 }
 0x5fc   :  { %v3459_v59 = vpop.permute.xlu1 %3458  ;;  %v3505_v12 = vpop.permute.xlu0 %3504 }
 0x5fd   :  { %v3589_v46 = vsel %vm3075_vm13, %v8091_v40, %v3459_v59  ;;  %v3604_v62 = vsel %vm3108_vm14, %v3588_v47, %v3505_v12  ;;  %v3408_v59 = vld [vmem:[%s8424_s1 + $0x1c0] sm:$0xff]  ;;  %v3394_v12 = vld [vmem:[%s8424_s1 + $0x150] sm:$0xff] }
 0x5fe   :  { %v3392_v40 = vld [vmem:[%s8424_s1 + $0x140] sm:$0xff] }
 0x600   :  { %v3507_v44 = vpop.permute.xlu1 %3506  ;;  %v3553_v25 = vpop.permute.xlu0 %3552 }
 0x601   :  { %v3605_v37 = vsel %vm3108_vm14, %v3589_v46, %v3507_v44  ;;  %v3620_v44 = vsel %vm3142_vm0, %v3604_v62, %v3553_v25  ;;  %v3405_v25 = vld [vmem:[%s8424_s1 + $0x1a8] sm:$0xff] }
 0x602   :  { %v3645_v9 = vmul.f32 %v3405_v25, %v8054_v26 }
 0x604   :  { %v3555_v5 = vpop.permute.xlu1 %3554  ;;  %v3461_v45 = vpop.permute.xlu0 %3460 }
 0x605   :  { %v3590_v41 = vsel %vm3075_vm13, %v8076_v29, %v3461_v45  ;;  %v3414_v29 = vld [vmem:[%s8424_s1 + $0x1f0] sm:$0xff]  ;;  %v3621_v49 = vsel %vm3142_vm0, %v3605_v37, %v3555_v5 }
 0x608   :  { %v3463_v24 = vpop.permute.xlu1 %3462  ;;  %v3509_v23 = vpop.permute.xlu0 %3508 }
 0x609   :  { %v3606_v21 = vsel %vm3108_vm14, %v3590_v41, %v3509_v23  ;;  %v3591_v42 = vsel %vm3075_vm13, %v8085_v48, %v3463_v24  ;;  %v3409_v48 = vld [vmem:[%s8424_s1 + $0x1c8] sm:$0xff]  ;;  %v3650_v24 = vmul.f32 %v3621_v49, %v3410_v32  ;;  %v3647_v41 = vmul.f32 %v3407_v57, %v8061_v55  ;;  %v3403_v55 = vld [vmem:[%s8424_s1 + $0x198] sm:$0xff] }
 0x60a   :  { %v3649_v45 = vmul.f32 %v3409_v48, %v8073_v51  ;;  %v3406_v51 = vld [vmem:[%s8424_s1 + $0x1b0] sm:$0xff]  ;;  %v3401_v48 = vld [vmem:[%s8424_s1 + $0x188] sm:$0xff]  ;;  %v3643_v32 = vmul.f32 %v3403_v55, %v8043_v3 }
 0x60b   :  { %v3646_v37 = vmul.f32 %v3619_v50, %v3406_v51  ;;  %v3667_v47 = vpack.c.bf16 %v3647_v41, %v3645_v9  ;;  %v3390_v51 = vld [vmem:[%s8424_s1 + $0x130] sm:$0xff] }
 0x60c   :  { %v3511_v22 = vpop.permute.xlu1 %3510  ;;  %v3557_v43 = vpop.permute.xlu0 %3556  ;;  %v3669_v19 = vpack.c.bf16 %v3651_v56, %v3649_v45  ;;  %v3399_v56 = vld [vmem:[%s8424_s1 + $0x178] sm:$0xff]  ;;  %v3393_v45 = vld [vmem:[%s8424_s1 + $0x148] sm:$0xff] }
 0x60d   :  { %v3622_v28 = vsel %vm3142_vm0, %v3606_v21, %v3557_v43  ;;  %v3607_v30 = vsel %vm3108_vm14, %v3591_v42, %v3511_v22  ;;  %v3648_v42 = vmul.f32 %v3620_v44, %v3408_v59  ;;  %v3639_v59 = vmul.f32 %v3399_v56, %v8025_v0  ;;  %v3391_v0 = vld [vmem:[%s8424_s1 + $0x138] sm:$0xff]  ;;  %v4937_v56 = vld [vmem:[%s8425_s2 + $0xa8] sm:$0xff]  }
 0x60e   :  { %v3652_v33 = vmul.f32 %v3622_v28, %v3412_v6 }
 0x610   :  { %v3559_v35 = vpop.permute.xlu1 %3558  ;;  %v3537_v18 = vpop.permute.xlu0 %3536 }
 0x611   :  { %v3623_v13 = vsel %vm3142_vm0, %v3607_v30, %v3559_v35  ;;  %v3612_v5 = vsel %vm3142_vm0, %v8160_v38, %v3537_v18  ;;  %v3586_v38 = vsel %vm3075_vm13, %v8054_v26, %v3453_v53  ;;  %v3585_v53 = vsel %vm3075_vm13, %v8043_v3, %v8189_v10  ;;  %v3402_v26 = vld [vmem:[%s8424_s1 + $0x190] sm:$0xff] }
 0x612   :  { %v3654_v1 = vmul.f32 %v3623_v13, %v3414_v29  ;;  %v3602_v46 = vsel %vm3108_vm14, %v3586_v38, %v3501_v34  ;;  %v8266_v6 = vmul.f32 %v3612_v5, %v3392_v40  ;;  %v3601_v29 = vsel %vm3108_vm14, %v3585_v53, %v8193_v7  ;;  %v3389_v38 = vld [vmem:[%s8424_s1 + $0x128] sm:$0xff] }
 0x613   :  { %v3618_v34 = vsel %vm3142_vm0, %v3602_v46, %v8199_v63  ;;  %v3668_v30 = vpack.c.bf16 %v3650_v24, %v3648_v42  ;;  %v3584_v63 = vsel %vm3075_vm13, %v8036_v20, %v8180_v14  ;;  %v3617_v7 = vsel %vm3142_vm0, %v3601_v29, %v8197_v11  ;;  %v3400_v14 = vld [vmem:[%s8424_s1 + $0x180] sm:$0xff]  ;;  %v3387_v46 = vld [vmem:[%s8424_s1 + $0x118] sm:$0xff] }
 0x614   :  { %v3670_v23 = vpack.c.bf16 %v3654_v1, %v3652_v33  ;;  %v3539_v22 = vpop.permute.xlu1 %3538  ;;  %v8251_v43 = vpop.permute.xlu0 %3436  ;;  %v3600_v49 = vsel %vm3108_vm14, %v3584_v63, %v8191_v27  ;;  %v3641_v11 = vmul.f32 %v3401_v48, %v8036_v20  ;;  %v3642_v3 = vmul.f32 %v3617_v7, %v3402_v26  ;;  %v3397_v1 = vld [vmem:[%s8424_s1 + $0x168] sm:$0xff] }
 0x615   :  { %v3613_v21 = vsel %vm3142_vm0, %v8165_v31, %v3539_v22  ;;  %v3404_v31 = vld [vmem:[%s8424_s1 + $0x1a0] sm:$0xff]  ;;  %v3616_v57 = vsel %vm3142_vm0, %v3600_v49, %v8195_v4  ;;  %v3395_v4 = vld [vmem:[%s8424_s1 + $0x158] sm:$0xff]  ;;  %v3637_v20 = vmul.f32 %v3397_v1, %v8018_v39  ;;  %v3633_v39 = vmul.f32 %v3393_v45, %v8006_v52 }
 0x616   :  { %v8268_v28 = vmul.f32 %v3613_v21, %v3394_v12  ;;  %3674 = vmatpush1.bf16.msra.mxu1 %v3670_v23  ;;  %v3644_v13 = vmul.f32 %v3618_v34, %v3404_v31  ;;  %v3665_v17 = vpack.c.bf16 %v3643_v32, %v3641_v11  ;;  %v3640_v44 = vmul.f32 %v3616_v57, %v3400_v14  ;;  %v4935_v49 = vld [vmem:[%s8425_s2 + $0xb8] sm:$0xff]   ;;  %v4938_v14 = vld [vmem:[%s8425_s2 + $0xa0] sm:$0xff]   ;;  %v4940_v11 = vld [vmem:[%s8425_s2 + $0x90] sm:$0xff]  }
 0x617   :  { %3675 = vmatprep.subr.bf16.mxu1 %v3669_v19  ;;  %v3663_v15 = vpack.c.bf16 %v3639_v59, %v3637_v20  ;;  %v3635_v24 = vmul.f32 %v3395_v4, %v8011_v8  ;;  %v3578_v8 = vsel %vm3075_vm13, %v8120_v36, %v8251_v43  ;;  %v3631_v52 = vmul.f32 %v3391_v0, %v8127_v60  ;;  %v3388_v43 = vld [vmem:[%s8424_s1 + $0x120] sm:$0xff]  ;;  %v4939_v57 = vld [vmem:[%s8425_s2 + $0x98] sm:$0xff]  }
 0x618   :  { %v3660_v35 = vpack.c.bf16 %v8268_v28, %v8266_v6  ;;  %v3439_v18 = vpop.permute.xlu1 %3438  ;;  %v3485_v10 = vpop.permute.xlu0 %3484  ;;  %v3666_v62 = vpack.c.bf16 %v3646_v37, %v3644_v13  ;;  %v3664_v40 = vpack.c.bf16 %v3642_v3, %v3640_v44  ;;  %v3629_v55 = vmul.f32 %v3389_v38, %v8120_v36  ;;  %v3384_v37 = vld [vmem:[%s8424_s1 + $0x100] sm:$0xff]  ;;  %v4936_v13 = vld [vmem:[%s8425_s2 + $0xb0] sm:$0xff]   ;;  %v4941_v3 = vld [vmem:[%s8425_s2 + $0x88] sm:$0xff]  }
 0x619   :  { %v3579_v23 = vsel %vm3075_vm13, %v8127_v60, %v3439_v18  ;;  %v3661_v21 = vpack.c.bf16 %v3635_v24, %v3633_v39  ;;  %v3594_v19 = vsel %vm3108_vm14, %v3578_v8, %v3485_v10  ;;  %v3627_v34 = vmul.f32 %v3387_v46, %v8145_v54  ;;  %v3386_v18 = vld [vmem:[%s8424_s1 + $0x110] sm:$0xff]  ;;  %v3736_v20 = vld [vmem:[%s8424_s1 + $0x203] ss:$0 sm:$0xff] }
 0x61a   :  { %3676 = vmatpush1.bf16.msra.mxu1 %v3668_v30  ;;  %v3625_v10 = vmul.f32 %v3385_v58, %v8138_v16  ;;  %v8893_v32 = vmov 0  }
 0x61b   :  { %3677 = vmatprep.subr.bf16.mxu1 %v3667_v47  ;;  %v3672_v47 = vld [vmem:[%s8425_s2 + $0xd8] sm:$0x1] }
 0x61c   :  { %v3487_v33 = vpop.permute.xlu1 %3486  ;;  %v3533_v27 = vpop.permute.xlu0 %3532 }
 0x61d   :  { %v3595_v22 = vsel %vm3108_vm14, %v3579_v23, %v3487_v33  ;;  %v3610_v42 = vsel %vm3142_vm0, %v3594_v19, %v3533_v27  ;;  %v4943_v33 = vld [vmem:[%s8425_s2 + $0xc8] sm:$0xff]  }
 0x61e   :  { %3678 = vmatpush1.bf16.msra.mxu1 %v3666_v62  ;;  %v3628_v9 = vmul.f32 %v3610_v42, %v3388_v43  ;;  %v4942_v62 = vld [vmem:[%s8425_s2 + $0xd0] sm:$0xff]  }
 0x61f   :  { %3679 = vmatprep.subr.bf16.mxu1 %v3665_v17 }
 0x620   :  { %v3535_v5 = vpop.permute.xlu1 %3534  ;;  %v3433_v12 = vpop.permute.xlu0 %3432 }
 0x621   :  { %v3611_v50 = vsel %vm3142_vm0, %v3595_v22, %v3535_v5  ;;  %v3576_v2 = vsel %vm3075_vm13, %v8138_v16, %v3433_v12  ;;  %v4934_v16 = vld [vmem:[%s8425_s2 + $0xc0] sm:$0xff]   ;;  %s5024_s2 = scalar_lea.vmem %s3848_s24, 32 }
 0x622   :  { %3680 = vmatpush1.bf16.msra.mxu1 %v3664_v40  ;;  %v3630_v60 = vmul.f32 %v3611_v50, %v3390_v51  ;;  %p5025_p0 = scmp.ne.s32.totalorder %s3848_s24, %s5024_s2  ;;  %p5030_p2 = scmp.lt.s32.totalorder %s5024_s2, %s5024_s2 }
 0x623   :  { %3681 = vmatprep.subr.bf16.mxu1 %v3663_v15 }
 0x624   :  { %v3435_v25 = vpop.permute.xlu1 %3434  ;;  %v3481_v41 = vpop.permute.xlu0 %3480  ;;  %v3658_v48 = vpack.c.bf16 %v3630_v60, %v3628_v9  ;;  %p5031_p3 = por %p5030_p2, %p5029_p1 }
 0x625   :  { %v3592_v29 = vsel %vm3108_vm14, %v3576_v2, %v3481_v41  ;;  %v3577_v36 = vsel %vm3075_vm13, %v8145_v54, %v3435_v25  ;;  %v3657_v54 = vpack.c.bf16 %v3627_v34, %v3625_v10 }
 0x626   :  { %3682 = vmatpush1.bf16.msra.mxu1 %v3662_v61  ;;  %v3659_v61 = vpack.c.bf16 %v3631_v52, %v3629_v55  ;;  %p5032_p4 = pnand %p5031_p3, %p5025_p0 }
 0x627   :  { %3683 = vmatprep.subr.bf16.mxu1 %v3661_v21 }
 0x628   :  { %v3483_v53 = vpop.permute.xlu1 %3482  ;;  %v3529_v31 = vpop.permute.xlu0 %3528 }
 0x629   :  { %v3608_v30 = vsel %vm3142_vm0, %v3592_v29, %v3529_v31  ;;  %v3593_v6 = vsel %vm3108_vm14, %v3577_v36, %v3483_v53 }
 0x62a   :  { %3684 = vmatpush1.bf16.msra.mxu1 %v3660_v35  ;;  %v3624_v63 = vmul.f32 %v3608_v30, %v3384_v37 }
 0x62b   :  { %3685 = vmatprep.subr.bf16.mxu1 %v3659_v61 }
 0x62c   :  { %v3531_v28 = vpop.permute.xlu1 %3530 }
 0x62d   :  { %v3609_v35 = vsel %vm3142_vm0, %v3593_v6, %v3531_v28 }
 0x62e   :  { %v3626_v26 = vmul.f32 %v3609_v35, %v3386_v18  ;;  %3686 = vmatpush1.bf16.msra.mxu1 %v3658_v48 }
 0x62f   :  { %3687 = vmatprep.subr.bf16.mxu1 %v3657_v54 }
 0x630   :  { %v3656_v7 = vpack.c.bf16 %v3626_v26, %v3624_v63 }
 0x632   :  { %3688 = vmatpush1.bf16.msra.mxu1 %v3656_v7 }
 0x633   :  { %3800 = vmatprep.subr.bf16.mxu1 %v8893_v32 }
 0x635   :  { %3706 = vmatmul.mubr.bf16.vlgmr.msra.gmra.mxu1 %v3672_v47 }
 0x636   :  { %3801 = vmatpush1.bf16.msra.mxu1 %v4934_v16 }
 0x637   :  { %3802 = vmatprep.subr.bf16.mxu1 %v8893_v32 }
 0x63a   :  { %3803 = vmatpush1.bf16.msra.mxu1 %v4935_v49 }
 0x63b   :  { %3804 = vmatprep.subr.bf16.mxu1 %v8893_v32 }
 0x63e   :  { %3805 = vmatpush1.bf16.msra.mxu1 %v4936_v13 }
 0x63f   :  { %3806 = vmatprep.subr.bf16.mxu1 %v8893_v32 }
 0x642   :  { %3807 = vmatpush1.bf16.msra.mxu1 %v4937_v56 }
 0x643   :  { %3808 = vmatprep.subr.bf16.mxu1 %v8893_v32 }
 0x646   :  { %3809 = vmatpush1.bf16.msra.mxu1 %v4938_v14 }
 0x647   :  { %3810 = vmatprep.subr.bf16.mxu1 %v8893_v32 }
 0x64a   :  { %3811 = vmatpush1.bf16.msra.mxu1 %v4939_v57 }
 0x64b   :  { %3812 = vmatprep.subr.bf16.mxu1 %v8893_v32 }
 0x64e   :  { %3813 = vmatpush1.bf16.msra.mxu1 %v4940_v11 }
 0x64f   :  { %3814 = vmatprep.subr.bf16.mxu1 %v8893_v32 }
 0x652   :  { %3815 = vmatpush1.bf16.msra.mxu1 %v4941_v3 }
 0x653   :  { %3828 = vmatprep.subr.bf16.mxu1 %v8893_v32 }
 0x656   :  { %3829 = vmatpush2.bf16.msra.mxu1 %v4942_v62 }
 0x657   :  { %3830 = vmatprep.subr.bf16.mxu1 %v8893_v32 }
 0x65a   :  { %3831 = vmatpush2.bf16.msra.mxu1 %v4943_v33 }
 0x6f5   :  { %v3707_v27 = vpop.f32.mrf.mxu1 }
 0x6f6   :  { %v3734_v59 = vpack.c.bf16 %v3707_v27, %v3707_v27 }
 0x6f7   :  { %v3709_v1 = vpop.f32.mrf.mxu1 }
 0x6f8   :  { %v3735_v17 = vpack.c.bf16 %v3709_v1, %v3709_v1 }
 0x6f9   :  { %v3711_v44 = vpop.f32.mrf.mxu1 }
 0x6fa   :  { %3906 = vmatprep.mubr.msk.bf16.mxu1 %vm3075_vm13, %v3735_v17 }
 0x6fb   :  { %v3712_v4 = vpop.f32.mrf.mxu1  ;;  %3833 = vmatmul.mubr.bf16.vlgmr.msra.gmra.mxu1 %v3734_v59 }
 0x7bb   :  { %v3834_v40 = vpop.f32.mrf.mxu1 }
 0x7bc   :  { %v3835_v5 = vadd.f32 %v3834_v40, %v3736_v20 }
 0x7bd   :  { %v3836_v12 = vpop.f32.mrf.mxu1 }
 0x7be   :  { %3840 = vst [vmem:[#allocation2] sm:$0x3] %v3835_v5 }
 0x7bf   :  { %v3837_v45 = vpop.f32.mrf.mxu1 }
 0x7c0   :  { %5035 = shalt.err (!%p5032_p4)
}
 0x7c1   :  { %3850 = dma.vmem_to_hbm [thread:$0]  %s3848_s24, 32, %s8426_s3, [#allocation3]   ;;  %v3838_v15 = vpop.f32.mrf.mxu1 }
 0x7c2   :  { %5044 = dma.done.wait [#allocation3], 32  }
 0x7c3   :  { %5045 = vsyncadd [#allocation3], 4294967264 }
 0x7c4   :  { %3854 = vsyncpa [#allocation3], 1 }

</bundles_post_ra>
